<compile_context>
chip_gen: v6e
topology: v6e:2x2x1
jax: 0.10.0
libtpu: 0.0.40
codegen_flags: <defaults>
</compile_context>

<pallas_src>
import functools

import jax
import jax.numpy as jnp
from jax.experimental import pallas as pl
from jax.experimental.pallas import tpu as pltpu


# --------------------------------------------------------------------------
# helpers (same semantics as adell_mri.split_int_into_n)
# --------------------------------------------------------------------------
def split_int_into_n(i, n):
    r = i % n
    o = [i // n for _ in range(n)]
    idx = 0
    while r > 0:
        o[idx] += 1
        r -= 1
        idx += 1
    return o


def _same_pads(k, dilation):
    # matches torch.nn.Conv2d(padding='same'): pad_before = total//2, rest after
    total = dilation * (k - 1)
    lo = total // 2
    return (lo, total - lo)


@functools.lru_cache(maxsize=None)
def _vmem_limit():
    """Generation-aware scoped-VMEM budget (v5e/v6e: 128 MiB, v7x: 64 MiB)."""
    try:
        cap = int(pltpu.get_tpu_info().vmem_capacity_bytes)
    except Exception:
        cap = 64 * 1024 * 1024                # conservative (v7x-sized) fallback
    return min(max(cap * 3 // 4, 32 * 1024 * 1024), 96 * 1024 * 1024)


# --------------------------------------------------------------------------
# stage 1+2 fused: entry 1x1 conv + spatial conv chain, one branch per call
# --------------------------------------------------------------------------
def _branch_kernel(*refs, conv_shapes, H, W):
    """Channel-major branch kernel.

    refs = [x(1,Cin,HW), weT(o,Cin), be(o,1),
            (wm_i(o,k*k*o), b_i(o,1)) per spatial conv ...,
            out(1,o,HW),
            pad_i(o,H+pt_i,W+pt_i) bf16 scratch per spatial conv ...]
    """
    n_conv = len(conv_shapes)
    x_ref, we_ref, be_ref = refs[0], refs[1], refs[2]
    out_ref = refs[3 + 2 * n_conv]
    pad_refs = refs[4 + 2 * n_conv:]
    o = we_ref.shape[0]
    HW = H * W

    # entry 1x1 conv: (o,Cin)@(Cin,HW) -> (o,HW); f32 accumulate + f32 bias
    x = x_ref[0].astype(jnp.bfloat16)
    h = jnp.dot(we_ref[...], x, preferred_element_type=jnp.float32) + be_ref[...]

    for ci, (k, d) in enumerate(conv_shapes):
        wm_ref = refs[3 + 2 * ci]
        b_ref = refs[4 + 2 * ci]
        pad_ref = pad_refs[ci]
        pt = d * (k - 1)
        lo, hi = pt // 2, pt - pt // 2
        Hp, Wp = H + pt, W + pt

        # Zero ONLY the border ring of the bf16 pad scratch (the interior is
        # fully overwritten right below).  Done every grid step so megacore
        # grid sharding (v7x, 2 TCs) can never observe an uninitialized ring.
        if lo > 0:
            pad_ref[:, :lo, :] = jnp.zeros((o, lo, Wp), jnp.bfloat16)
            pad_ref[:, :, :lo] = jnp.zeros((o, Hp, lo), jnp.bfloat16)
        if hi > 0:
            pad_ref[:, lo + H:, :] = jnp.zeros((o, hi, Wp), jnp.bfloat16)
            pad_ref[:, :, lo + W:] = jnp.zeros((o, Hp, hi), jnp.bfloat16)
        pad_ref[:, lo:lo + H, lo:lo + W] = h.reshape(o, H, W).astype(jnp.bfloat16)

        # im2col in VMEM: ONE wide-contraction MXU dot per conv (K = k*k*o)
        # instead of k*k skinny K=o dots.
        # TODO(synk): do the dx shift with pltpu.roll along W (full-padded-width
        # GEMM + final column slice) to avoid the strided tap windows entirely.
        cols = []
        for dy in range(k):
            for dx in range(k):
                win = pad_ref[:, dy * d:dy * d + H, dx * d:dx * d + W]  # (o,H,W)
                cols.append(win.reshape(o, HW))
        col = jnp.concatenate(cols, axis=0)                    # (k*k*o, HW) bf16
        h = jnp.dot(wm_ref[...], col,
                    preferred_element_type=jnp.float32) + b_ref[...]   # f32

    out_ref[0] = h.astype(out_ref.dtype)


def branch_chain(x_cm, we_T, be, conv_list, H, W):
    """x_cm: (N, Cin, H*W) f32; returns (N, o, H*W) bf16 branch activation."""
    N, Cin, HW = x_cm.shape
    o = we_T.shape[0]
    conv_shapes = tuple((k, d) for (_, _, k, d) in conv_list)

    args = [x_cm, we_T, be]
    in_specs = [pl.BlockSpec((1, Cin, HW), lambda n: (n, 0, 0)),
                pl.BlockSpec((o, Cin), lambda n: (0, 0)),
                pl.BlockSpec((o, 1), lambda n: (0, 0))]
    scratch_shapes = []
    flops = 2 * N * HW * Cin * o
    scratch_bytes, max_kk = 0, 1
    for wm, bb, k, d in conv_list:
        args += [wm, bb]
        in_specs += [pl.BlockSpec((o, k * k * o), lambda n: (0, 0)),
                     pl.BlockSpec((o, 1), lambda n: (0, 0))]
        pt = d * (k - 1)
        scratch_shapes.append(pltpu.VMEM((o, H + pt, W + pt), jnp.bfloat16))
        scratch_bytes += o * (H + pt) * (W + pt) * 2
        max_kk = max(max_kk, k * k)
        flops += 2 * N * HW * (k * k * o) * o

    # whole-image-per-step VMEM budget check (double-buffered x/out blocks,
    # bf16 pad scratches, largest in-VMEM im2col value).
    est = 2 * (Cin * HW * 4 + o * HW * 2) + scratch_bytes + max_kk * o * HW * 2
    if est > _vmem_limit():
        # TODO(synk): halo-tile H (grid=(N, H//th)) so large images fit the
        # per-generation VMEM budget and both v7x TensorCores get work.
        raise NotImplementedError(
            f"branch tile needs ~{est} B VMEM > budget {_vmem_limit()} B")

    return pl.pallas_call(
        functools.partial(_branch_kernel, conv_shapes=conv_shapes, H=H, W=W),
        out_shape=jax.ShapeDtypeStruct((N, o, HW), jnp.bfloat16),
        grid=(N,),
        in_specs=in_specs,
        out_specs=pl.BlockSpec((1, o, HW), lambda n: (n, 0, 0)),
        scratch_shapes=scratch_shapes,
        compiler_params=pltpu.CompilerParams(
            dimension_semantics=("parallel",),
            vmem_limit_bytes=_vmem_limit()),
        cost_estimate=pl.CostEstimate(
            flops=int(flops), transcendentals=0,
            bytes_accessed=int(N * HW * (Cin * 4 + o * 2))),
    )(*args)


# --------------------------------------------------------------------------
# stage 3: final 1x1 conv + residual, concat built in VMEM (single wide-K dot)
# --------------------------------------------------------------------------
def _final_kernel(*refs, n_br):
    """refs = [br_0..br_{n-1}(1,o_i,thw), wfT(Cout,total_o), bias(Cout,1),
               x(1,Cin,thw), out(1,Cout,thw)]."""
    wf_ref = refs[n_br]
    b_ref = refs[n_br + 1]
    x_ref = refs[n_br + 2]
    o_ref = refs[n_br + 3]
    cat = jnp.concatenate([refs[i][0] for i in range(n_br)], axis=0)  # VMEM only
    acc = jnp.dot(wf_ref[...], cat, preferred_element_type=jnp.float32)
    acc = acc + b_ref[...] + x_ref[0].astype(jnp.float32)
    o_ref[0] = acc.astype(o_ref.dtype)


def _pick_hw_tile(HW, target=2048):
    """Largest lane-dense (multiple-of-128) divisor of HW up to `target`."""
    if HW <= target or HW % 128 != 0:
        return HW
    best = 128
    for t in range(128, target + 1, 128):
        if HW % t == 0:
            best = t
    return best


def fused_final_1x1_residual(branch_outs, wfT, bias, x_cm, out_dtype):
    N, Cin, HW = x_cm.shape
    Cout, total_o = wfT.shape
    thw = _pick_hw_tile(HW)
    n_br = len(branch_outs)

    args, in_specs = [], []
    for bo in branch_outs:
        oi = bo.shape[1]
        args.append(bo)
        in_specs.append(pl.BlockSpec((1, oi, thw), lambda n, t: (n, 0, t)))
    args += [wfT, bias, x_cm]
    in_specs += [pl.BlockSpec((Cout, total_o), lambda n, t: (0, 0)),
                 pl.BlockSpec((Cout, 1), lambda n, t: (0, 0)),
                 pl.BlockSpec((1, Cin, thw), lambda n, t: (n, 0, t))]

    return pl.pallas_call(
        functools.partial(_final_kernel, n_br=n_br),
        out_shape=jax.ShapeDtypeStruct((N, Cout, HW), out_dtype),
        grid=(N, HW // thw),
        in_specs=in_specs,
        out_specs=pl.BlockSpec((1, Cout, thw), lambda n, t: (n, 0, t)),
        compiler_params=pltpu.CompilerParams(
            dimension_semantics=("parallel", "parallel"),
            vmem_limit_bytes=_vmem_limit()),
        cost_estimate=pl.CostEstimate(
            flops=int(2 * N * HW * total_o * Cout),
            transcendentals=0,
            bytes_accessed=int(N * HW * (total_o * 2 + Cin * 4 + Cout * 4))),
    )(*args)


# --------------------------------------------------------------------------
# ReceptiveFieldBlock2d parameters + forward (adn_fn == Identity)
# --------------------------------------------------------------------------
def init_rfb2d_params(key, in_channels, out_channels, rates):
    out_c_list = split_int_into_n(out_channels, len(rates))

    def conv_p(k, cin, cout, ksize):
        kw, kb = jax.random.split(k)
        bound = 1.0 / float(cin * ksize * ksize) ** 0.5
        w = jax.random.uniform(kw, (ksize, ksize, cin, cout),
                               jnp.float32, -bound, bound)          # HWIO
        b = jax.random.uniform(kb, (cout,), jnp.float32, -bound, bound)
        return {"w": w, "b": b}

    keys = jax.random.split(key, len(rates) + 1)
    branches = []
    for rate, o, bk in zip(rates, out_c_list, keys[:-1]):
        bks = jax.random.split(bk, 3)
        layers = [(conv_p(bks[0], in_channels, o, 1), 1)]            # 1x1 entry
        if rate == 1:
            layers.append((conv_p(bks[1], o, o, 3), 1))              # 3x3
        else:
            layers.append((conv_p(bks[1], o, o, rate), 1))           # rate x rate
            layers.append((conv_p(bks[2], o, o, 3), rate))           # 3x3 dilated
        branches.append(layers)
    final = conv_p(keys[-1], out_channels, out_channels, 1)
    return {"branches": branches, "final": final}


def rfb2d_forward(params, x_nchw):
    # TODO(synk): adn_fn other than Identity (norm/activation) not implemented.
    N, Cin, H, W = x_nchw.shape
    HW = H * W
    x_cm = x_nchw.reshape(N, Cin, HW)       # free reshape: NCHW == (N, C, H*W)

    branches = params["branches"]
    out_sizes = [br[0][0]["w"].shape[-1] for br in branches]

    branch_outs = []
    for br, o in zip(branches, out_sizes):
        entry = br[0][0]
        we_T = entry["w"].reshape(Cin, o).T.astype(jnp.bfloat16)     # (o, Cin)
        be = entry["b"].reshape(o, 1).astype(jnp.float32)
        conv_list = []
        for p, dil in br[1:]:
            k = p["w"].shape[0]
            # Wm[c_out, (dy*k+dx)*o + c_in] = w[dy, dx, c_in, c_out]
            wm = p["w"].transpose(3, 0, 1, 2).reshape(o, k * k * o)
            conv_list.append((wm.astype(jnp.bfloat16),
                              p["b"].reshape(o, 1).astype(jnp.float32), k, dil))
        branch_outs.append(branch_chain(x_cm, we_T, be, conv_list, H, W))

    Cout = params["final"]["w"].shape[-1]
    total_o = sum(out_sizes)
    assert Cin == Cout, "residual add requires in_channels == out_channels"
    wfT = params["final"]["w"].reshape(total_o, Cout).T.astype(jnp.bfloat16)
    bf = params["final"]["b"].reshape(Cout, 1).astype(jnp.float32)
    out_cm = fused_final_1x1_residual(branch_outs, wfT, bf, x_cm, x_nchw.dtype)
    return out_cm.reshape(N, Cout, H, W)    # free reshape back to NCHW


# --------------------------------------------------------------------------
# pure-JAX f32 reference (lax.conv) for correctness check
# --------------------------------------------------------------------------
def _conv_ref(h, w, b, dil):
    KH, KW = w.shape[0], w.shape[1]
    out = jax.lax.conv_general_dilated(
        h, w, window_strides=(1, 1),
        padding=[_same_pads(KH, dil), _same_pads(KW, dil)],
        rhs_dilation=(dil, dil),
        dimension_numbers=("NHWC", "HWIO", "NHWC"))
    return out + b


def rfb2d_forward_ref(params, x_nchw):
    x = jnp.transpose(x_nchw, (0, 2, 3, 1))
    outs = []
    for layers in params["branches"]:
        h = x
        for p, dil in layers:
            h = _conv_ref(h, p["w"], p["b"], dil)
        outs.append(h)
    cat = jnp.concatenate(outs, axis=-1)
    out = x + _conv_ref(cat, params["final"]["w"], params["final"]["b"], 1)
    return jnp.transpose(out, (0, 3, 1, 2))


# --------------------------------------------------------------------------
if __name__ == "__main__":
    key = jax.random.PRNGKey(0)
    kx, kp = jax.random.split(key)

    in_channels = 4
    out_channels = 4          # residual X + output requires in == out
    rates = [1, 3]
    N, H, W = 2, 16, 16

    x = jax.random.normal(kx, (N, in_channels, H, W), jnp.float32)
    params = init_rfb2d_params(kp, in_channels, out_channels, rates)

    fwd = jax.jit(functools.partial(rfb2d_forward, params))
    y = jax.block_until_ready(fwd(x))
    assert y.shape == (N, out_channels, H, W), y.shape

    y_ref = rfb2d_forward_ref(params, x)
    err = float(jnp.max(jnp.abs(y - y_ref)))
    # bf16 MXU path vs f32 reference -> loosened tolerance
    assert jnp.allclose(y, y_ref, rtol=5e-2, atol=5e-2), err

    print("KERNEL_OK")
</pallas_src>

<mosaic_0001>
module attributes {stable_mosaic.version = 11 : i64} {
  func.func @_branch_kernel(%arg0: i32, %arg1: memref<1x4x256xf32, #tpu.memory_space<vmem>>, %arg2: memref<2x4xbf16, #tpu.memory_space<vmem>>, %arg3: memref<2x1xf32, #tpu.memory_space<vmem>>, %arg4: memref<2x18xbf16, #tpu.memory_space<vmem>>, %arg5: memref<2x1xf32, #tpu.memory_space<vmem>>, %arg6: memref<1x2x256xbf16, #tpu.memory_space<vmem>>, %arg7: memref<2x18x18xbf16, #tpu.memory_space<vmem>>) attributes {dimension_semantics = [#tpu.dimension_semantics<parallel>], iteration_bounds = array<i64: 2>, scalar_prefetch = 0 : i64, scratch_operands = 1 : i64, tpu.core_type = #tpu.core_type<tc>, window_params = [{transform_indices = @transform_0, window_bounds = array<i64: 1, 4, 256>}, {pipeline_mode = #tpu.pipeline_mode<synchronous>, transform_indices = @transform_1, window_bounds = array<i64: 2, 4>}, {pipeline_mode = #tpu.pipeline_mode<synchronous>, transform_indices = @transform_2, window_bounds = array<i64: 2, 1>}, {pipeline_mode = #tpu.pipeline_mode<synchronous>, transform_indices = @transform_3, window_bounds = array<i64: 2, 18>}, {pipeline_mode = #tpu.pipeline_mode<synchronous>, transform_indices = @transform_4, window_bounds = array<i64: 2, 1>}, {transform_indices = @transform_5, window_bounds = array<i64: 1, 2, 256>}]} {
    %c0 = arith.constant 0 : index
    %c0_0 = arith.constant 0 : index
    %c0_1 = arith.constant 0 : index
    %0 = vector.load %arg1[%c0, %c0_0, %c0_1] : memref<1x4x256xf32, #tpu.memory_space<vmem>>, vector<1x4x256xf32>
    %1 = vector.shape_cast %0 : vector<1x4x256xf32> to vector<4x256xf32>
    %2 = arith.truncf %1 : vector<4x256xf32> to vector<4x256xbf16>
    %c0_2 = arith.constant 0 : index
    %c0_3 = arith.constant 0 : index
    %3 = vector.load %arg2[%c0_2, %c0_3] : memref<2x4xbf16, #tpu.memory_space<vmem>>, vector<2x4xbf16>
    %cst = arith.constant dense<0.000000e+00> : vector<2x256xf32>
    %4 = tpu.matmul %3, %2, %cst {dimension_numbers = #tpu.dot_dimension_numbers<[1], [0], [0], [1], [0, 0, 1, 1], [], []>} : vector<2x4xbf16>, vector<4x256xbf16>, vector<2x256xf32> -> vector<2x256xf32>
    %c0_4 = arith.constant 0 : index
    %c0_5 = arith.constant 0 : index
    %5 = vector.load %arg3[%c0_4, %c0_5] : memref<2x1xf32, #tpu.memory_space<vmem>>, vector<2x1xf32>
    %6 = vector.broadcast %5 : vector<2x1xf32> to vector<2x256xf32>
    %7 = arith.addf %4, %6 : vector<2x256xf32>
    %cst_6 = arith.constant 0.000000e+00 : bf16
    %8 = vector.broadcast %cst_6 : bf16 to vector<2x1x18xbf16>
    %c0_7 = arith.constant 0 : index
    %c0_8 = arith.constant 0 : index
    %c0_9 = arith.constant 0 : index
    %9 = vector.load %arg7[%c0_7, %c0_8, %c0_9] : memref<2x18x18xbf16, #tpu.memory_space<vmem>>, vector<2x1x18xbf16>
    tpu.vector_store %arg7[%c0_7, %c0_8, %c0_9], %8 {strides = array<i32>} : memref<2x18x18xbf16, #tpu.memory_space<vmem>>, vector<2x1x18xbf16>,
    %cst_10 = arith.constant 0.000000e+00 : bf16
    %10 = vector.broadcast %cst_10 : bf16 to vector<2x18x1xbf16>
    %c0_11 = arith.constant 0 : index
    %c0_12 = arith.constant 0 : index
    %c0_13 = arith.constant 0 : index
    %11 = vector.load %arg7[%c0_11, %c0_12, %c0_13] : memref<2x18x18xbf16, #tpu.memory_space<vmem>>, vector<2x18x1xbf16>
    tpu.vector_store %arg7[%c0_11, %c0_12, %c0_13], %10 {strides = array<i32>} : memref<2x18x18xbf16, #tpu.memory_space<vmem>>, vector<2x18x1xbf16>,
    %cst_14 = arith.constant 0.000000e+00 : bf16
    %12 = vector.broadcast %cst_14 : bf16 to vector<2x1x18xbf16>
    %c0_15 = arith.constant 0 : index
    %c17 = arith.constant 17 : index
    %c0_16 = arith.constant 0 : index
    %13 = vector.load %arg7[%c0_15, %c17, %c0_16] : memref<2x18x18xbf16, #tpu.memory_space<vmem>>, vector<2x1x18xbf16>
    tpu.vector_store %arg7[%c0_15, %c17, %c0_16], %12 {strides = array<i32>} : memref<2x18x18xbf16, #tpu.memory_space<vmem>>, vector<2x1x18xbf16>,
    %cst_17 = arith.constant 0.000000e+00 : bf16
    %14 = vector.broadcast %cst_17 : bf16 to vector<2x18x1xbf16>
    %c0_18 = arith.constant 0 : index
    %c0_19 = arith.constant 0 : index
    %c17_20 = arith.constant 17 : index
    %15 = vector.load %arg7[%c0_18, %c0_19, %c17_20] : memref<2x18x18xbf16, #tpu.memory_space<vmem>>, vector<2x18x1xbf16>
    tpu.vector_store %arg7[%c0_18, %c0_19, %c17_20], %14 {strides = array<i32>} : memref<2x18x18xbf16, #tpu.memory_space<vmem>>, vector<2x18x1xbf16>,
    %16 = vector.shape_cast %7 : vector<2x256xf32> to vector<2x16x16xf32>
    %17 = arith.truncf %16 : vector<2x16x16xf32> to vector<2x16x16xbf16>
    %c0_21 = arith.constant 0 : index
    %c1 = arith.constant 1 : index
    %c1_22 = arith.constant 1 : index
    %18 = vector.load %arg7[%c0_21, %c1, %c1_22] : memref<2x18x18xbf16, #tpu.memory_space<vmem>>, vector<2x16x16xbf16>
    tpu.vector_store %arg7[%c0_21, %c1, %c1_22], %17 {strides = array<i32>} : memref<2x18x18xbf16, #tpu.memory_space<vmem>>, vector<2x16x16xbf16>,
    %c0_23 = arith.constant 0 : index
    %c0_24 = arith.constant 0 : index
    %c0_25 = arith.constant 0 : index
    %19 = vector.load %arg7[%c0_23, %c0_24, %c0_25] : memref<2x18x18xbf16, #tpu.memory_space<vmem>>, vector<2x16x16xbf16>
    %20 = vector.shape_cast %19 : vector<2x16x16xbf16> to vector<2x256xbf16>
    %c0_26 = arith.constant 0 : index
    %c0_27 = arith.constant 0 : index
    %c1_28 = arith.constant 1 : index
    %21 = vector.load %arg7[%c0_26, %c0_27, %c1_28] : memref<2x18x18xbf16, #tpu.memory_space<vmem>>, vector<2x16x16xbf16>
    %22 = vector.shape_cast %21 : vector<2x16x16xbf16> to vector<2x256xbf16>
    %c0_29 = arith.constant 0 : index
    %c0_30 = arith.constant 0 : index
    %c2 = arith.constant 2 : index
    %23 = vector.load %arg7[%c0_29, %c0_30, %c2] : memref<2x18x18xbf16, #tpu.memory_space<vmem>>, vector<2x16x16xbf16>
    %24 = vector.shape_cast %23 : vector<2x16x16xbf16> to vector<2x256xbf16>
    %c0_31 = arith.constant 0 : index
    %c1_32 = arith.constant 1 : index
    %c0_33 = arith.constant 0 : index
    %25 = vector.load %arg7[%c0_31, %c1_32, %c0_33] : memref<2x18x18xbf16, #tpu.memory_space<vmem>>, vector<2x16x16xbf16>
    %26 = vector.shape_cast %25 : vector<2x16x16xbf16> to vector<2x256xbf16>
    %c0_34 = arith.constant 0 : index
    %c1_35 = arith.constant 1 : index
    %c1_36 = arith.constant 1 : index
    %27 = vector.load %arg7[%c0_34, %c1_35, %c1_36] : memref<2x18x18xbf16, #tpu.memory_space<vmem>>, vector<2x16x16xbf16>
    %28 = vector.shape_cast %27 : vector<2x16x16xbf16> to vector<2x256xbf16>
    %c0_37 = arith.constant 0 : index
    %c1_38 = arith.constant 1 : index
    %c2_39 = arith.constant 2 : index
    %29 = vector.load %arg7[%c0_37, %c1_38, %c2_39] : memref<2x18x18xbf16, #tpu.memory_space<vmem>>, vector<2x16x16xbf16>
    %30 = vector.shape_cast %29 : vector<2x16x16xbf16> to vector<2x256xbf16>
    %c0_40 = arith.constant 0 : index
    %c2_41 = arith.constant 2 : index
    %c0_42 = arith.constant 0 : index
    %31 = vector.load %arg7[%c0_40, %c2_41, %c0_42] : memref<2x18x18xbf16, #tpu.memory_space<vmem>>, vector<2x16x16xbf16>
    %32 = vector.shape_cast %31 : vector<2x16x16xbf16> to vector<2x256xbf16>
    %c0_43 = arith.constant 0 : index
    %c2_44 = arith.constant 2 : index
    %c1_45 = arith.constant 1 : index
    %33 = vector.load %arg7[%c0_43, %c2_44, %c1_45] : memref<2x18x18xbf16, #tpu.memory_space<vmem>>, vector<2x16x16xbf16>
    %34 = vector.shape_cast %33 : vector<2x16x16xbf16> to vector<2x256xbf16>
    %c0_46 = arith.constant 0 : index
    %c2_47 = arith.constant 2 : index
    %c2_48 = arith.constant 2 : index
    %35 = vector.load %arg7[%c0_46, %c2_47, %c2_48] : memref<2x18x18xbf16, #tpu.memory_space<vmem>>, vector<2x16x16xbf16>
    %36 = vector.shape_cast %35 : vector<2x16x16xbf16> to vector<2x256xbf16>
    %37 = tpu.concatenate %20, %22, %24, %26, %28, %30, %32, %34, %36 in 0 : vector<2x256xbf16>, vector<2x256xbf16>, vector<2x256xbf16>, vector<2x256xbf16>, vector<2x256xbf16>, vector<2x256xbf16>, vector<2x256xbf16>, vector<2x256xbf16>, vector<2x256xbf16> -> vector<18x256xbf16>
    %c0_49 = arith.constant 0 : index
    %c0_50 = arith.constant 0 : index
    %38 = vector.load %arg4[%c0_49, %c0_50] : memref<2x18xbf16, #tpu.memory_space<vmem>>, vector<2x18xbf16>
    %cst_51 = arith.constant dense<0.000000e+00> : vector<2x256xf32>
    %39 = tpu.matmul %38, %37, %cst_51 {dimension_numbers = #tpu.dot_dimension_numbers<[1], [0], [0], [1], [0, 0, 1, 1], [], []>} : vector<2x18xbf16>, vector<18x256xbf16>, vector<2x256xf32> -> vector<2x256xf32>
    %c0_52 = arith.constant 0 : index
    %c0_53 = arith.constant 0 : index
    %40 = vector.load %arg5[%c0_52, %c0_53] : memref<2x1xf32, #tpu.memory_space<vmem>>, vector<2x1xf32>
    %41 = vector.broadcast %40 : vector<2x1xf32> to vector<2x256xf32>
    %42 = arith.addf %39, %41 : vector<2x256xf32>
    %43 = arith.truncf %42 : vector<2x256xf32> to vector<2x256xbf16>
    %c0_54 = arith.constant 0 : index
    %c0_55 = arith.constant 0 : index
    %c0_56 = arith.constant 0 : index
    %44 = vector.load %arg6[%c0_54, %c0_55, %c0_56] : memref<1x2x256xbf16, #tpu.memory_space<vmem>>, vector<1x2x256xbf16>
    %45 = vector.shape_cast %44 : vector<1x2x256xbf16> to vector<2x256xbf16>
    %46 = vector.shape_cast %43 : vector<2x256xbf16> to vector<1x2x256xbf16>
    tpu.vector_store %arg6[%c0_54, %c0_55, %c0_56], %46 {strides = array<i32>} : memref<1x2x256xbf16, #tpu.memory_space<vmem>>, vector<1x2x256xbf16>,
    return
  }
  func.func @transform_0(%arg0: i32) -> (i32, i32, i32) {
    %c0_i32 = arith.constant 0 : i32
    %c0_i32_0 = arith.constant 0 : i32
    %c0_i32_1 = arith.constant 0 : i32
    return %arg0, %c0_i32, %c0_i32_0 : i32, i32, i32
  }
  func.func @transform_1(%arg0: i32) -> (i32, i32) {
    %c0_i32 = arith.constant 0 : i32
    %c0_i32_0 = arith.constant 0 : i32
    %c0_i32_1 = arith.constant 0 : i32
    return %c0_i32, %c0_i32_0 : i32, i32
  }
  func.func @transform_2(%arg0: i32) -> (i32, i32) {
    %c0_i32 = arith.constant 0 : i32
    %c0_i32_0 = arith.constant 0 : i32
    %c0_i32_1 = arith.constant 0 : i32
    return %c0_i32, %c0_i32_0 : i32, i32
  }
  func.func @transform_3(%arg0: i32) -> (i32, i32) {
    %c0_i32 = arith.constant 0 : i32
    %c0_i32_0 = arith.constant 0 : i32
    %c0_i32_1 = arith.constant 0 : i32
    return %c0_i32, %c0_i32_0 : i32, i32
  }
  func.func @transform_4(%arg0: i32) -> (i32, i32) {
    %c0_i32 = arith.constant 0 : i32
    %c0_i32_0 = arith.constant 0 : i32
    %c0_i32_1 = arith.constant 0 : i32
    return %c0_i32, %c0_i32_0 : i32, i32
  }
  func.func @transform_5(%arg0: i32) -> (i32, i32, i32) {
    %c0_i32 = arith.constant 0 : i32
    %c0_i32_0 = arith.constant 0 : i32
    %c0_i32_1 = arith.constant 0 : i32
    return %arg0, %c0_i32, %c0_i32_0 : i32, i32, i32
  }
}

module attributes {stable_mosaic.version = 11 : i64} {
  func.func @_branch_kernel(%arg0: i32, %arg1: memref<1x4x256xf32, #tpu.memory_space<vmem>>, %arg2: memref<2x4xbf16, #tpu.memory_space<vmem>>, %arg3: memref<2x1xf32, #tpu.memory_space<vmem>>, %arg4: memref<2x18xbf16, #tpu.memory_space<vmem>>, %arg5: memref<2x1xf32, #tpu.memory_space<vmem>>, %arg6: memref<2x18xbf16, #tpu.memory_space<vmem>>, %arg7: memref<2x1xf32, #tpu.memory_space<vmem>>, %arg8: memref<1x2x256xbf16, #tpu.memory_space<vmem>>, %arg9: memref<2x18x18xbf16, #tpu.memory_space<vmem>>, %arg10: memref<2x22x22xbf16, #tpu.memory_space<vmem>>) attributes {dimension_semantics = [#tpu.dimension_semantics<parallel>], iteration_bounds = array<i64: 2>, scalar_prefetch = 0 : i64, scratch_operands = 2 : i64, tpu.core_type = #tpu.core_type<tc>, window_params = [{transform_indices = @transform_0, window_bounds = array<i64: 1, 4, 256>}, {pipeline_mode = #tpu.pipeline_mode<synchronous>, transform_indices = @transform_1, window_bounds = array<i64: 2, 4>}, {pipeline_mode = #tpu.pipeline_mode<synchronous>, transform_indices = @transform_2, window_bounds = array<i64: 2, 1>}, {pipeline_mode = #tpu.pipeline_mode<synchronous>, transform_indices = @transform_3, window_bounds = array<i64: 2, 18>}, {pipeline_mode = #tpu.pipeline_mode<synchronous>, transform_indices = @transform_4, window_bounds = array<i64: 2, 1>}, {pipeline_mode = #tpu.pipeline_mode<synchronous>, transform_indices = @transform_5, window_bounds = array<i64: 2, 18>}, {pipeline_mode = #tpu.pipeline_mode<synchronous>, transform_indices = @transform_6, window_bounds = array<i64: 2, 1>}, {transform_indices = @transform_7, window_bounds = array<i64: 1, 2, 256>}]} {
    %c0 = arith.constant 0 : index
    %c0_0 = arith.constant 0 : index
    %c0_1 = arith.constant 0 : index
    %0 = vector.load %arg1[%c0, %c0_0, %c0_1] : memref<1x4x256xf32, #tpu.memory_space<vmem>>, vector<1x4x256xf32>
    %1 = vector.shape_cast %0 : vector<1x4x256xf32> to vector<4x256xf32>
    %2 = arith.truncf %1 : vector<4x256xf32> to vector<4x256xbf16>
    %c0_2 = arith.constant 0 : index
    %c0_3 = arith.constant 0 : index
    %3 = vector.load %arg2[%c0_2, %c0_3] : memref<2x4xbf16, #tpu.memory_space<vmem>>, vector<2x4xbf16>
    %cst = arith.constant dense<0.000000e+00> : vector<2x256xf32>
    %4 = tpu.matmul %3, %2, %cst {dimension_numbers = #tpu.dot_dimension_numbers<[1], [0], [0], [1], [0, 0, 1, 1], [], []>} : vector<2x4xbf16>, vector<4x256xbf16>, vector<2x256xf32> -> vector<2x256xf32>
    %c0_4 = arith.constant 0 : index
    %c0_5 = arith.constant 0 : index
    %5 = vector.load %arg3[%c0_4, %c0_5] : memref<2x1xf32, #tpu.memory_space<vmem>>, vector<2x1xf32>
    %6 = vector.broadcast %5 : vector<2x1xf32> to vector<2x256xf32>
    %7 = arith.addf %4, %6 : vector<2x256xf32>
    %cst_6 = arith.constant 0.000000e+00 : bf16
    %8 = vector.broadcast %cst_6 : bf16 to vector<2x1x18xbf16>
    %c0_7 = arith.constant 0 : index
    %c0_8 = arith.constant 0 : index
    %c0_9 = arith.constant 0 : index
    %9 = vector.load %arg9[%c0_7, %c0_8, %c0_9] : memref<2x18x18xbf16, #tpu.memory_space<vmem>>, vector<2x1x18xbf16>
    tpu.vector_store %arg9[%c0_7, %c0_8, %c0_9], %8 {strides = array<i32>} : memref<2x18x18xbf16, #tpu.memory_space<vmem>>, vector<2x1x18xbf16>,
    %cst_10 = arith.constant 0.000000e+00 : bf16
    %10 = vector.broadcast %cst_10 : bf16 to vector<2x18x1xbf16>
    %c0_11 = arith.constant 0 : index
    %c0_12 = arith.constant 0 : index
    %c0_13 = arith.constant 0 : index
    %11 = vector.load %arg9[%c0_11, %c0_12, %c0_13] : memref<2x18x18xbf16, #tpu.memory_space<vmem>>, vector<2x18x1xbf16>
    tpu.vector_store %arg9[%c0_11, %c0_12, %c0_13], %10 {strides = array<i32>} : memref<2x18x18xbf16, #tpu.memory_space<vmem>>, vector<2x18x1xbf16>,
    %cst_14 = arith.constant 0.000000e+00 : bf16
    %12 = vector.broadcast %cst_14 : bf16 to vector<2x1x18xbf16>
    %c0_15 = arith.constant 0 : index
    %c17 = arith.constant 17 : index
    %c0_16 = arith.constant 0 : index
    %13 = vector.load %arg9[%c0_15, %c17, %c0_16] : memref<2x18x18xbf16, #tpu.memory_space<vmem>>, vector<2x1x18xbf16>
    tpu.vector_store %arg9[%c0_15, %c17, %c0_16], %12 {strides = array<i32>} : memref<2x18x18xbf16, #tpu.memory_space<vmem>>, vector<2x1x18xbf16>,
    %cst_17 = arith.constant 0.000000e+00 : bf16
    %14 = vector.broadcast %cst_17 : bf16 to vector<2x18x1xbf16>
    %c0_18 = arith.constant 0 : index
    %c0_19 = arith.constant 0 : index
    %c17_20 = arith.constant 17 : index
    %15 = vector.load %arg9[%c0_18, %c0_19, %c17_20] : memref<2x18x18xbf16, #tpu.memory_space<vmem>>, vector<2x18x1xbf16>
    tpu.vector_store %arg9[%c0_18, %c0_19, %c17_20], %14 {strides = array<i32>} : memref<2x18x18xbf16, #tpu.memory_space<vmem>>, vector<2x18x1xbf16>,
    %16 = vector.shape_cast %7 : vector<2x256xf32> to vector<2x16x16xf32>
    %17 = arith.truncf %16 : vector<2x16x16xf32> to vector<2x16x16xbf16>
    %c0_21 = arith.constant 0 : index
    %c1 = arith.constant 1 : index
    %c1_22 = arith.constant 1 : index
    %18 = vector.load %arg9[%c0_21, %c1, %c1_22] : memref<2x18x18xbf16, #tpu.memory_space<vmem>>, vector<2x16x16xbf16>
    tpu.vector_store %arg9[%c0_21, %c1, %c1_22], %17 {strides = array<i32>} : memref<2x18x18xbf16, #tpu.memory_space<vmem>>, vector<2x16x16xbf16>,
    %c0_23 = arith.constant 0 : index
    %c0_24 = arith.constant 0 : index
    %c0_25 = arith.constant 0 : index
    %19 = vector.load %arg9[%c0_23, %c0_24, %c0_25] : memref<2x18x18xbf16, #tpu.memory_space<vmem>>, vector<2x16x16xbf16>
    %20 = vector.shape_cast %19 : vector<2x16x16xbf16> to vector<2x256xbf16>
    %c0_26 = arith.constant 0 : index
    %c0_27 = arith.constant 0 : index
    %c1_28 = arith.constant 1 : index
    %21 = vector.load %arg9[%c0_26, %c0_27, %c1_28] : memref<2x18x18xbf16, #tpu.memory_space<vmem>>, vector<2x16x16xbf16>
    %22 = vector.shape_cast %21 : vector<2x16x16xbf16> to vector<2x256xbf16>
    %c0_29 = arith.constant 0 : index
    %c0_30 = arith.constant 0 : index
    %c2 = arith.constant 2 : index
    %23 = vector.load %arg9[%c0_29, %c0_30, %c2] : memref<2x18x18xbf16, #tpu.memory_space<vmem>>, vector<2x16x16xbf16>
    %24 = vector.shape_cast %23 : vector<2x16x16xbf16> to vector<2x256xbf16>
    %c0_31 = arith.constant 0 : index
    %c1_32 = arith.constant 1 : index
    %c0_33 = arith.constant 0 : index
    %25 = vector.load %arg9[%c0_31, %c1_32, %c0_33] : memref<2x18x18xbf16, #tpu.memory_space<vmem>>, vector<2x16x16xbf16>
    %26 = vector.shape_cast %25 : vector<2x16x16xbf16> to vector<2x256xbf16>
    %c0_34 = arith.constant 0 : index
    %c1_35 = arith.constant 1 : index
    %c1_36 = arith.constant 1 : index
    %27 = vector.load %arg9[%c0_34, %c1_35, %c1_36] : memref<2x18x18xbf16, #tpu.memory_space<vmem>>, vector<2x16x16xbf16>
    %28 = vector.shape_cast %27 : vector<2x16x16xbf16> to vector<2x256xbf16>
    %c0_37 = arith.constant 0 : index
    %c1_38 = arith.constant 1 : index
    %c2_39 = arith.constant 2 : index
    %29 = vector.load %arg9[%c0_37, %c1_38, %c2_39] : memref<2x18x18xbf16, #tpu.memory_space<vmem>>, vector<2x16x16xbf16>
    %30 = vector.shape_cast %29 : vector<2x16x16xbf16> to vector<2x256xbf16>
    %c0_40 = arith.constant 0 : index
    %c2_41 = arith.constant 2 : index
    %c0_42 = arith.constant 0 : index
    %31 = vector.load %arg9[%c0_40, %c2_41, %c0_42] : memref<2x18x18xbf16, #tpu.memory_space<vmem>>, vector<2x16x16xbf16>
    %32 = vector.shape_cast %31 : vector<2x16x16xbf16> to vector<2x256xbf16>
    %c0_43 = arith.constant 0 : index
    %c2_44 = arith.constant 2 : index
    %c1_45 = arith.constant 1 : index
    %33 = vector.load %arg9[%c0_43, %c2_44, %c1_45] : memref<2x18x18xbf16, #tpu.memory_space<vmem>>, vector<2x16x16xbf16>
    %34 = vector.shape_cast %33 : vector<2x16x16xbf16> to vector<2x256xbf16>
    %c0_46 = arith.constant 0 : index
    %c2_47 = arith.constant 2 : index
    %c2_48 = arith.constant 2 : index
    %35 = vector.load %arg9[%c0_46, %c2_47, %c2_48] : memref<2x18x18xbf16, #tpu.memory_space<vmem>>, vector<2x16x16xbf16>
    %36 = vector.shape_cast %35 : vector<2x16x16xbf16> to vector<2x256xbf16>
    %37 = tpu.concatenate %20, %22, %24, %26, %28, %30, %32, %34, %36 in 0 : vector<2x256xbf16>, vector<2x256xbf16>, vector<2x256xbf16>, vector<2x256xbf16>, vector<2x256xbf16>, vector<2x256xbf16>, vector<2x256xbf16>, vector<2x256xbf16>, vector<2x256xbf16> -> vector<18x256xbf16>
    %c0_49 = arith.constant 0 : index
    %c0_50 = arith.constant 0 : index
    %38 = vector.load %arg4[%c0_49, %c0_50] : memref<2x18xbf16, #tpu.memory_space<vmem>>, vector<2x18xbf16>
    %cst_51 = arith.constant dense<0.000000e+00> : vector<2x256xf32>
    %39 = tpu.matmul %38, %37, %cst_51 {dimension_numbers = #tpu.dot_dimension_numbers<[1], [0], [0], [1], [0, 0, 1, 1], [], []>} : vector<2x18xbf16>, vector<18x256xbf16>, vector<2x256xf32> -> vector<2x256xf32>
    %c0_52 = arith.constant 0 : index
    %c0_53 = arith.constant 0 : index
    %40 = vector.load %arg5[%c0_52, %c0_53] : memref<2x1xf32, #tpu.memory_space<vmem>>, vector<2x1xf32>
    %41 = vector.broadcast %40 : vector<2x1xf32> to vector<2x256xf32>
    %42 = arith.addf %39, %41 : vector<2x256xf32>
    %cst_54 = arith.constant 0.000000e+00 : bf16
    %43 = vector.broadcast %cst_54 : bf16 to vector<2x3x22xbf16>
    %c0_55 = arith.constant 0 : index
    %c0_56 = arith.constant 0 : index
    %c0_57 = arith.constant 0 : index
    %44 = vector.load %arg10[%c0_55, %c0_56, %c0_57] : memref<2x22x22xbf16, #tpu.memory_space<vmem>>, vector<2x3x22xbf16>
    tpu.vector_store %arg10[%c0_55, %c0_56, %c0_57], %43 {strides = array<i32>} : memref<2x22x22xbf16, #tpu.memory_space<vmem>>, vector<2x3x22xbf16>,
    %cst_58 = arith.constant 0.000000e+00 : bf16
    %45 = vector.broadcast %cst_58 : bf16 to vector<2x22x3xbf16>
    %c0_59 = arith.constant 0 : index
    %c0_60 = arith.constant 0 : index
    %c0_61 = arith.constant 0 : index
    %46 = vector.load %arg10[%c0_59, %c0_60, %c0_61] : memref<2x22x22xbf16, #tpu.memory_space<vmem>>, vector<2x22x3xbf16>
    tpu.vector_store %arg10[%c0_59, %c0_60, %c0_61], %45 {strides = array<i32>} : memref<2x22x22xbf16, #tpu.memory_space<vmem>>, vector<2x22x3xbf16>,
    %cst_62 = arith.constant 0.000000e+00 : bf16
    %47 = vector.broadcast %cst_62 : bf16 to vector<2x3x22xbf16>
    %c0_63 = arith.constant 0 : index
    %c19 = arith.constant 19 : index
    %c0_64 = arith.constant 0 : index
    %48 = vector.load %arg10[%c0_63, %c19, %c0_64] : memref<2x22x22xbf16, #tpu.memory_space<vmem>>, vector<2x3x22xbf16>
    tpu.vector_store %arg10[%c0_63, %c19, %c0_64], %47 {strides = array<i32>} : memref<2x22x22xbf16, #tpu.memory_space<vmem>>, vector<2x3x22xbf16>,
    %cst_65 = arith.constant 0.000000e+00 : bf16
    %49 = vector.broadcast %cst_65 : bf16 to vector<2x22x3xbf16>
    %c0_66 = arith.constant 0 : index
    %c0_67 = arith.constant 0 : index
    %c19_68 = arith.constant 19 : index
    %50 = vector.load %arg10[%c0_66, %c0_67, %c19_68] : memref<2x22x22xbf16, #tpu.memory_space<vmem>>, vector<2x22x3xbf16>
    tpu.vector_store %arg10[%c0_66, %c0_67, %c19_68], %49 {strides = array<i32>} : memref<2x22x22xbf16, #tpu.memory_space<vmem>>, vector<2x22x3xbf16>,
    %51 = vector.shape_cast %42 : vector<2x256xf32> to vector<2x16x16xf32>
    %52 = arith.truncf %51 : vector<2x16x16xf32> to vector<2x16x16xbf16>
    %c0_69 = arith.constant 0 : index
    %c3 = arith.constant 3 : index
    %c3_70 = arith.constant 3 : index
    %53 = vector.load %arg10[%c0_69, %c3, %c3_70] : memref<2x22x22xbf16, #tpu.memory_space<vmem>>, vector<2x16x16xbf16>
    tpu.vector_store %arg10[%c0_69, %c3, %c3_70], %52 {strides = array<i32>} : memref<2x22x22xbf16, #tpu.memory_space<vmem>>, vector<2x16x16xbf16>,
    %c0_71 = arith.constant 0 : index
    %c0_72 = arith.constant 0 : index
    %c0_73 = arith.constant 0 : index
    %54 = vector.load %arg10[%c0_71, %c0_72, %c0_73] : memref<2x22x22xbf16, #tpu.memory_space<vmem>>, vector<2x16x16xbf16>
    %55 = vector.shape_cast %54 : vector<2x16x16xbf16> to vector<2x256xbf16>
    %c0_74 = arith.constant 0 : index
    %c0_75 = arith.constant 0 : index
    %c3_76 = arith.constant 3 : index
    %56 = vector.load %arg10[%c0_74, %c0_75, %c3_76] : memref<2x22x22xbf16, #tpu.memory_space<vmem>>, vector<2x16x16xbf16>
    %57 = vector.shape_cast %56 : vector<2x16x16xbf16> to vector<2x256xbf16>
    %c0_77 = arith.constant 0 : index
    %c0_78 = arith.constant 0 : index
    %c6 = arith.constant 6 : index
    %58 = vector.load %arg10[%c0_77, %c0_78, %c6] : memref<2x22x22xbf16, #tpu.memory_space<vmem>>, vector<2x16x16xbf16>
    %59 = vector.shape_cast %58 : vector<2x16x16xbf16> to vector<2x256xbf16>
    %c0_79 = arith.constant 0 : index
    %c3_80 = arith.constant 3 : index
    %c0_81 = arith.constant 0 : index
    %60 = vector.load %arg10[%c0_79, %c3_80, %c0_81] : memref<2x22x22xbf16, #tpu.memory_space<vmem>>, vector<2x16x16xbf16>
    %61 = vector.shape_cast %60 : vector<2x16x16xbf16> to vector<2x256xbf16>
    %c0_82 = arith.constant 0 : index
    %c3_83 = arith.constant 3 : index
    %c3_84 = arith.constant 3 : index
    %62 = vector.load %arg10[%c0_82, %c3_83, %c3_84] : memref<2x22x22xbf16, #tpu.memory_space<vmem>>, vector<2x16x16xbf16>
    %63 = vector.shape_cast %62 : vector<2x16x16xbf16> to vector<2x256xbf16>
    %c0_85 = arith.constant 0 : index
    %c3_86 = arith.constant 3 : index
    %c6_87 = arith.constant 6 : index
    %64 = vector.load %arg10[%c0_85, %c3_86, %c6_87] : memref<2x22x22xbf16, #tpu.memory_space<vmem>>, vector<2x16x16xbf16>
    %65 = vector.shape_cast %64 : vector<2x16x16xbf16> to vector<2x256xbf16>
    %c0_88 = arith.constant 0 : index
    %c6_89 = arith.constant 6 : index
    %c0_90 = arith.constant 0 : index
    %66 = vector.load %arg10[%c0_88, %c6_89, %c0_90] : memref<2x22x22xbf16, #tpu.memory_space<vmem>>, vector<2x16x16xbf16>
    %67 = vector.shape_cast %66 : vector<2x16x16xbf16> to vector<2x256xbf16>
    %c0_91 = arith.constant 0 : index
    %c6_92 = arith.constant 6 : index
    %c3_93 = arith.constant 3 : index
    %68 = vector.load %arg10[%c0_91, %c6_92, %c3_93] : memref<2x22x22xbf16, #tpu.memory_space<vmem>>, vector<2x16x16xbf16>
    %69 = vector.shape_cast %68 : vector<2x16x16xbf16> to vector<2x256xbf16>
    %c0_94 = arith.constant 0 : index
    %c6_95 = arith.constant 6 : index
    %c6_96 = arith.constant 6 : index
    %70 = vector.load %arg10[%c0_94, %c6_95, %c6_96] : memref<2x22x22xbf16, #tpu.memory_space<vmem>>, vector<2x16x16xbf16>
    %71 = vector.shape_cast %70 : vector<2x16x16xbf16> to vector<2x256xbf16>
    %72 = tpu.concatenate %55, %57, %59, %61, %63, %65, %67, %69, %71 in 0 : vector<2x256xbf16>, vector<2x256xbf16>, vector<2x256xbf16>, vector<2x256xbf16>, vector<2x256xbf16>, vector<2x256xbf16>, vector<2x256xbf16>, vector<2x256xbf16>, vector<2x256xbf16> -> vector<18x256xbf16>
    %c0_97 = arith.constant 0 : index
    %c0_98 = arith.constant 0 : index
    %73 = vector.load %arg6[%c0_97, %c0_98] : memref<2x18xbf16, #tpu.memory_space<vmem>>, vector<2x18xbf16>
    %cst_99 = arith.constant dense<0.000000e+00> : vector<2x256xf32>
    %74 = tpu.matmul %73, %72, %cst_99 {dimension_numbers = #tpu.dot_dimension_numbers<[1], [0], [0], [1], [0, 0, 1, 1], [], []>} : vector<2x18xbf16>, vector<18x256xbf16>, vector<2x256xf32> -> vector<2x256xf32>
    %c0_100 = arith.constant 0 : index
    %c0_101 = arith.constant 0 : index
    %75 = vector.load %arg7[%c0_100, %c0_101] : memref<2x1xf32, #tpu.memory_space<vmem>>, vector<2x1xf32>
    %76 = vector.broadcast %75 : vector<2x1xf32> to vector<2x256xf32>
    %77 = arith.addf %74, %76 : vector<2x256xf32>
    %78 = arith.truncf %77 : vector<2x256xf32> to vector<2x256xbf16>
    %c0_102 = arith.constant 0 : index
    %c0_103 = arith.constant 0 : index
    %c0_104 = arith.constant 0 : index
    %79 = vector.load %arg8[%c0_102, %c0_103, %c0_104] : memref<1x2x256xbf16, #tpu.memory_space<vmem>>, vector<1x2x256xbf16>
    %80 = vector.shape_cast %79 : vector<1x2x256xbf16> to vector<2x256xbf16>
    %81 = vector.shape_cast %78 : vector<2x256xbf16> to vector<1x2x256xbf16>
    tpu.vector_store %arg8[%c0_102, %c0_103, %c0_104], %81 {strides = array<i32>} : memref<1x2x256xbf16, #tpu.memory_space<vmem>>, vector<1x2x256xbf16>,
    return
  }
  func.func @transform_0(%arg0: i32) -> (i32, i32, i32) {
    %c0_i32 = arith.constant 0 : i32
    %c0_i32_0 = arith.constant 0 : i32
    %c0_i32_1 = arith.constant 0 : i32
    return %arg0, %c0_i32, %c0_i32_0 : i32, i32, i32
  }
  func.func @transform_1(%arg0: i32) -> (i32, i32) {
    %c0_i32 = arith.constant 0 : i32
    %c0_i32_0 = arith.constant 0 : i32
    %c0_i32_1 = arith.constant 0 : i32
    return %c0_i32, %c0_i32_0 : i32, i32
  }
  func.func @transform_2(%arg0: i32) -> (i32, i32) {
    %c0_i32 = arith.constant 0 : i32
    %c0_i32_0 = arith.constant 0 : i32
    %c0_i32_1 = arith.constant 0 : i32
    return %c0_i32, %c0_i32_0 : i32, i32
  }
  func.func @transform_3(%arg0: i32) -> (i32, i32) {
    %c0_i32 = arith.constant 0 : i32
    %c0_i32_0 = arith.constant 0 : i32
    %c0_i32_1 = arith.constant 0 : i32
    return %c0_i32, %c0_i32_0 : i32, i32
  }
  func.func @transform_4(%arg0: i32) -> (i32, i32) {
    %c0_i32 = arith.constant 0 : i32
    %c0_i32_0 = arith.constant 0 : i32
    %c0_i32_1 = arith.constant 0 : i32
    return %c0_i32, %c0_i32_0 : i32, i32
  }
  func.func @transform_5(%arg0: i32) -> (i32, i32) {
    %c0_i32 = arith.constant 0 : i32
    %c0_i32_0 = arith.constant 0 : i32
    %c0_i32_1 = arith.constant 0 : i32
    return %c0_i32, %c0_i32_0 : i32, i32
  }
  func.func @transform_6(%arg0: i32) -> (i32, i32) {
    %c0_i32 = arith.constant 0 : i32
    %c0_i32_0 = arith.constant 0 : i32
    %c0_i32_1 = arith.constant 0 : i32
    return %c0_i32, %c0_i32_0 : i32, i32
  }
  func.func @transform_7(%arg0: i32) -> (i32, i32, i32) {
    %c0_i32 = arith.constant 0 : i32
    %c0_i32_0 = arith.constant 0 : i32
    %c0_i32_1 = arith.constant 0 : i32
    return %arg0, %c0_i32, %c0_i32_0 : i32, i32, i32
  }
}

module attributes {stable_mosaic.version = 11 : i64} {
  func.func @_final_kernel(%arg0: i32, %arg1: i32, %arg2: memref<1x2x256xbf16, #tpu.memory_space<vmem>>, %arg3: memref<1x2x256xbf16, #tpu.memory_space<vmem>>, %arg4: memref<4x4xbf16, #tpu.memory_space<vmem>>, %arg5: memref<4x1xf32, #tpu.memory_space<vmem>>, %arg6: memref<1x4x256xf32, #tpu.memory_space<vmem>>, %arg7: memref<1x4x256xf32, #tpu.memory_space<vmem>>) attributes {dimension_semantics = [#tpu.dimension_semantics<parallel>, #tpu.dimension_semantics<parallel>], iteration_bounds = array<i64: 2, 1>, scalar_prefetch = 0 : i64, scratch_operands = 0 : i64, tpu.core_type = #tpu.core_type<tc>, window_params = [{transform_indices = @transform_0, window_bounds = array<i64: 1, 2, 256>}, {transform_indices = @transform_1, window_bounds = array<i64: 1, 2, 256>}, {pipeline_mode = #tpu.pipeline_mode<synchronous>, transform_indices = @transform_2, window_bounds = array<i64: 4, 4>}, {pipeline_mode = #tpu.pipeline_mode<synchronous>, transform_indices = @transform_3, window_bounds = array<i64: 4, 1>}, {transform_indices = @transform_4, window_bounds = array<i64: 1, 4, 256>}, {transform_indices = @transform_5, window_bounds = array<i64: 1, 4, 256>}]} {
    %c0 = arith.constant 0 : index
    %c0_0 = arith.constant 0 : index
    %c0_1 = arith.constant 0 : index
    %0 = vector.load %arg2[%c0, %c0_0, %c0_1] : memref<1x2x256xbf16, #tpu.memory_space<vmem>>, vector<1x2x256xbf16>
    %1 = vector.shape_cast %0 : vector<1x2x256xbf16> to vector<2x256xbf16>
    %c0_2 = arith.constant 0 : index
    %c0_3 = arith.constant 0 : index
    %c0_4 = arith.constant 0 : index
    %2 = vector.load %arg3[%c0_2, %c0_3, %c0_4] : memref<1x2x256xbf16, #tpu.memory_space<vmem>>, vector<1x2x256xbf16>
    %3 = vector.shape_cast %2 : vector<1x2x256xbf16> to vector<2x256xbf16>
    %4 = tpu.concatenate %1, %3 in 0 : vector<2x256xbf16>, vector<2x256xbf16> -> vector<4x256xbf16>
    %c0_5 = arith.constant 0 : index
    %c0_6 = arith.constant 0 : index
    %5 = vector.load %arg4[%c0_5, %c0_6] : memref<4x4xbf16, #tpu.memory_space<vmem>>, vector<4x4xbf16>
    %cst = arith.constant dense<0.000000e+00> : vector<4x256xf32>
    %6 = tpu.matmul %5, %4, %cst {dimension_numbers = #tpu.dot_dimension_numbers<[1], [0], [0], [1], [0, 0, 1, 1], [], []>} : vector<4x4xbf16>, vector<4x256xbf16>, vector<4x256xf32> -> vector<4x256xf32>
    %c0_7 = arith.constant 0 : index
    %c0_8 = arith.constant 0 : index
    %7 = vector.load %arg5[%c0_7, %c0_8] : memref<4x1xf32, #tpu.memory_space<vmem>>, vector<4x1xf32>
    %8 = vector.broadcast %7 : vector<4x1xf32> to vector<4x256xf32>
    %9 = arith.addf %6, %8 : vector<4x256xf32>
    %c0_9 = arith.constant 0 : index
    %c0_10 = arith.constant 0 : index
    %c0_11 = arith.constant 0 : index
    %10 = vector.load %arg6[%c0_9, %c0_10, %c0_11] : memref<1x4x256xf32, #tpu.memory_space<vmem>>, vector<1x4x256xf32>
    %11 = vector.shape_cast %10 : vector<1x4x256xf32> to vector<4x256xf32>
    %12 = arith.addf %9, %11 : vector<4x256xf32>
    %c0_12 = arith.constant 0 : index
    %c0_13 = arith.constant 0 : index
    %c0_14 = arith.constant 0 : index
    %13 = vector.load %arg7[%c0_12, %c0_13, %c0_14] : memref<1x4x256xf32, #tpu.memory_space<vmem>>, vector<1x4x256xf32>
    %14 = vector.shape_cast %13 : vector<1x4x256xf32> to vector<4x256xf32>
    %15 = vector.shape_cast %12 : vector<4x256xf32> to vector<1x4x256xf32>
    tpu.vector_store %arg7[%c0_12, %c0_13, %c0_14], %15 {strides = array<i32>} : memref<1x4x256xf32, #tpu.memory_space<vmem>>, vector<1x4x256xf32>,
    return
  }
  func.func @transform_0(%arg0: i32, %arg1: i32) -> (i32, i32, i32) {
    %c0_i32 = arith.constant 0 : i32
    %c0_i32_0 = arith.constant 0 : i32
    return %arg0, %c0_i32, %arg1 : i32, i32, i32
  }
  func.func @transform_1(%arg0: i32, %arg1: i32) -> (i32, i32, i32) {
    %c0_i32 = arith.constant 0 : i32
    %c0_i32_0 = arith.constant 0 : i32
    return %arg0, %c0_i32, %arg1 : i32, i32, i32
  }
  func.func @transform_2(%arg0: i32, %arg1: i32) -> (i32, i32) {
    %c0_i32 = arith.constant 0 : i32
    %c0_i32_0 = arith.constant 0 : i32
    %c0_i32_1 = arith.constant 0 : i32
    return %c0_i32, %c0_i32_0 : i32, i32
  }
  func.func @transform_3(%arg0: i32, %arg1: i32) -> (i32, i32) {
    %c0_i32 = arith.constant 0 : i32
    %c0_i32_0 = arith.constant 0 : i32
    %c0_i32_1 = arith.constant 0 : i32
    return %c0_i32, %c0_i32_0 : i32, i32
  }
  func.func @transform_4(%arg0: i32, %arg1: i32) -> (i32, i32, i32) {
    %c0_i32 = arith.constant 0 : i32
    %c0_i32_0 = arith.constant 0 : i32
    return %arg0, %c0_i32, %arg1 : i32, i32, i32
  }
  func.func @transform_5(%arg0: i32, %arg1: i32) -> (i32, i32, i32) {
    %c0_i32 = arith.constant 0 : i32
    %c0_i32_0 = arith.constant 0 : i32
    return %arg0, %c0_i32, %arg1 : i32, i32, i32
  }
}

</mosaic_0001>

<bundles_post_ra>
// kernel: rfb2d_forward.5
= control target key start
LH: loop header
LB: loop body
LE: loop exit
PB: predicated region body
PF: predicated region fallthrough
CT: control target
= control target key end

     0   :  { %s675_s18 = smov 0   ;;  %s677_s19 = smov 0   ;;  %s724_s0 = inlined_call_operand.vmem [shape: bf16[2,2,256], index: 0, kind: input, shape index: {}]   ;;  %s725_s1 = inlined_call_operand.vmem [shape: bf16[2,2,256], index: 1, kind: input, shape index: {}]   ;;  %s726_s2 = inlined_call_operand.vmem [shape: bf16[4,4], index: 2, kind: input, shape index: {}]   ;;  %s727_s3 = inlined_call_operand.vmem [shape: f32[4,1], index: 3, kind: input, shape index: {}]   ;;  %s728_s4 = inlined_call_operand.vmem [shape: f32[2,4,256], index: 4, kind: input, shape index: {}]   ;;  %s729_s5 = inlined_call_operand.vmem [shape: f32[2,4,256], index: 5, kind: output, shape index: {}]  }
   0x1   :  { %s679_s20 = smov 0  }
   0x2 LB: > { %s27_s21 = sadd.s32 1, %s637_s19  ;;  %p576_p0 = scmp.ge.s32.totalorder %s641_s20, 1  ;;  %s641_s20 = sphi %s679_s20, %s15_s20   ;;  %s637_s19 = sphi %s677_s19, %s731_s19   ;;  %s633_s18 = sphi %s675_s18, %s730_s18  }
   0x3   : > { %p29_p1 = scmp.ge.s32.totalorder %s27_s21, 2  ;;  %p240_p2 = scmp.lt.s32.totalorder %s641_s20, 3 }
   0x5   : > { %s733_s21 = smov (%p29_p1, %s27_s21), 0  ;;  %p241_p3 = pnand %p576_p0, %p240_p2 }
   0x6   : > { %p293_p4 = scmp.lt.s32.totalorder (!%p241_p3), %s633_s18, 1 }
   0x7   : > { %244 = sbr.rel (%p241_p3) target bundleno = 232 (0xe8), region = 40 }
   0xc   : > { %v345_v0 = vlaneseq  ;;  %v643_v1 = vmov 1966171168   ;;  %v388_v3 = vld [vmem:[%s727_s3] sm:$0xf]  ;;  %s735_s18 = smov (!%p293_p4, %s633_s18), 1  ;;  %v644_v5 = vmov 0  }
   0xd   : > { %v343_v2 = vunpack.c.l.s4 %v643_v1  ;;  %435 = vmatprep.mubr.bf16.mxu0 %v644_v5  ;;  %616 = vset.pattern.permute.xlu0 %v644_v5  ;;  %s577_s24 = sshll.u32 %s735_s18, 1  ;;  %vm380_vm0 = vcmask 1040384   ;;  %vm398_vm1 = vcmask 1041408   ;;  %v387_v20 = vld [vmem:[%s726_s2] sm:$0x3]  ;;  %vm394_vm2 = vcmask 31744  }
   0xe   : > { %v346_v4 = vshrl.u32 %v345_v0, 7  ;;  %391 = vperm.xlu0 %616, %v388_v3   ;;  %s299_s27 = scalar_lea.vmem %s724_s0, %s577_s24  ;;  %s308_s30 = scalar_lea.vmem %s725_s1, %s577_s24 }
   0xf   : > { %v344_v6 = vunpack.c.0.s8 %v343_v2  ;;  %v583_v8 = vld.sshfl [vmem:[%s299_s27] sm:$0x11 pattern:$0x75316420]  ;;  %s588_s8 = sshll.u32 %s735_s18, 3 }
  0x10   : > { %v341_v9 = vcombine.high %v583_v8, %v583_v8  ;;  %v617_v10 = vld [vmem:[%s308_s30] ss:$0 sps:$4 sm:$0x33]   ;;  %s318_s11 = scalar_lea.vmem %s728_s4, %s588_s8  ;;  %s328_s14 = scalar_lea.vmem %s729_s5, %s588_s8 }
  0x11   : > { %v347_v7 = vsub.s32 %v344_v6, %v346_v4  ;;  %v444_v22 = vld [vmem:[%s318_s11] sm:$0xff] }
  0x12   : > { %v446_v25 = vcombine.high %v444_v22, %v444_v22 }
  0x13   : > { %v364_v11 = vrot.slane %v617_v10, %v347_v7  ;;  %v348_v12 = vrot.slane %v583_v8, %v347_v7  ;;  %v355_v13 = vrot.slane %v341_v9, %v347_v7 }
  0x15   : > { %v365_v14 = vcombine.high %v364_v11, %v364_v11  ;;  %v372_v15 = vrot.slane %v364_v11, %v347_v7 }
  0x17   : > { %v379_v16 = vrot.slane %v365_v14, %v347_v7  ;;  %v383_v17 = vsel %vm380_vm0, %v348_v12, %v372_v15 }
  0x18   : > { %v399_v18 = vsel %vm398_vm1, %v383_v17, 0 }
  0x19   : > { %v386_v19 = vsel %vm380_vm0, %v355_v13, %v379_v16 }
  0x1a   : > { %584 = vmatprep.subr.msk.bf16.mxu0 %vm398_vm1, %v386_v19 }
  0x1b   : > { %418 = vmatpush1.bf16.msra.mxu0 %v399_v18 }
  0x1e   : > { %585 = vmatmul.mubr.msk.bf16.vlgmr.msra.gmra.mxu0 %vm394_vm2, %v387_v20 }
  0x89   : > { %v392_v21 = vpop.permute.xlu0 %391 }
  0xde   : > { %v437_v23 = vpop.f32.mrf.mxu0 }
  0xdf   : > { %v438_v24 = vadd.f32 %v437_v23, %v392_v21 }
  0xe0   : > { %v439_v26 = vpop.f32.mrf.mxu0 }
  0xe1   : > { %v440_v27 = vadd.f32 %v439_v26, %v392_v21  ;;  %v448_v29 = vadd.f32 %v444_v22, %v438_v24 }
  0xe2   : > { %v441_v28 = vpop.f32.mrf.mxu0 }
  0xe3   : > { %v449_v30 = vadd.f32 %v446_v25, %v440_v27 }
  0xe4   : > { %v442_v31 = vpop.f32.mrf.mxu0 }
  0xe5   : > { %v452_v32 = vcombine.low %v448_v29, %v449_v30 }
  0xe7   : > { %454 = vst [vmem:[%s328_s14] sm:$0xff] %v452_v32 }
  0xe8 PF: > { %s15_s20 = sadd.s32 1, %s641_s20   ;;  %s730_s18 = smov %s637_s19 }
  0xe9   : > { %p12_p5 = scmp.ge.s32.totalorder %s15_s20, 4   ;;  %s731_s19 = smov %s733_s21 }
  0xeb   :  { %14 = sbr.rel (!%p12_p5) target bundleno = 2 (0x2), region = 76 }

// kernel: rfb2d_forward.3
= control target key start
LH: loop header
LB: loop body
LE: loop exit
PB: predicated region body
PF: predicated region fallthrough
CT: control target
= control target key end

     0   :  { %s3086_s18 = smov 0   ;;  %s4089_s0 = inlined_call_operand.vmem [shape: f32[2,4,256], index: 0, kind: input, shape index: {}]   ;;  %s4090_s1 = inlined_call_operand.vmem [shape: bf16[2,4], index: 1, kind: input, shape index: {}]   ;;  %s4091_s2 = inlined_call_operand.vmem [shape: f32[2,1], index: 2, kind: input, shape index: {}]   ;;  %s4092_s3 = inlined_call_operand.vmem [shape: bf16[2,18], index: 3, kind: input, shape index: {}]   ;;  %s4093_s4 = inlined_call_operand.vmem [shape: f32[2,1], index: 4, kind: input, shape index: {}]   ;;  %s4094_s5 = inlined_call_operand.vmem [shape: bf16[2,2,256], index: 5, kind: output, shape index: {}]  }
   0x1 LB: > { %s2784_s19 = sadd.s32 4294967295, %s3040_s18   ;;  %p2788_p0 = scmp.ge.s32.totalorder %s3040_s18, 1  ;;  %s3040_s18 = sphi %s3086_s18, %s15_s18  }
   0x2   : > { %p187_p1 = scmp.lt.s32.totalorder %s3040_s18, 3 }
   0x4   : > { %p188_p2 = pnand %p2788_p0, %p187_p1 }
   0x6   : > { %191 = sbr.rel (%p188_p2) target bundleno = 1120 (0x460), region = 40 }
   0xb   : > { %p214_p3 = scmp.lt.s32.totalorder %s2784_s19, 1  ;;  %v4095_v0 = vmov 0   ;;  %v231_v1 = vld [vmem:[%s4091_s2] sm:$0x3]  ;;  %vm241_vm0 = vcmask 1041408   ;;  %vm237_vm1 = vcmask 31744   ;;  %v370_v27 = vlaneseq }
   0xc   : > { %280 = vmatprep.mubr.bf16.mxu0 %v4095_v0  ;;  %3031 = vset.pattern.permute.xlu0 %v4095_v0  ;;  %v230_v7 = vld [vmem:[%s4090_s1] sm:$0x1]  ;;  %s3043_s28 = smov 96   ;;  %s3044_s29 = smov 112   ;;  %vm290_vm2 = vsmask.f32 256 }
   0xd   : > { %s4136_s19 = smov (!%p214_p3, %s2784_s19), 1  ;;  %234 = vperm.xlu0 %3031, %v231_v1   ;;  %2701 = vmatprep.mubr.bf16.mxu1 %v4095_v0  ;;  %s3045_s30 = smov 80   ;;  %vm289_vm3 = vcmask 139264   ;;  %v292_v15 = vld [vmem:[#allocation2] sm:$0x1]  ;;  %vm298_vm4 = vcmask 3072  }
   0xe   : > { %3032 = vset.pattern.permute.xlu1 %v4095_v0  ;;  %s2932_s22 = sshll.u32 %s4136_s19, 3  ;;  %s3046_s6 = smov 64   ;;  %v295_v16 = vld [vmem:[#allocation2 + $0xc] sm:$0x1]  ;;  %vm291_vm5 = vmand %vm289_vm3, %vm290_vm2  ;;  %vm301_vm6 = vcmask 0   ;;  %vm314_vm7 = vcmask 142472  }
   0xf   : > { %s218_s25 = scalar_lea.vmem %s4089_s0, %s2932_s22  ;;  %s3047_s7 = smov 48   ;;  %300 = vst.msk [vmem:[#allocation2 + $0x4] sm:$0xf] %vm298_vm4, %v4095_v0  ;;  %304 = vst.msk [vmem:[#allocation2 + $0x10] sm:$0xf] %vm298_vm4, %v4095_v0  ;;  %v293_v17 = vsel %vm291_vm5, 0, %v292_v15 }
  0x10   : > { %v224_v2 = vld [vmem:[%s218_s25] sm:$0xff]  ;;  %s3048_s8 = smov 32   ;;  %s3049_s9 = smov 16   ;;  %v296_v18 = vsel %vm291_vm5, 0, %v295_v16  ;;  %302 = vst.msk [vmem:[#allocation2 + $0x8] sm:$0x1] %vm301_vm6, %v4095_v0 }
  0x11   : > { %v226_v3 = vcombine.high %v224_v2, %v224_v2  ;;  %v228_v4 = vpack.c.bf16 %v224_v2, %v224_v2  ;;  %305 = vst.msk [vmem:[#allocation2 + $0x14] sm:$0x1] %vm301_vm6, %v4095_v0  ;;  %294 = vst [vmem:[#allocation2] sm:$0x1] %v293_v17  ;;  %vm306_vm8 = vsmask.f32 7938 }
  0x12   : > { %316 = vst.msk [vmem:[#allocation2 + $0x4] sm:$0xf] %vm314_vm7, %v4095_v0  ;;  %320 = vst.msk [vmem:[#allocation2 + $0x10] sm:$0xf] %vm314_vm7, %v4095_v0  ;;  %v3050_v25 = vmov 1983009808  }
  0x13   : > { %v229_v5 = vpack.c.bf16 %v226_v3, %v226_v3  ;;  %v243_v6 = vsel %vm241_vm0, %v228_v4, 0  ;;  %297 = vst [vmem:[#allocation2 + $0xc] sm:$0x1] %v296_v18  ;;  %299 = vst.msk [vmem:[#allocation2] sm:$0xf] %vm298_vm4, %v4095_v0  ;;  %v368_v26 = vunpack.c.l.s4 %v3050_v25  ;;  %v3158_v31 = vshrl.u32 %v370_v27, 7 }
  0x14   : > { %303 = vst.msk [vmem:[#allocation2 + $0xc] sm:$0xf] %vm298_vm4, %v4095_v0  ;;  %vm307_vm9 = vmand %vm289_vm3, %vm306_vm8  ;;  %v3051_v32 = vmov 1934713408   ;;  %vm317_vm10 = vcmask 139400   ;;  %s3052_s10 = smov 1  }
  0x15   : > { %2792 = vmatprep.subr.msk.bf16.mxu0 %vm241_vm0, %v229_v5  ;;  %315 = vst.msk [vmem:[#allocation2] sm:$0xf] %vm314_vm7, %v4095_v0  ;;  %319 = vst.msk [vmem:[#allocation2 + $0xc] sm:$0xf] %vm314_vm7, %v4095_v0  ;;  %v369_v30 = vunpack.c.0.s8 %v368_v26  ;;  %v400_v33 = vunpack.c.l.s4 %v3051_v32  ;;  %vm478_vm11 = vsmask.f32 4368 }
  0x16   : > { %263 = vmatpush1.bf16.msra.mxu0 %v243_v6  ;;  %4100 = vst [vmem:[#allocation3_spill] sm:$0xff] %v3158_v31  ;;  %vm479_vm12 = vmor %vm290_vm2, %vm478_vm11  ;;  %vm532_vm13 = vcmask 134152   ;;  %vm539_vm15 = vcmask 131080   ;;  %s3053_s11 = smov 127   ;;  %s3054_s12 = smov 126   ;;  %vm1922_vm3 = vcmask 1046532  }
  0x17   : > { %v308_v19 = vld [vmem:[#allocation2 + $0x8] sm:$0x1]  ;;  %v3161_v37 = vsub.s32 %v369_v30, %v3158_v31  ;;  %v401_v39 = vunpack.c.0.s8 %v400_v33  ;;  %vm533_vm14 = vmand %vm532_vm13, %vm306_vm8  ;;  %vm1220_vm5 = vsmask.f32 3328  ;;  %vm1221_vm6 = vsmask.f32 7440 }
  0x18   : > { %v311_v20 = vld [vmem:[#allocation2 + $0x14] sm:$0x1]  ;;  %v309_v21 = vsel %vm307_vm9, 0, %v308_v19  ;;  %vm3253_vm7 = vmor %vm1220_vm5, %vm1221_vm6  ;;  %vm737_vm8 = vcmask 130048   ;;  %vm747_vm11 = vcmask 523264   ;;  %s2791_s17 = sshll.u32 %s4136_s19, 1 }
  0x19   : > { %2793 = vmatmul.mubr.msk.bf16.vlgmr.msra.gmra.mxu0 %vm237_vm1, %v230_v7  ;;  %v312_v22 = vsel %vm307_vm9, 0, %v311_v20  ;;  %310 = vst [vmem:[#allocation2 + $0x8] sm:$0x1] %v309_v21  ;;  %v3167_v46 = vsub.s32 %v401_v39, %v3158_v31  ;;  %vm540_vm1 = vmand %vm539_vm15, %vm290_vm2  ;;  %vm1921_vm2 = vcmask 1042432   ;;  %vm741_vm9 = vcmask 261120   ;;  %s222_s22 = scalar_lea.vmem %s4094_s5, %s2791_s17 }
  0x1a   : > { %313 = vst [vmem:[#allocation2 + $0x14] sm:$0x1] %v312_v22  ;;  %318 = vst.msk [vmem:[#allocation2 + $0x8] sm:$0x1] %vm317_vm10, %v4095_v0  ;;  %vm2618_vm15 = vcmask 1040384  }
  0x1b   : > { %321 = vst.msk [vmem:[#allocation2 + $0x14] sm:$0x1] %vm317_vm10, %v4095_v0  ;;  %vm3208_vm4 = vmor %vm1921_vm2, %vm1922_vm3  ;;  %vm744_vm10 = vcmask 392192   ;;  %vm2647_vm3 = vcmask 1046528  }
  0x88   : > { %v235_v8 = vpop.permute.xlu0 %234 }
  0xd9   : > { %v282_v9 = vpop.f32.mrf.mxu0 }
  0xda   : > { %v3112_v10 = vadd.f32 %v282_v9, %v235_v8 }
  0xdb   : > { %v284_v11 = vpop.f32.mrf.mxu0 }
  0xdc   : > { %326 = vrot.lane.b32.xlu1 %v3112_v10, %s3043_s28  ;;  %323 = vrot.lane.b32.xlu0 %v3112_v10, %s3044_s29  ;;  %v3126_v14 = vadd.f32 %v284_v11, %v235_v8 }
  0xdd   : > { %v286_v12 = vpop.f32.mrf.mxu0 }
  0xdf   : > { %v287_v13 = vpop.f32.mrf.mxu0 }
  0xe0   : > { %329 = vrot.lane.b32.xlu1 %v3112_v10, %s3045_s30  ;;  %332 = vrot.lane.b32.xlu0 %v3112_v10, %s3046_s6 }
  0xe4   : > { %335 = vrot.lane.b32.xlu1 %v3112_v10, %s3047_s7  ;;  %338 = vrot.lane.b32.xlu0 %v3112_v10, %s3048_s8 }
  0xe8   : > { %341 = vrot.lane.b32.xlu1 %v3112_v10, %s3049_s9  ;;  %345 = vrot.lane.b32.xlu0 %v3126_v14, %s3044_s29 }
  0xec   : > { %348 = vrot.lane.b32.xlu1 %v3126_v14, %s3043_s28  ;;  %351 = vrot.lane.b32.xlu0 %v3126_v14, %s3045_s30 }
  0xf0   : > { %354 = vrot.lane.b32.xlu1 %v3126_v14, %s3046_s6  ;;  %357 = vrot.lane.b32.xlu0 %v3126_v14, %s3047_s7 }
  0xf4   : > { %360 = vrot.lane.b32.xlu1 %v3126_v14, %s3048_s8  ;;  %363 = vrot.lane.b32.xlu0 %v3126_v14, %s3049_s9 }
 0x14e   : > { %v327_v23 = vpop.permute.xlu1 %326  ;;  %v324_v24 = vpop.permute.xlu0 %323 }
 0x14f   : > { %v366_v38 = vcombine.low %v3112_v10, %v327_v23 }
 0x151   : > { %v373_v44 = vrot.slane %v366_v38, %v3161_v37 }
 0x152   : > { %v330_v28 = vpop.permute.xlu1 %329  ;;  %v333_v29 = vpop.permute.xlu0 %332 }
 0x153   : > { %v374_v34 = vcombine.low %v324_v24, %v330_v28 }
 0x155   : > { %v381_v40 = vrot.slane %v374_v34, %v3161_v37 }
 0x156   : > { %v336_v35 = vpop.permute.xlu1 %335  ;;  %v339_v36 = vpop.permute.xlu0 %338 }
 0x157   : > { %v382_v41 = vcombine.low %v333_v29, %v339_v36  ;;  %v398_v47 = vcombine.low %v373_v44, %v381_v40  ;;  %v534_v40 = vld [vmem:[#allocation2] sm:$0xf] }
 0x159   : > { %v389_v48 = vrot.slane %v382_v41, %v3161_v37  ;;  %v405_v55 = vrot.slane %v398_v47, %v3167_v46 }
 0x15a   : > { %v342_v42 = vpop.permute.xlu1 %341  ;;  %v346_v43 = vpop.permute.xlu0 %345 }
 0x15b   : > { %v390_v45 = vcombine.low %v336_v35, %v342_v42 }
 0x15d   : > { %v397_v49 = vrot.slane %v390_v45, %v3161_v37 }
 0x15e   : > { %v349_v50 = vpop.permute.xlu1 %348  ;;  %v352_v51 = vpop.permute.xlu0 %351 }
 0x15f   : > { %v406_v52 = vcombine.low %v389_v48, %v397_v49  ;;  %v416_v53 = vcombine.low %v3126_v14, %v349_v50  ;;  %v424_v54 = vcombine.low %v346_v43, %v352_v51  ;;  %v544_v43 = vld [vmem:[#allocation2 + $0xc] sm:$0xf]  ;;  %v548_v48 = vld [vmem:[#allocation2 + $0x14] sm:$0x1]  ;;  %v541_v49 = vld [vmem:[#allocation2 + $0x8] sm:$0x1] }
 0x161   : > { %v413_v56 = vrot.slane %v406_v52, %v3167_v46  ;;  %v423_v61 = vrot.slane %v416_v53, %v3161_v37  ;;  %v431_v62 = vrot.slane %v424_v54, %v3161_v37 }
 0x162   : > { %v355_v57 = vpop.permute.xlu1 %354  ;;  %v358_v58 = vpop.permute.xlu0 %357 }
 0x163   : > { %v414_v59 = vcombine.low %v405_v55, %v413_v56  ;;  %v415_v60 = vcombine.high %v405_v55, %v413_v56  ;;  %v448_v7 = vcombine.low %v423_v61, %v431_v62 }
 0x165   : > { %v2933_v63 = vpack.c.bf16 %v414_v59, %v414_v59  ;;  %v2935_v1 = vpack.c.bf16 %v415_v60, %v415_v60  ;;  %v455_v16 = vrot.slane %v448_v7, %v3167_v46 }
 0x166   : > { %v361_v2 = vpop.permute.xlu1 %360  ;;  %v364_v3 = vpop.permute.xlu0 %363 }
 0x167   : > { %v432_v4 = vcombine.low %v355_v57, %v361_v2  ;;  %v440_v5 = vcombine.low %v358_v58, %v364_v3  ;;  %v481_v6 = vshrl.u32 %v2933_v63, 16  ;;  %v498_v8 = vshrl.u32 %v2935_v1, 16 }
 0x168   : > { %v484_v12 = vshll.u32 %v2933_v63, 16  ;;  %v501_v18 = vshll.u32 %v2935_v1, 16 }
 0x169   : > { %v439_v9 = vrot.slane %v432_v4, %v3161_v37  ;;  %v447_v10 = vrot.slane %v440_v5, %v3161_v37  ;;  %v483_v11 = vrot.slane %v481_v6, 7  ;;  %v500_v15 = vrot.slane %v498_v8, 7 }
 0x16b   : > { %v456_v13 = vcombine.low %v439_v9, %v447_v10  ;;  %v486_v14 = vor.u32 %v484_v12, %v483_v11  ;;  %v503_v19 = vor.u32 %v501_v18, %v500_v15  ;;  %v487_v33 = vrot.slane %v483_v11, 4 }
 0x16c   : > { %v504_v38 = vrot.slane %v500_v15, 4 }
 0x16d   : > { %v463_v17 = vrot.slane %v456_v13, %v3167_v46  ;;  %514 = vrot.lane.b32.xlu1 %v486_v14, %s3052_s10 }
 0x16f   : > { %v465_v20 = vcombine.high %v455_v16, %v463_v17  ;;  %v464_v21 = vcombine.low %v455_v16, %v463_v17 }
 0x171   : > { %520 = vrot.lane.b32.xlu1 %v503_v19, %s3052_s10  ;;  %v2936_v22 = vpack.c.bf16 %v465_v20, %v465_v20  ;;  %v2934_v23 = vpack.c.bf16 %v464_v21, %v464_v21 }
 0x173   : > { %v506_v24 = vshrl.u32 %v2936_v22, 16  ;;  %v489_v25 = vshrl.u32 %v2934_v23, 16  ;;  %v492_v28 = vshll.u32 %v2934_v23, 16  ;;  %v509_v34 = vshll.u32 %v2936_v22, 16 }
 0x175   : > { %v508_v26 = vrot.slane %v506_v24, 7  ;;  %v491_v27 = vrot.slane %v489_v25, 7 }
 0x177   : > { %v513_v29 = vrot.slane %v508_v26, 4  ;;  %v496_v30 = vrot.slane %v491_v27, 4  ;;  %v494_v32 = vor.u32 %v492_v28, %v491_v27  ;;  %v511_v36 = vor.u32 %v509_v34, %v508_v26 }
 0x179   : > { %524 = vrot.lane.b32.xlu0 %v513_v29, %s3052_s10  ;;  %518 = vrot.lane.b32.xlu1 %v496_v30, %s3052_s10  ;;  %v495_v35 = vsel %vm479_vm12, %v487_v33, %v494_v32  ;;  %v512_v39 = vsel %vm479_vm12, %v504_v38, %v511_v36  ;;  %vm750_vm12 = vcmask 654336  }
 0x17d   : > { %516 = vrot.lane.b32.xlu0 %v495_v35, %s3052_s10 }
 0x181   : > { %522 = vrot.lane.b32.xlu0 %v512_v39, %s3052_s10 }
 0x1df   : > { %v515_v41 = vpop.permute.xlu1 %514 }
 0x1e0   : > { %v535_v42 = vsel %vm533_vm14, %v515_v41, %v534_v40 }
 0x1e1   : > { %536 = vst [vmem:[#allocation2] sm:$0xf] %v535_v42 }
 0x1e3   : > { %v521_v44 = vpop.permute.xlu1 %520 }
 0x1e4   : > { %v545_v45 = vsel %vm533_vm14, %v521_v44, %v544_v43  ;;  %vm756_vm14 = vcmask 916480  }
 0x1e5   : > { %546 = vst [vmem:[#allocation2 + $0xc] sm:$0xf] %v545_v45 }
 0x1e8   : > { %v3185_v47 = vld [vmem:[#allocation2] sm:$0xf] }
 0x1e9   : > { %778 = vrot.lane.b32.xlu1 %v3185_v47, %s3053_s11  ;;  %v1915_v58 = vld [vmem:[#allocation2] sm:$0xe]  ;;  %v558_v3 = vshrl.u32 %v3185_v47, 16  ;;  %v1225_v5 = vshll.u32 %v3185_v47, 16 }
 0x1ea   : > { %v2882_v62 = vrot.slane %v1915_v58, 9 }
 0x1eb   : > { %v525_v50 = vpop.permute.xlu0 %524  ;;  %v519_v51 = vpop.permute.xlu1 %518  ;;  %v1224_v10 = vrot.slane %v558_v3, 4  ;;  %v1227_v11 = vrot.slane %v1225_v5, 5 }
 0x1ec   : > { %v549_v52 = vsel %vm540_vm1, %v525_v50, %v548_v48  ;;  %v542_v53 = vsel %vm540_vm1, %v519_v51, %v541_v49  ;;  %v553_v54 = vld [vmem:[#allocation2 + $0xc] sm:$0xf]  ;;  %vm2637_vm1 = vcmask 1044480  }
 0x1ed   : > { %550 = vst [vmem:[#allocation2 + $0x14] sm:$0x1] %v549_v52  ;;  %543 = vst [vmem:[#allocation2 + $0x8] sm:$0x1] %v542_v53  ;;  %998 = vrot.lane.b32.xlu1 %v3185_v47, %s3054_s12  ;;  %782 = vrot.lane.b32.xlu0 %v553_v54, %s3053_s11  ;;  %v1916_v63 = vld [vmem:[#allocation2 + $0xc] sm:$0xe]  ;;  %v557_v13 = vpack.i.b16 %v553_v54, %v3185_v47  ;;  %v1228_v19 = vor.u32 %v1227_v11, %v1224_v10 }
 0x1ee   : > { %v2883_v4 = vrot.slane %v1916_v63, 9  ;;  %v559_v14 = vshrl.u32 %v553_v54, 16  ;;  %v1245_v20 = vshll.u32 %v553_v54, 16 }
 0x1ef   : > { %v517_v55 = vpop.permute.xlu0 %516  ;;  %v574_v21 = vrot.slane %v557_v13, %v3161_v37  ;;  %v1229_v26 = vrot.slane %v1228_v19, 4 }
 0x1f0   : > { %538 = vst.msk [vmem:[#allocation2 + $0x4] sm:$0xf] %vm532_vm13, %v517_v55  ;;  %v560_v22 = vpack.i.b16 %v559_v14, %v558_v3  ;;  %v1244_v27 = vrot.slane %v559_v14, 4  ;;  %v1247_v28 = vrot.slane %v1245_v20, 5 }
 0x1f1   : > { %1002 = vrot.lane.b32.xlu0 %v553_v54, %s3054_s12  ;;  %v3258_v29 = vrot.slane %v574_v21, %v3167_v46  ;;  %v575_v52 = vcombine.high %v574_v21, %v4095_v0 }
 0x1f2   : > { %v599_v30 = vrot.slane %v560_v22, %v3161_v37  ;;  %v1248_v35 = vor.u32 %v1247_v28, %v1244_v27 }
 0x1f3   : > { %v523_v56 = vpop.permute.xlu0 %522  ;;  %v2937_v36 = vcombine.high %v3258_v29, %v3258_v29 }
 0x1f4   : > { %547 = vst.msk [vmem:[#allocation2 + $0x10] sm:$0xf] %vm532_vm13, %v523_v56  ;;  %v1218_v6 = vld [vmem:[#allocation2 + $0x8] sm:$0x1]  ;;  %v3231_v12 = vld [vmem:[#allocation2 + $0x14] sm:$0x1]  ;;  %v607_v38 = vrot.slane %v599_v30, %v3167_v46  ;;  %v600_v3 = vcombine.high %v599_v30, %v4095_v0 }
 0x1f5   : > { %v1929_v9 = vrot.slane %v1218_v6, 5  ;;  %v1936_v18 = vrot.slane %v3231_v12, 5  ;;  %v1249_v42 = vrot.slane %v1248_v35, 4  ;;  %v1239_v49 = vshll.u32 %v1218_v6, 16 }
 0x1f6   : > { %v2798_v43 = vcombine.low %v607_v38, %v607_v38  ;;  %v2938_v50 = vcombine.high %v607_v38, %v607_v38  ;;  %vm753_vm13 = vcmask 785408  }
 0x1f7   : > { %v3196_v57 = vld [vmem:[#allocation2 + $0x4] sm:$0xf]  ;;  %v1241_v55 = vrot.slane %v1239_v49, 5 }
 0x1f8   : > { %780 = vrot.lane.b32.xlu1 %v3196_v57, %s3053_s11  ;;  %v1926_v60 = vrot.slane %v3196_v57, 5  ;;  %v1230_v17 = vshll.u32 %v3196_v57, 16  ;;  %v564_v34 = vshrl.u32 %v3196_v57, 16 }
 0x1fa   : > { %v3214_v1 = vsel %vm3208_vm4, %v2882_v62, %v1926_v60  ;;  %v1928_v8 = vrot.slane %v1926_v60, 4  ;;  %v1232_v24 = vrot.slane %v1230_v17, 5  ;;  %v1235_v41 = vrot.slane %v564_v34, 4 }
 0x1fb   : > { %v3200_v59 = vld [vmem:[#allocation2 + $0x10] sm:$0xf]  ;;  %v1941_v19 = vshrl.u32 %v3214_v1, 16 }
 0x1fc   : > { %1000 = vrot.lane.b32.xlu1 %v3196_v57, %s3054_s12  ;;  %784 = vrot.lane.b32.xlu0 %v3200_v59, %s3053_s11  ;;  %v1933_v2 = vrot.slane %v3200_v59, 5  ;;  %v3236_v15 = vsel %vm3208_vm4, %v1928_v8, %v1929_v9  ;;  %v3263_v32 = vsel %vm3253_vm7, %v1229_v26, %v1232_v24  ;;  %v1250_v33 = vshll.u32 %v3200_v59, 16 }
 0x1fd   : > { %v563_v39 = vpack.i.b16 %v3200_v59, %v3196_v57  ;;  %v565_v45 = vshrl.u32 %v3200_v59, 16  ;;  %v1236_v48 = vor.u32 %v1235_v41, %v1232_v24  ;;  %v589_v57 = vrot.slane %v575_v52, %v3167_v46 }
 0x1fe   : > { %v3225_v7 = vsel %vm3208_vm4, %v2883_v4, %v1933_v2  ;;  %v1935_v16 = vrot.slane %v1933_v2, 4  ;;  %v1252_v40 = vrot.slane %v1250_v33, 5  ;;  %v1259_v2 = vshll.u32 %v3231_v12, 16 }
 0x1ff   : > { %v624_v44 = vrot.slane %v563_v39, %v3161_v37  ;;  %v566_v53 = vpack.i.b16 %v565_v45, %v564_v34  ;;  %v1237_v54 = vrot.slane %v1236_v48, 4  ;;  %v1255_v60 = vrot.slane %v565_v45, 4 }
 0x200   : > { %2370 = vrot.lane.b32.xlu1 %v3214_v1, %s3054_s12  ;;  %1004 = vrot.lane.b32.xlu0 %v3200_v59, %s3054_s12  ;;  %v3247_v23 = vsel %vm3208_vm4, %v1935_v16, %v1936_v18  ;;  %v3283_v47 = vsel %vm3253_vm7, %v1249_v42, %v1252_v40  ;;  %v2801_v61 = vcombine.low %v589_v57, %v589_v57  ;;  %v1261_v8 = vrot.slane %v1259_v2, 5 }
 0x201   : > { %v3289_v51 = vrot.slane %v624_v44, %v3167_v46  ;;  %v649_v58 = vrot.slane %v566_v53, %v3161_v37  ;;  %v3301_v59 = vsel %vm3253_vm7, %v1237_v54, %v1241_v55  ;;  %v1256_v63 = vor.u32 %v1255_v60, %v1252_v40 }
 0x202   : > { %v2939_v5 = vcombine.high %v589_v57, %v589_v57  ;;  %v614_v9 = vrot.slane %v600_v3, %v3167_v46  ;;  %v625_v11 = vcombine.high %v624_v44, %v4095_v0  ;;  %v1940_v14 = vpack.i.b16 %v3225_v7, %v3214_v1 }
 0x203   : > { %v2941_v56 = vcombine.high %v3289_v51, %v3289_v51  ;;  %v657_v62 = vrot.slane %v649_v58, %v3167_v46  ;;  %v1257_v6 = vrot.slane %v1256_v63, 4  ;;  %v1942_v16 = vshrl.u32 %v3225_v7, 16 }
 0x204   : > { %2154 = vrot.lane.b32.xlu0 %v3225_v7, %s3053_s11  ;;  %2374 = vrot.lane.b32.xlu1 %v3225_v7, %s3054_s12  ;;  %v2802_v12 = vcombine.low %v614_v9, %v614_v9  ;;  %v639_v17 = vrot.slane %v625_v11, %v3167_v46  ;;  %v650_v18 = vcombine.high %v649_v58, %v4095_v0  ;;  %v1948_v40 = vshrl.u32 %v3247_v23, 16 }
 0x205   : > { %v2805_v4 = vcombine.low %v657_v62, %v657_v62  ;;  %v2942_v10 = vcombine.high %v657_v62, %v657_v62  ;;  %v3318_v13 = vsel %vm3253_vm7, %v1257_v6, %v1261_v8  ;;  %v1946_v20 = vpack.i.b16 %v3247_v23, %v3236_v15 }
 0x206   : > { %v2940_v21 = vcombine.high %v614_v9, %v614_v9  ;;  %v1943_v22 = vpack.i.b16 %v1942_v16, %v1941_v19  ;;  %v2808_v24 = vcombine.low %v639_v17, %v639_v17  ;;  %v664_v25 = vrot.slane %v650_v18, %v3167_v46 }
 0x207   : > { %v1957_v7 = vrot.slane %v1940_v14, %v3161_v37  ;;  %v2007_v26 = vrot.slane %v1946_v20, %v3161_v37  ;;  %v2943_v28 = vcombine.high %v639_v17, %v639_v17  ;;  %v1947_v48 = vshrl.u32 %v3236_v15, 16 }
 0x208   : > { %2372 = vrot.lane.b32.xlu0 %v3236_v15, %s3054_s12  ;;  %2150 = vrot.lane.b32.xlu1 %v3214_v1, %s3053_s11  ;;  %v1265_v1 = vpack.i.b16 %v3283_v47, %v3263_v32  ;;  %v2809_v27 = vcombine.low %v664_v25, %v664_v25  ;;  %v1982_v33 = vrot.slane %v1943_v22, %v3161_v37  ;;  %v1266_v11 = vshrl.u32 %v3263_v32, 16 }
 0x209   : > { %v3342_v30 = vrot.slane %v1957_v7, %v3167_v46  ;;  %v3348_v34 = vrot.slane %v2007_v26, %v3167_v46  ;;  %v2944_v35 = vcombine.high %v664_v25, %v664_v25  ;;  %v1958_v44 = vcombine.high %v1957_v7, %v4095_v0 }
 0x20a   : > { %v1990_v38 = vrot.slane %v1982_v33, %v3167_v46  ;;  %v1282_v39 = vrot.slane %v1265_v1, %v3161_v37  ;;  %v2008_v45 = vcombine.high %v2007_v26, %v4095_v0  ;;  %v1949_v49 = vpack.i.b16 %v1948_v40, %v1947_v48 }
 0x20b   : > { %4105 = vst [vmem:[#allocation4_spill] sm:$0xff] %v3348_v34  ;;  %v2989_v41 = vcombine.high %v3348_v34, %v3348_v34  ;;  %v1972_v53 = vrot.slane %v1958_v44, %v3167_v46  ;;  %v1983_v55 = vcombine.high %v1982_v33, %v4095_v0  ;;  %vm2661_vm4 = vcmask 146432  }
 0x20c   : > { %2376 = vrot.lane.b32.xlu0 %v3247_v23, %s3054_s12  ;;  %2152 = vrot.lane.b32.xlu1 %v3236_v15, %s3053_s11  ;;  %v2884_v42 = vcombine.low %v1990_v38, %v1990_v38  ;;  %v2022_v54 = vrot.slane %v2008_v45, %v3167_v46  ;;  %v2032_v15 = vrot.slane %v1949_v49, %v3161_v37 }
 0x20d   : > { %v1997_v58 = vrot.slane %v1983_v55, %v3167_v46  ;;  %v2987_v62 = vcombine.high %v1972_v53, %v1972_v53 }
 0x20e   : > { %v2894_v57 = vcombine.low %v2022_v54, %v2022_v54  ;;  %v2040_v2 = vrot.slane %v2032_v15, %v3167_v46  ;;  %v2991_v18 = vcombine.high %v2022_v54, %v2022_v54 }
 0x20f   : > { %v2888_v63 = vcombine.low %v1997_v58, %v1997_v58  ;;  %v2988_v20 = vcombine.high %v1997_v58, %v1997_v58 }
 0x210   : > { %2156 = vrot.lane.b32.xlu0 %v3247_v23, %s3053_s11  ;;  %1475 = vrot.lane.b32.xlu1 %v3263_v32, %s3053_s11  ;;  %v1271_v23 = vpack.i.b16 %v3318_v13, %v3301_v59  ;;  %v2891_v6 = vcombine.low %v2040_v2, %v2040_v2  ;;  %v2990_v16 = vcombine.high %v2040_v2, %v2040_v2 }
 0x212   : > { %v1332_v60 = vrot.slane %v1271_v23, %v3161_v37 }
 0x214   : > { %675 = vrot.lane.b32.xlu0 %v2937_v36, %s3048_s8  ;;  %1695 = vrot.lane.b32.xlu1 %v3263_v32, %s3054_s12  ;;  %v2985_v36 = vcombine.high %v3342_v30, %v3342_v30  ;;  %v3384_v3 = vrot.slane %v1332_v60, %v3167_v46  ;;  %v1333_v25 = vcombine.high %v1332_v60, %v4095_v0 }
 0x216   : > { %v2965_v8 = vcombine.high %v3384_v3, %v3384_v3  ;;  %v1347_v26 = vrot.slane %v1333_v25, %v3167_v46 }
 0x218   : > { %670 = vrot.lane.b32.xlu1 %v2798_v43, %s3049_s9  ;;  %1479 = vrot.lane.b32.xlu0 %v3283_v47, %s3053_s11  ;;  %v3360_v43 = vrot.slane %v1282_v39, %v3167_v46  ;;  %v2967_v60 = vcombine.high %v1347_v26, %v1347_v26 }
 0x21a   : > { %v2961_v52 = vcombine.high %v3360_v43, %v3360_v43 }
 0x21c   : > { %680 = vrot.lane.b32.xlu1 %v2938_v50, %s3047_s7  ;;  %1699 = vrot.lane.b32.xlu0 %v3283_v47, %s3054_s12  ;;  %v2986_v50 = vcombine.high %v1990_v38, %v1990_v38 }
 0x220   : > { %1477 = vrot.lane.b32.xlu1 %v3301_v59, %s3053_s11  ;;  %710 = vrot.lane.b32.xlu0 %v2941_v56, %s3048_s8  ;;  %v2887_v56 = vcombine.low %v1972_v53, %v1972_v53 }
 0x224   : > { %1697 = vrot.lane.b32.xlu1 %v3301_v59, %s3054_s12  ;;  %685 = vrot.lane.b32.xlu0 %v2801_v61, %s3046_s6  ;;  %v1283_v61 = vcombine.high %v1282_v39, %v4095_v0 }
 0x226   : > { %v1297_v9 = vrot.slane %v1283_v61, %v3167_v46 }
 0x228   : > { %705 = vrot.lane.b32.xlu1 %v2805_v4, %s3049_s9  ;;  %695 = vrot.lane.b32.xlu0 %v2939_v5, %s3043_s28  ;;  %v1267_v4 = vshrl.u32 %v3283_v47, 16  ;;  %v1273_v5 = vshrl.u32 %v3318_v13, 16  ;;  %v2963_v44 = vcombine.high %v1297_v9, %v1297_v9 }
 0x22a   : > { %v1268_v14 = vpack.i.b16 %v1267_v4, %v1266_v11 }
 0x22c   : > { %715 = vrot.lane.b32.xlu1 %v2942_v10, %s3047_s7  ;;  %1481 = vrot.lane.b32.xlu0 %v3318_v13, %s3053_s11  ;;  %v2033_v10 = vcombine.high %v2032_v15, %v4095_v0  ;;  %v1307_v32 = vrot.slane %v1268_v14, %v3161_v37 }
 0x22e   : > { %v2047_v17 = vrot.slane %v2033_v10, %v3167_v46  ;;  %v1315_v22 = vrot.slane %v1307_v32, %v3167_v46 }
 0x230   : > { %690 = vrot.lane.b32.xlu1 %v2802_v12, %s3045_s30  ;;  %1701 = vrot.lane.b32.xlu0 %v3318_v13, %s3054_s12  ;;  %v1272_v12 = vshrl.u32 %v3301_v59, 16  ;;  %v2843_v13 = vcombine.low %v1297_v9, %v1297_v9  ;;  %v2895_v19 = vcombine.low %v2047_v17, %v2047_v17  ;;  %v2840_v7 = vcombine.low %v1315_v22, %v1315_v22 }
 0x232   : > { %v1274_v47 = vpack.i.b16 %v1273_v5, %v1272_v12 }
 0x234   : > { %700 = vrot.lane.b32.xlu1 %v2940_v21, %s3044_s29  ;;  %720 = vrot.lane.b32.xlu0 %v2808_v24, %s3046_s6  ;;  %v1357_v59 = vrot.slane %v1274_v47, %v3161_v37  ;;  %v2992_v21 = vcombine.high %v2047_v17, %v2047_v17 }
 0x236   : > { %v1365_v24 = vrot.slane %v1357_v59, %v3167_v46  ;;  %v1358_v40 = vcombine.high %v1357_v59, %v4095_v0 }
 0x238   : > { %725 = vrot.lane.b32.xlu1 %v2809_v27, %s3045_s30  ;;  %730 = vrot.lane.b32.xlu0 %v2943_v28, %s3043_s28  ;;  %v2847_v1 = vcombine.low %v1365_v24, %v1365_v24  ;;  %v1308_v27 = vcombine.high %v1307_v32, %v4095_v0 }
 0x23a   : > { %v1322_v38 = vrot.slane %v1308_v27, %v3167_v46 }
 0x23c   : > { %735 = vrot.lane.b32.xlu1 %v2944_v35, %s3044_s29  ;;  %2058 = vrot.lane.b32.xlu0 %v2985_v36, %s3048_s8  ;;  %v2962_v35 = vcombine.high %v1315_v22, %v1315_v22  ;;  %v2850_v36 = vcombine.low %v1347_v26, %v1347_v26  ;;  %v2844_v45 = vcombine.low %v1322_v38, %v1322_v38 }
 0x240   : > { %2093 = vrot.lane.b32.xlu1 %v2989_v41, %s3048_s8  ;;  %2053 = vrot.lane.b32.xlu0 %v2884_v42, %s3049_s9 }
 0x244   : > { %2063 = vrot.lane.b32.xlu1 %v2986_v50, %s3047_s7  ;;  %1383 = vrot.lane.b32.xlu0 %v2961_v52, %s3048_s8  ;;  %v2966_v50 = vcombine.high %v1365_v24, %v1365_v24  ;;  %v1372_v52 = vrot.slane %v1358_v40, %v3167_v46 }
 0x246   : > { %v2968_v4 = vcombine.high %v1372_v52, %v1372_v52 }
 0x248   : > { %2068 = vrot.lane.b32.xlu1 %v2887_v56, %s3046_s6  ;;  %2103 = vrot.lane.b32.xlu0 %v2894_v57, %s3046_s6  ;;  %v2964_v56 = vcombine.high %v1322_v38, %v1322_v38 }
 0x24c   : > { %2078 = vrot.lane.b32.xlu1 %v2987_v62, %s3043_s28  ;;  %2073 = vrot.lane.b32.xlu0 %v2888_v63, %s3045_s30 }
 0x250   : > { %2088 = vrot.lane.b32.xlu1 %v2891_v6, %s3049_s9  ;;  %1418 = vrot.lane.b32.xlu0 %v2965_v8, %s3048_s8  ;;  %v2851_v8 = vcombine.low %v1372_v52, %v1372_v52 }
 0x254   : > { %2098 = vrot.lane.b32.xlu1 %v2990_v16, %s3047_s7  ;;  %1393 = vrot.lane.b32.xlu0 %v2843_v13, %s3046_s6 }
 0x258   : > { %2113 = vrot.lane.b32.xlu1 %v2991_v18, %s3043_s28  ;;  %2108 = vrot.lane.b32.xlu0 %v2895_v19, %s3045_s30 }
 0x25b   : > { %v779_v28 = vpop.permute.xlu1 %778 }
 0x25c   : > { %2083 = vrot.lane.b32.xlu1 %v2988_v20, %s3044_s29  ;;  %2118 = vrot.lane.b32.xlu0 %v2992_v21, %s3044_s29  ;;  %v789_v48 = vshrl.u32 %v779_v28, 16 }
 0x25f   : > { %v783_v33 = vpop.permute.xlu0 %782  ;;  %v999_v41 = vpop.permute.xlu1 %998 }
 0x260   : > { %1378 = vrot.lane.b32.xlu1 %v2840_v7, %s3049_s9  ;;  %1413 = vrot.lane.b32.xlu0 %v2847_v1, %s3049_s9  ;;  %v790_v39 = vshrl.u32 %v783_v33, 16  ;;  %v788_v42 = vpack.i.b16 %v783_v33, %v779_v28  ;;  %v1009_v57 = vshrl.u32 %v999_v41, 16 }
 0x262   : > { %v791_v23 = vpack.i.b16 %v790_v39, %v789_v48  ;;  %v805_v53 = vrot.slane %v788_v42, %v3161_v37 }
 0x263   : > { %v1003_v49 = vpop.permute.xlu0 %1002 }
 0x264   : > { %1388 = vrot.lane.b32.xlu1 %v2962_v35, %s3047_s7  ;;  %1428 = vrot.lane.b32.xlu0 %v2850_v36, %s3046_s6  ;;  %v1008_v54 = vpack.i.b16 %v1003_v49, %v999_v41  ;;  %v1010_v55 = vshrl.u32 %v1003_v49, 16  ;;  %v3425_v58 = vrot.slane %v791_v23, %v3161_v37  ;;  %v3429_v5 = vrot.slane %v805_v53, %v3167_v46 }
 0x265   : > { %v806_v17 = vcombine.high %v805_v53, %v4095_v0 }
 0x266   : > { %v1011_v61 = vpack.i.b16 %v1010_v55, %v1009_v57  ;;  %v1025_v62 = vrot.slane %v1008_v54, %v3161_v37  ;;  %v838_v9 = vrot.slane %v3425_v58, %v3167_v46  ;;  %v2945_v47 = vcombine.high %v3429_v5, %v3429_v5 }
 0x267   : > { %v820_v24 = vrot.slane %v806_v17, %v3167_v46 }
 0x268   : > { %1403 = vrot.lane.b32.xlu1 %v2963_v44, %s3043_s28  ;;  %1398 = vrot.lane.b32.xlu0 %v2844_v45, %s3045_s30  ;;  %v3436_v10 = vrot.slane %v1011_v61, %v3161_v37  ;;  %v3444_v16 = vrot.slane %v1025_v62, %v3167_v46  ;;  %v2812_v18 = vcombine.low %v838_v9, %v838_v9 }
 0x269   : > { %v1026_v35 = vcombine.high %v1025_v62, %v4095_v0  ;;  %v2815_v41 = vcombine.low %v820_v24, %v820_v24  ;;  %v2946_v45 = vcombine.high %v838_v9, %v838_v9  ;;  %v831_v9 = vcombine.high %v3425_v58, %v4095_v0 }
 0x26a   : > { %v781_v15 = vpop.permute.xlu1 %780  ;;  %v2953_v20 = vcombine.high %v3444_v16, %v3444_v16  ;;  %v1058_v21 = vrot.slane %v3436_v10, %v3167_v46 }
 0x26b   : > { %v795_v33 = vshrl.u32 %v781_v15, 16  ;;  %v1040_v53 = vrot.slane %v1026_v35, %v3167_v46 }
 0x26c   : > { %1423 = vrot.lane.b32.xlu1 %v2966_v50, %s3047_s7  ;;  %1408 = vrot.lane.b32.xlu0 %v2964_v56, %s3044_s29  ;;  %v2826_v26 = vcombine.low %v1058_v21, %v1058_v21  ;;  %v2954_v52 = vcombine.high %v1058_v21, %v1058_v21  ;;  %v2947_v56 = vcombine.high %v820_v24, %v820_v24 }
 0x26d   : > { %v2829_v57 = vcombine.low %v1040_v53, %v1040_v53  ;;  %v2955_v61 = vcombine.high %v1040_v53, %v1040_v53  ;;  %v845_v24 = vrot.slane %v831_v9, %v3167_v46 }
 0x26e   : > { %v1001_v63 = vpop.permute.xlu1 %1000  ;;  %v785_v2 = vpop.permute.xlu0 %784 }
 0x26f   : > { %v794_v6 = vpack.i.b16 %v785_v2, %v781_v15  ;;  %v796_v25 = vshrl.u32 %v785_v2, 16  ;;  %v1015_v44 = vshrl.u32 %v1001_v63, 16 }
 0x270   : > { %1438 = vrot.lane.b32.xlu1 %v2967_v60, %s3043_s28  ;;  %1443 = vrot.lane.b32.xlu0 %v2968_v4, %s3044_s29 }
 0x271   : > { %v855_v11 = vrot.slane %v794_v6, %v3161_v37  ;;  %v797_v36 = vpack.i.b16 %v796_v25, %v795_v33  ;;  %v1051_v25 = vcombine.high %v3436_v10, %v4095_v0 }
 0x272   : > { %v3439_v12 = vpop.permute.xlu1 %2370  ;;  %v1005_v14 = vpop.permute.xlu0 %1004 }
 0x273   : > { %v1014_v13 = vpack.i.b16 %v1005_v14, %v1001_v63  ;;  %v3459_v22 = vrot.slane %v855_v11, %v3167_v46  ;;  %v1016_v38 = vshrl.u32 %v1005_v14, 16  ;;  %v3485_v48 = vrot.slane %v797_v36, %v3161_v37 }
 0x274   : > { %1433 = vrot.lane.b32.xlu1 %v2851_v8, %s3045_s30  ;;  %906 = vrot.lane.b32.xlu0 %v2945_v47, %s3048_s8  ;;  %v856_v62 = vcombine.high %v855_v11, %v4095_v0  ;;  %v2816_v36 = vcombine.low %v845_v24, %v845_v24  ;;  %v2381_v53 = vshrl.u32 %v3439_v12, 16 }
 0x275   : > { %v1075_v19 = vrot.slane %v1014_v13, %v3161_v37  ;;  %v2949_v27 = vcombine.high %v3459_v22, %v3459_v22  ;;  %v1017_v49 = vpack.i.b16 %v1016_v38, %v1015_v44  ;;  %v888_v60 = vrot.slane %v3485_v48, %v3167_v46 }
 0x276   : > { %v3450_v32 = vpop.permute.xlu1 %2374  ;;  %v3452_v59 = vpop.permute.xlu0 %2154  ;;  %v870_v17 = vrot.slane %v856_v62, %v3167_v46 }
 0x277   : > { %v3471_v28 = vrot.slane %v1075_v19, %v3167_v46  ;;  %v1100_v54 = vrot.slane %v1017_v49, %v3161_v37  ;;  %v1076_v63 = vcombine.high %v1075_v19, %v4095_v0  ;;  %v2819_v6 = vcombine.low %v888_v60, %v888_v60 }
 0x278   : > { %901 = vrot.lane.b32.xlu0 %v2812_v18, %s3049_s9  ;;  %1126 = vrot.lane.b32.xlu1 %v2953_v20, %s3048_s8  ;;  %v2950_v13 = vcombine.high %v888_v60, %v888_v60  ;;  %v2822_v21 = vcombine.low %v870_v17, %v870_v17  ;;  %v2382_v38 = vshrl.u32 %v3450_v32, 16  ;;  %v2951_v49 = vcombine.high %v870_v17, %v870_v17 }
 0x279   : > { %v2957_v42 = vcombine.high %v3471_v28, %v3471_v28  ;;  %v1108_v8 = vrot.slane %v1100_v54, %v3167_v46  ;;  %v1090_v18 = vrot.slane %v1076_v63, %v3167_v46 }
 0x27a   : > { %v3464_v7 = vpop.permute.xlu1 %2150  ;;  %v3466_v1 = vpop.permute.xlu0 %2372 }
 0x27b   : > { %v2833_v11 = vcombine.low %v1108_v8, %v1108_v8  ;;  %v2836_v58 = vcombine.low %v1090_v18, %v1090_v18  ;;  %v2958_v35 = vcombine.high %v1108_v8, %v1108_v8  ;;  %v2160_v10 = vpack.i.b16 %v3452_v59, %v3464_v7 }
 0x27c   : > { %1121 = vrot.lane.b32.xlu0 %v2826_v26, %s3049_s9  ;;  %941 = vrot.lane.b32.xlu1 %v2949_v27, %s3048_s8  ;;  %v2380_v26 = vpack.i.b16 %v3450_v32, %v3439_v12  ;;  %v1101_v32 = vcombine.high %v1100_v54, %v4095_v0  ;;  %v881_v12 = vcombine.high %v3485_v48, %v4095_v0  ;;  %v2161_v54 = vshrl.u32 %v3464_v7, 16 }
 0x27d   : > { %v2162_v7 = vshrl.u32 %v3452_v59, 16 }
 0x27e   : > { %v3476_v39 = vpop.permute.xlu1 %2152  ;;  %v3478_v40 = vpop.permute.xlu0 %2376  ;;  %v1115_v9 = vrot.slane %v1101_v32, %v3167_v46  ;;  %v895_v59 = vrot.slane %v881_v12, %v3167_v46 }
 0x27f   : > { %v2386_v17 = vpack.i.b16 %v3478_v40, %v3466_v1 }
 0x280   : > { %916 = vrot.lane.b32.xlu0 %v2815_v41, %s3046_s6  ;;  %1161 = vrot.lane.b32.xlu1 %v2957_v42, %s3048_s8  ;;  %v1065_v41 = vrot.slane %v1051_v25, %v3167_v46  ;;  %v2397_v42 = vrot.slane %v2380_v26, %v3161_v37 }
 0x281   : > { %v3584_v25 = vrot.slane %v2386_v17, %v3161_v37 }
 0x282   : > { %v3487_v23 = vpop.permute.xlu1 %1475  ;;  %v3489_v50 = vpop.permute.xlu0 %2156  ;;  %v3553_v60 = vrot.slane %v2397_v42, %v3167_v46  ;;  %v2956_v8 = vcombine.high %v1065_v41, %v1065_v41 }
 0x284   : > { %1131 = vrot.lane.b32.xlu0 %v2954_v52, %s3047_s7  ;;  %911 = vrot.lane.b32.xlu1 %v2946_v45, %s3047_s7  ;;  %v2959_v52 = vcombine.high %v1090_v18, %v1090_v18  ;;  %v3001_v48 = vcombine.high %v3553_v60, %v3553_v60 }
 0x286   : > { %v3495_v55 = vpop.permute.xlu1 %1695  ;;  %v3497_v15 = vpop.permute.xlu0 %675 }
 0x288   : > { %926 = vrot.lane.b32.xlu0 %v2947_v56, %s3043_s28  ;;  %1136 = vrot.lane.b32.xlu1 %v2829_v57, %s3046_s6  ;;  %v2948_v56 = vcombine.high %v845_v24, %v845_v24  ;;  %v2383_v57 = vpack.i.b16 %v2382_v38, %v2381_v53  ;;  %v2837_v24 = vcombine.low %v1115_v9, %v1115_v9 }
 0x28a   : > { %v3505_v2 = vpop.permute.xlu1 %670  ;;  %v3507_v4 = vpop.permute.xlu0 %1479 }
 0x28c   : > { %1146 = vrot.lane.b32.xlu0 %v2955_v61, %s3043_s28  ;;  %936 = vrot.lane.b32.xlu1 %v2819_v6, %s3049_s9  ;;  %v2177_v61 = vrot.slane %v2160_v10, %v3161_v37  ;;  %v2830_v6 = vcombine.low %v1065_v41, %v1065_v41  ;;  %v3602_v10 = vrot.slane %v3584_v25, %v3167_v46 }
 0x28e   : > { %v3514_v14 = vpop.permute.xlu1 %680  ;;  %v3516_v47 = vpop.permute.xlu0 %1699 }
 0x28f   : > { %v1705_v31 = vpack.i.b16 %v3516_v47, %v3495_v55 }
 0x290   : > { %1156 = vrot.lane.b32.xlu0 %v2833_v11, %s3049_s9  ;;  %946 = vrot.lane.b32.xlu1 %v2950_v13, %s3047_s7  ;;  %v3567_v11 = vrot.slane %v2383_v57, %v3161_v37  ;;  %v3570_v13 = vrot.slane %v2177_v61, %v3167_v46 }
 0x292   : > { %v3522_v19 = vpop.permute.xlu1 %1477  ;;  %v3524_v20 = vpop.permute.xlu0 %710  ;;  %v2430_v38 = vrot.slane %v3567_v11, %v3167_v46 }
 0x294   : > { %951 = vrot.lane.b32.xlu0 %v2822_v21, %s3046_s6  ;;  %1171 = vrot.lane.b32.xlu1 %v2836_v58, %s3046_s6  ;;  %v2163_v58 = vpack.i.b16 %v2162_v7, %v2161_v54  ;;  %v2912_v32 = vcombine.low %v2430_v38, %v2430_v38  ;;  %v2952_v54 = vcombine.high %v895_v59, %v895_v59 }
 0x295   : > { %v2178_v7 = vcombine.high %v2177_v61, %v4095_v0 }
 0x296   : > { %v3533_v27 = vpop.permute.xlu1 %1697  ;;  %v3535_v33 = vpop.permute.xlu0 %685  ;;  %v3598_v41 = vrot.slane %v2163_v58, %v3161_v37 }
 0x298   : > { %1166 = vrot.lane.b32.xlu0 %v2958_v35, %s3047_s7  ;;  %921 = vrot.lane.b32.xlu1 %v2816_v36, %s3045_s30  ;;  %v2993_v36 = vcombine.high %v3570_v13, %v3570_v13  ;;  %v2210_v17 = vrot.slane %v3598_v41, %v3167_v46 }
 0x29a   : > { %v3544_v44 = vpop.permute.xlu1 %705  ;;  %v3546_v45 = vpop.permute.xlu0 %695 }
 0x29c   : > { %961 = vrot.lane.b32.xlu0 %v2951_v49, %s3043_s28  ;;  %1181 = vrot.lane.b32.xlu1 %v2959_v52, %s3043_s28  ;;  %v2166_v49 = vpack.i.b16 %v3489_v50, %v3476_v39 }
 0x29e   : > { %v3556_v62 = vpop.permute.xlu1 %715  ;;  %v3558_v63 = vpop.permute.xlu0 %1481  ;;  %v3613_v57 = vrot.slane %v2166_v49, %v3161_v37  ;;  %v2898_v49 = vcombine.low %v2210_v17, %v2210_v17 }
 0x2a0   : > { %1141 = vrot.lane.b32.xlu0 %v2830_v6, %s3045_s30  ;;  %931 = vrot.lane.b32.xlu1 %v2948_v56, %s3044_s29  ;;  %v2823_v56 = vcombine.low %v895_v59, %v895_v59  ;;  %v3629_v58 = vrot.slane %v3613_v57, %v3167_v46  ;;  %v2960_v59 = vcombine.high %v1115_v9, %v1115_v9 }
 0x2a1   : > { %v2192_v9 = vrot.slane %v2178_v7, %v3167_v46 }
 0x2a2   : > { %v3574_v18 = vpop.permute.xlu1 %690  ;;  %v3576_v21 = vpop.permute.xlu0 %1701 }
 0x2a4   : > { %1151 = vrot.lane.b32.xlu0 %v2956_v8, %s3044_s29  ;;  %2498 = vrot.lane.b32.xlu1 %v3001_v48, %s3048_s8  ;;  %v3005_v8 = vcombine.high %v3602_v10, %v3602_v10  ;;  %v2398_v48 = vcombine.high %v2397_v42, %v4095_v0  ;;  %v1485_v42 = vpack.i.b16 %v3507_v4, %v3487_v23 }
 0x2a6   : > { %v3586_v26 = vpop.permute.xlu1 %700  ;;  %v3588_v35 = vpop.permute.xlu0 %720  ;;  %v2412_v0 = vrot.slane %v2398_v48, %v3167_v46  ;;  %v2901_v48 = vcombine.low %v2192_v9, %v2192_v9 }
 0x2a8   : > { %1176 = vrot.lane.b32.xlu0 %v2837_v24, %s3045_s30  ;;  %2278 = vrot.lane.b32.xlu1 %v2993_v36, %s3048_s8  ;;  %v2915_v34 = vcombine.low %v2412_v0, %v2412_v0 }
 0x2aa   : > { %v3606_v52 = vpop.permute.xlu1 %725  ;;  %v3608_v53 = vpop.permute.xlu0 %730 }
 0x2ac   : > { %2493 = vrot.lane.b32.xlu0 %v2912_v32, %s3049_s9  ;;  %956 = vrot.lane.b32.xlu1 %v2823_v56, %s3045_s30  ;;  %v2388_v32 = vshrl.u32 %v3478_v40, 16  ;;  %v3002_v56 = vcombine.high %v2430_v38, %v2430_v38  ;;  %v2168_v38 = vshrl.u32 %v3489_v50, 16 }
 0x2ae   : > { %v3615_v6 = vpop.permute.xlu1 %735  ;;  %v3617_v12 = vpop.permute.xlu0 %2058 }
 0x2b0   : > { %966 = vrot.lane.b32.xlu1 %v2952_v54, %s3044_s29  ;;  %2533 = vrot.lane.b32.xlu0 %v3005_v8, %s3048_s8  ;;  %v2997_v8 = vcombine.high %v3629_v58, %v3629_v58 }
 0x2b2   : > { %v3631_v24 = vpop.permute.xlu1 %2093  ;;  %v3633_v36 = vpop.permute.xlu0 %2053 }
 0x2b3   : > { %4106 = vst [vmem:[#allocation5_spill] sm:$0xff] %v3631_v24 }
 0x2b4   : > { %1186 = vrot.lane.b32.xlu1 %v2960_v59, %s3044_s29  ;;  %2273 = vrot.lane.b32.xlu0 %v2898_v49, %s3049_s9  ;;  %v2387_v59 = vshrl.u32 %v3466_v1, 16  ;;  %v3653_v49 = vrot.slane %v1485_v42, %v3161_v37  ;;  %v2167_v1 = vshrl.u32 %v3476_v39, 16  ;;  %v3672_v42 = vrot.slane %v1705_v31, %v3161_v37 }
 0x2b5   : > { %v3003_v39 = vcombine.high %v2412_v0, %v2412_v0 }
 0x2b6   : > { %v3640_v61 = vpop.permute.xlu1 %2063  ;;  %v3642_v54 = vpop.permute.xlu0 %1383  ;;  %v2389_v40 = vpack.i.b16 %v2388_v32, %v2387_v59  ;;  %v2169_v32 = vpack.i.b16 %v2168_v38, %v2167_v1 }
 0x2b7   : > { %4107 = vst [vmem:[#allocation6_spill] sm:$0xff] %v3640_v61 }
 0x2b8   : > { %2503 = vrot.lane.b32.xlu0 %v3002_v56, %s3047_s7  ;;  %2313 = vrot.lane.b32.xlu1 %v2997_v8, %s3048_s8  ;;  %v3665_v50 = vrot.slane %v2389_v40, %v3161_v37  ;;  %v3669_v56 = vrot.slane %v3653_v49, %v3167_v46  ;;  %v3685_v40 = vrot.slane %v3672_v42, %v3167_v46 }
 0x2ba   : > { %v3657_v24 = vpop.permute.xlu1 %2068  ;;  %v3659_v7 = vpop.permute.xlu0 %2103  ;;  %v2969_v0 = vcombine.high %v3669_v56, %v3669_v56 }
 0x2bb   : > { %4108 = vst [vmem:[#allocation7_spill] sm:$0xff] %v3657_v24  ;;  %4109 = vst [vmem:[#allocation8_spill] sm:$0xff] %v3659_v7  ;;  %v2994_v7 = vcombine.high %v2210_v17, %v2210_v17  ;;  %v2480_v17 = vrot.slane %v3665_v50, %v3167_v46 }
 0x2bc   : > { %2288 = vrot.lane.b32.xlu0 %v2901_v48, %s3046_s6  ;;  %2508 = vrot.lane.b32.xlu1 %v2915_v34, %s3046_s6  ;;  %v3681_v34 = vrot.slane %v2169_v32, %v3161_v37  ;;  %v2995_v48 = vcombine.high %v2192_v9, %v2192_v9  ;;  %v2977_v9 = vcombine.high %v3685_v40, %v3685_v40 }
 0x2be   : > { %v3674_v8 = vpop.permute.xlu1 %2078  ;;  %v3676_v59 = vpop.permute.xlu0 %2073 }
 0x2bf   : > { %4110 = vst [vmem:[#allocation9_spill] sm:$0xff] %v3674_v8  ;;  %4111 = vst [vmem:[#allocation10_spill] sm:$0xff] %v3676_v59  ;;  %v2919_v8 = vcombine.low %v2480_v17, %v2480_v17  ;;  %v2260_v59 = vrot.slane %v3681_v34, %v3167_v46 }
 0x2c0   : > { %2518 = vrot.lane.b32.xlu0 %v3003_v39, %s3043_s28  ;;  %2283 = vrot.lane.b32.xlu1 %v2994_v7, %s3047_s7  ;;  %v4113_v7 = vmov 0  }
 0x2c1   : > { %v2423_v1 = vcombine.high %v3567_v11, %v4113_v7 }
 0x2c2   : > { %v3687_v38 = vpop.permute.xlu1 %2088  ;;  %v3689_v31 = vpop.permute.xlu0 %1418 }
 0x2c3   : > { %4112 = vst [vmem:[#allocation11_spill] sm:$0xff] %v3687_v38  ;;  %v2905_v38 = vcombine.low %v2260_v59, %v2260_v59  ;;  %v2437_v24 = vrot.slane %v2423_v1, %v3167_v46 }
 0x2c4   : > { %2298 = vrot.lane.b32.xlu0 %v2995_v48, %s3043_s28  ;;  %1603 = vrot.lane.b32.xlu1 %v2969_v0, %s3048_s8  ;;  %v2448_v48 = vcombine.high %v3584_v25, %v4113_v7  ;;  %v1487_v25 = vshrl.u32 %v3507_v4, 16 }
 0x2c6   : > { %v3699_v32 = vpop.permute.xlu1 %2098  ;;  %v3701_v39 = vpop.permute.xlu0 %1393  ;;  %v2462_v1 = vrot.slane %v2448_v48, %v3167_v46 }
 0x2c7   : > { %4114 = vst [vmem:[#allocation12_spill] sm:$0xff] %v3699_v32  ;;  %v3006_v32 = vcombine.high %v2480_v17, %v2480_v17  ;;  %v2916_v17 = vcombine.low %v2437_v24, %v2437_v24 }
 0x2c8   : > { %2528 = vrot.lane.b32.xlu1 %v2919_v8, %s3049_s9  ;;  %1823 = vrot.lane.b32.xlu0 %v2977_v9, %s3048_s8  ;;  %v2203_v8 = vcombine.high %v3598_v41, %v4113_v7  ;;  %v2228_v9 = vcombine.high %v3613_v57, %v4113_v7 }
 0x2ca   : > { %v3711_v0 = vpop.permute.xlu1 %2113  ;;  %v3713_v11 = vpop.permute.xlu0 %2108  ;;  %v3732_v57 = vrot.slane %v2203_v8, %v3167_v46  ;;  %v2242_v4 = vrot.slane %v2228_v9, %v3167_v46 }
 0x2cb   : > { %4115 = vst [vmem:[#allocation13_spill] sm:$0xff] %v3711_v0  ;;  %4116 = vst [vmem:[#allocation14_spill] sm:$0xff] %v3713_v11  ;;  %v2998_v11 = vcombine.high %v2260_v59, %v2260_v59  ;;  %v1491_v59 = vpack.i.b16 %v3558_v63, %v3522_v19 }
 0x2cc   : > { %2538 = vrot.lane.b32.xlu1 %v3006_v32, %s3047_s7  ;;  %2308 = vrot.lane.b32.xlu0 %v2905_v38, %s3049_s9  ;;  %v1486_v32 = vshrl.u32 %v3487_v23, 16  ;;  %v1707_v38 = vshrl.u32 %v3516_v47, 16  ;;  %v2922_v23 = vcombine.low %v2462_v1, %v2462_v1  ;;  %v2902_v47 = vcombine.low %v3732_v57, %v3732_v57 }
 0x2cd   : > { %v2908_v9 = vcombine.low %v2242_v4, %v2242_v4 }
 0x2ce   : > { %v3723_v61 = vpop.permute.xlu1 %2083  ;;  %v3725_v0 = vpop.permute.xlu0 %2118  ;;  %v1488_v41 = vpack.i.b16 %v1487_v25, %v1486_v32 }
 0x2cf   : > { %4117 = vst [vmem:[#allocation15_spill] sm:$0xff] %v3723_v61  ;;  %4118 = vst [vmem:[#allocation16_spill] sm:$0xff] %v3725_v0  ;;  %v3007_v61 = vcombine.high %v2462_v1, %v2462_v1  ;;  %v3749_v1 = vrot.slane %v1491_v59, %v3161_v37 }
 0x2d0   : > { %2513 = vrot.lane.b32.xlu1 %v2916_v17, %s3045_s30  ;;  %2318 = vrot.lane.b32.xlu0 %v2998_v11, %s3047_s7  ;;  %v1706_v11 = vshrl.u32 %v3495_v55, 16  ;;  %v3744_v8 = vrot.slane %v1488_v41, %v3161_v37  ;;  %v3004_v41 = vcombine.high %v2437_v24, %v2437_v24 }
 0x2d2   : > { %v1379_v0 = vpop.permute.xlu1 %1378  ;;  %v1414_v48 = vpop.permute.xlu0 %1413  ;;  %v1708_v25 = vpack.i.b16 %v1707_v38, %v1706_v11  ;;  %v2999_v38 = vcombine.high %v2242_v4, %v2242_v4  ;;  %v1535_v59 = vrot.slane %v3744_v8, %v3167_v46 }
 0x2d3   : > { %v1447_v17 = vsel %vm737_vm8, %v3360_v43, %v1379_v0  ;;  %v1711_v43 = vpack.i.b16 %v3576_v21, %v3533_v27  ;;  %v1462_v24 = vsel %vm737_vm8, %v3384_v3, %v1414_v48 }
 0x2d4   : > { %2553 = vrot.lane.b32.xlu1 %v3007_v61, %s3043_s28  ;;  %2543 = vrot.lane.b32.xlu0 %v2922_v23, %s3046_s6  ;;  %v1449_v61 = vsel %vm741_vm9, %v1447_v17, %v3642_v54  ;;  %v3761_v23 = vrot.slane %v1708_v25, %v3161_v37  ;;  %v3765_v54 = vrot.slane %v3749_v1, %v3167_v46 }
 0x2d5   : > { %v3768_v17 = vrot.slane %v1711_v43, %v3161_v37  ;;  %v1723_v43 = vcombine.high %v3672_v42, %v4113_v7  ;;  %v1464_v3 = vsel %vm741_vm9, %v1462_v24, %v3689_v31  ;;  %v1503_v31 = vcombine.high %v3653_v49, %v4113_v7 }
 0x2d6   : > { %v1389_v55 = vpop.permute.xlu1 %1388  ;;  %v1429_v0 = vpop.permute.xlu0 %1428  ;;  %4119 = vst [vmem:[#allocation17_spill] sm:$0xff] %v3765_v54 }
 0x2d7   : > { %v1451_v32 = vsel %vm744_vm10, %v1449_v61, %v1389_v55  ;;  %v2854_v55 = vcombine.low %v1535_v59, %v1535_v59 }
 0x2d8   : > { %2293 = vrot.lane.b32.xlu1 %v2902_v47, %s3045_s30  ;;  %2323 = vrot.lane.b32.xlu0 %v2908_v9, %s3046_s6  ;;  %v1453_v47 = vsel %vm747_vm11, %v1451_v32, %v3701_v39  ;;  %v3782_v39 = vrot.slane %v3768_v17, %v3167_v46  ;;  %v2973_v32 = vcombine.high %v3765_v54, %v3765_v54 }
 0x2da   : > { %v1404_v11 = vpop.permute.xlu1 %1403  ;;  %v1399_v9 = vpop.permute.xlu0 %1398 }
 0x2db   : > { %v1455_v4 = vsel %vm750_vm12, %v1453_v47, %v1399_v9  ;;  %v1493_v47 = vshrl.u32 %v3558_v63, 16 }
 0x2dc   : > { %2523 = vrot.lane.b32.xlu1 %v3004_v41, %s3044_s29  ;;  %2333 = vrot.lane.b32.xlu0 %v2999_v38, %s3043_s28  ;;  %v1457_v25 = vsel %vm753_vm13, %v1455_v4, %v1404_v11  ;;  %v1755_v41 = vrot.slane %v3761_v23, %v3167_v46 }
 0x2de   : > { %v1424_v61 = vpop.permute.xlu1 %1423  ;;  %v1409_v48 = vpop.permute.xlu0 %1408  ;;  %v2868_v4 = vcombine.low %v1755_v41, %v1755_v41 }
 0x2df   : > { %v1466_v38 = vsel %vm744_vm10, %v1464_v3, %v1424_v61  ;;  %v3792_v42 = vsel %vm756_vm14, %v1457_v25, %v1409_v48  ;;  %v2981_v61 = vcombine.high %v3782_v39, %v3782_v39  ;;  %v1737_v25 = vrot.slane %v1723_v43, %v3167_v46 }
 0x2e0   : > { %1598 = vrot.lane.b32.xlu0 %v2854_v55, %s3049_s9  ;;  %1638 = vrot.lane.b32.xlu1 %v2973_v32, %s3048_s8  ;;  %v1468_v11 = vsel %vm747_vm11, %v1466_v38, %v1429_v0  ;;  %v1492_v3 = vshrl.u32 %v3522_v19, 16  ;;  %v2253_v0 = vcombine.high %v3681_v34, %v4113_v7  ;;  %v2970_v32 = vcombine.high %v1535_v59, %v1535_v59 }
 0x2e1   : > { %v2871_v48 = vcombine.low %v1737_v25, %v1737_v25  ;;  %v1517_v38 = vrot.slane %v1503_v31, %v3167_v46  ;;  %v2473_v19 = vcombine.high %v3665_v50, %v4113_v7  ;;  %v1712_v50 = vshrl.u32 %v3533_v27, 16 }
 0x2e2   : > { %v1439_v9 = vpop.permute.xlu1 %1438  ;;  %v1444_v24 = vpop.permute.xlu0 %1443  ;;  %v1494_v49 = vpack.i.b16 %v1493_v47, %v1492_v3  ;;  %v3819_v47 = vrot.slane %v2253_v0, %v3167_v46  ;;  %v1553_v0 = vcombine.high %v3749_v1, %v4113_v7 }
 0x2e4   : > { %1818 = vrot.lane.b32.xlu1 %v2868_v4, %s3049_s9  ;;  %1858 = vrot.lane.b32.xlu0 %v2981_v61, %s3048_s8  ;;  %v3822_v59 = vrot.slane %v1494_v49, %v3161_v37  ;;  %v2857_v4 = vcombine.low %v1517_v38, %v1517_v38  ;;  %v2909_v3 = vcombine.low %v3819_v47, %v3819_v47 }
 0x2e6   : > { %v1434_v55 = vpop.permute.xlu1 %1433  ;;  %v907_v63 = vpop.permute.xlu0 %906  ;;  %v1585_v27 = vrot.slane %v3822_v59, %v3167_v46 }
 0x2e7   : > { %v1470_v54 = vsel %vm750_vm12, %v1468_v11, %v1434_v55  ;;  %v1713_v11 = vshrl.u32 %v3576_v21, 16  ;;  %v2487_v21 = vrot.slane %v2473_v19, %v3167_v46 }
 0x2e8   : > { %v1472_v43 = vsel %vm753_vm13, %v1470_v54, %v1439_v9  ;;  %1833 = vrot.lane.b32.xlu1 %v2871_v48, %s3046_s6  ;;  %1608 = vrot.lane.b32.xlu0 %v2970_v32, %s3047_s7  ;;  %v2971_v9 = vcombine.high %v1517_v38, %v1517_v38  ;;  %v2861_v19 = vcombine.low %v1585_v27, %v1585_v27 }
 0x2e9   : > { %v3816_v34 = vsel %vm756_vm14, %v1472_v43, %v1444_v24  ;;  %v1714_v49 = vpack.i.b16 %v1713_v11, %v1712_v50  ;;  %v2923_v11 = vcombine.low %v2487_v21, %v2487_v21 }
 0x2ea   : > { %v1127_v31 = vpop.permute.xlu1 %1126  ;;  %v902_v54 = vpop.permute.xlu0 %901 }
 0x2eb   : > { %v970_v61 = vsel %vm737_vm8, %v3429_v5, %v902_v54  ;;  %v2978_v5 = vcombine.high %v1755_v41, %v1755_v41  ;;  %v1797_v38 = vrot.slane %v1714_v49, %v3161_v37  ;;  %v1567_v41 = vrot.slane %v1553_v0, %v3167_v46 }
 0x2ec   : > { %1623 = vrot.lane.b32.xlu1 %v2971_v9, %s3043_s28  ;;  %1613 = vrot.lane.b32.xlu0 %v2857_v4, %s3046_s6  ;;  %v972_v24 = vsel %vm741_vm9, %v970_v61, %v907_v63  ;;  %v2979_v61 = vcombine.high %v1737_v25, %v1737_v25  ;;  %v1528_v0 = vcombine.high %v3744_v8, %v4113_v7 }
 0x2ed   : > { %v2864_v4 = vcombine.low %v1567_v41, %v1567_v41 }
 0x2ee   : > { %v942_v55 = vpop.permute.xlu1 %941  ;;  %v1122_v48 = vpop.permute.xlu0 %1121  ;;  %v1542_v8 = vrot.slane %v1528_v0, %v3167_v46 }
 0x2ef   : > { %v1190_v32 = vsel %vm737_vm8, %v3444_v16, %v1122_v48  ;;  %v1773_v16 = vcombine.high %v3768_v17, %v4113_v7 }
 0x2f0   : > { %2328 = vrot.lane.b32.xlu1 %v2909_v3, %s3045_s30  ;;  %1828 = vrot.lane.b32.xlu0 %v2978_v5, %s3047_s7  ;;  %v1192_v63 = vsel %vm741_vm9, %v1190_v32, %v1127_v31  ;;  %v1805_v31 = vrot.slane %v1797_v38, %v3167_v46  ;;  %v3008_v5 = vcombine.high %v2487_v21, %v2487_v21 }
 0x2f1   : > { %v1787_v25 = vrot.slane %v1773_v16, %v3167_v46 }
 0x2f2   : > { %v1162_v43 = vpop.permute.xlu1 %1161  ;;  %v917_v1 = vpop.permute.xlu0 %916  ;;  %v2982_v48 = vcombine.high %v1805_v31, %v1805_v31 }
 0x2f4   : > { %1633 = vrot.lane.b32.xlu1 %v2861_v19, %s3049_s9  ;;  %2548 = vrot.lane.b32.xlu0 %v2923_v11, %s3045_s30  ;;  %v2878_v19 = vcombine.low %v1787_v25, %v1787_v25  ;;  %v2875_v11 = vcombine.low %v1805_v31, %v1805_v31 }
 0x2f6   : > { %v912_v54 = vpop.permute.xlu1 %911  ;;  %v1132_v9 = vpop.permute.xlu0 %1131 }
 0x2f7   : > { %v974_v37 = vsel %vm744_vm10, %v972_v24, %v912_v54  ;;  %v1194_v50 = vsel %vm744_vm10, %v1192_v63, %v1132_v9  ;;  %v1748_v24 = vcombine.high %v3761_v23, %v4113_v7 }
 0x2f8   : > { %1648 = vrot.lane.b32.xlu1 %v2864_v4, %s3046_s6  ;;  %1843 = vrot.lane.b32.xlu0 %v2979_v61, %s3043_s28  ;;  %v976_v3 = vsel %vm747_vm11, %v974_v37, %v917_v1  ;;  %v2858_v4 = vcombine.low %v1542_v8, %v1542_v8  ;;  %v2974_v61 = vcombine.high %v1585_v27, %v1585_v27 }
 0x2f9   : > { %v1762_v23 = vrot.slane %v1748_v24, %v3167_v46  ;;  %v2975_v27 = vcombine.high %v1567_v41, %v1567_v41 }
 0x2fa   : > { %v1137_v17 = vpop.permute.xlu1 %1136  ;;  %v927_v49 = vpop.permute.xlu0 %926 }
 0x2fb   : > { %v1196_v32 = vsel %vm747_vm11, %v1194_v50, %v1137_v17  ;;  %v2872_v17 = vcombine.low %v1762_v23, %v1762_v23 }
 0x2fc   : > { %1863 = vrot.lane.b32.xlu1 %v2982_v48, %s3047_s7  ;;  %2558 = vrot.lane.b32.xlu0 %v3008_v5, %s3044_s29 }
 0x2fe   : > { %v937_v63 = vpop.permute.xlu1 %936  ;;  %v1147_v1 = vpop.permute.xlu0 %1146 }
 0x2ff   : > { %v985_v21 = vsel %vm737_vm8, %v3459_v22, %v937_v63  ;;  %v2972_v63 = vcombine.high %v1542_v8, %v1542_v8 }
 0x300   : > { %1868 = vrot.lane.b32.xlu1 %v2878_v19, %s3046_s6  ;;  %1853 = vrot.lane.b32.xlu0 %v2875_v11, %s3049_s9  ;;  %v987_v16 = vsel %vm741_vm9, %v985_v21, %v942_v55  ;;  %v1578_v55 = vcombine.high %v3822_v59, %v4113_v7 }
 0x302   : > { %v947_v54 = vpop.permute.xlu1 %946  ;;  %v1157_v9 = vpop.permute.xlu0 %1156  ;;  %v1592_v19 = vrot.slane %v1578_v55, %v3167_v46  ;;  %v3000_v55 = vcombine.high %v3819_v47, %v3819_v47  ;;  %v2655_v47 = vld [vmem:[%s4093_s4] sm:$0x3] }
 0x303   : > { %v989_v37 = vsel %vm744_vm10, %v987_v16, %v947_v54  ;;  %v1205_v31 = vsel %vm737_vm8, %v3471_v28, %v1157_v9  ;;  %v1798_v28 = vcombine.high %v1797_v38, %v4113_v7  ;;  %v740_v7 = vsel %vm737_vm8, %v3258_v29, %v3505_v2 }
 0x304   : > { %1618 = vrot.lane.b32.xlu1 %v2858_v4, %s3045_s30  ;;  %1643 = vrot.lane.b32.xlu0 %v2974_v61, %s3047_s7  ;;  %v1207_v22 = vsel %vm741_vm9, %v1205_v31, %v1162_v43  ;;  %v2983_v43 = vcombine.high %v1787_v25, %v1787_v25  ;;  %v2865_v8 = vcombine.low %v1592_v19, %v1592_v19 }
 0x305   : > { %v2980_v16 = vcombine.high %v1762_v23, %v1762_v23  ;;  %v743_v54 = vsel %vm741_vm9, %v740_v7, %v3497_v15 }
 0x306   : > { %v1172_v50 = vpop.permute.xlu1 %1171  ;;  %v952_v0 = vpop.permute.xlu0 %951 }
 0x307   : > { %v3879_v48 = vsel %vm747_vm11, %v989_v37, %v952_v0 }
 0x308   : > { %1838 = vrot.lane.b32.xlu1 %v2872_v17, %s3045_s30  ;;  %1658 = vrot.lane.b32.xlu0 %v2975_v27, %s3043_s28 }
 0x30a   : > { %v922_v5 = vpop.permute.xlu1 %921  ;;  %v1167_v24 = vpop.permute.xlu0 %1166 }
 0x30b   : > { %v978_v59 = vsel %vm750_vm12, %v976_v3, %v922_v5  ;;  %v1209_v11 = vsel %vm744_vm10, %v1207_v22, %v1167_v24  ;;  %v1812_v3 = vrot.slane %v1798_v28, %v3167_v46  ;;  %v2996_v28 = vcombine.high %v3732_v57, %v3732_v57 }
 0x30c   : > { %1628 = vrot.lane.b32.xlu1 %v2972_v63, %s3044_s29  ;;  %1878 = vrot.lane.b32.xlu0 %v2983_v43, %s3043_s28  ;;  %v980_v41 = vsel %vm753_vm13, %v978_v59, %v927_v49  ;;  %v1211_v21 = vsel %vm747_vm11, %v1209_v11, %v1172_v50  ;;  %v746_v49 = vsel %vm744_vm10, %v743_v54, %v3514_v14 }
 0x30d   : > { %v2984_v61 = vcombine.high %v1812_v3, %v1812_v3  ;;  %v2879_v29 = vcombine.low %v1812_v3, %v1812_v3  ;;  %v749_v2 = vsel %vm747_vm11, %v746_v49, %v3535_v33  ;;  %v2976_v33 = vcombine.high %v1592_v19, %v1592_v19 }
 0x30e   : > { %v1182_v38 = vpop.permute.xlu1 %1181  ;;  %v962_v25 = vpop.permute.xlu0 %961  ;;  %v752_v37 = vsel %vm750_vm12, %v749_v2, %v3574_v18  ;;  %v761_v63 = vsel %vm737_vm8, %v3289_v51, %v3544_v44 }
 0x310   : > { %1653 = vrot.lane.b32.xlu1 %v2865_v8, %s3045_s30  ;;  %1848 = vrot.lane.b32.xlu0 %v2980_v16, %s3044_s29 }
 0x312   : > { %v932_v9 = vpop.permute.xlu1 %931  ;;  %v1142_v4 = vpop.permute.xlu0 %1141 }
 0x313   : > { %v982_v23 = vsel %vm756_vm14, %v980_v41, %v932_v9  ;;  %v1198_v46 = vsel %vm750_vm12, %v1196_v32, %v1142_v4  ;;  %v755_v32 = vsel %vm753_vm13, %v752_v37, %v3546_v45  ;;  %v2601_v9 = vrot.slane %v3816_v34, 5 }
 0x314   : > { %1883 = vrot.lane.b32.xlu1 %v2984_v61, %s3044_s29  ;;  %1873 = vrot.lane.b32.xlu0 %v2879_v29, %s3045_s30  ;;  %v1200_v15 = vsel %vm753_vm13, %v1198_v46, %v1147_v1  ;;  %v2592_v14 = vrot.slane %v982_v23, 7  ;;  %v758_v18 = vsel %vm756_vm14, %v755_v32, %v3586_v26  ;;  %v2600_v1 = vrot.slane %v3792_v42, 5 }
 0x316   : > { %v2499_v31 = vpop.permute.xlu1 %2498  ;;  %v1152_v22 = vpop.permute.xlu0 %1151  ;;  %v2620_v17 = vsel %vm2618_vm15, %v758_v18, %v2592_v14 }
 0x317   : > { %v1202_v50 = vsel %vm756_vm14, %v1200_v15, %v1152_v22 }
 0x318   : > { %v2596_v0 = vrot.slane %v1202_v50, 6  ;;  %2338 = vrot.lane.b32.xlu1 %v3000_v55, %s3044_s29  ;;  %1663 = vrot.lane.b32.xlu0 %v2976_v33, %s3044_s29 }
 0x31a   : > { %v2279_v27 = vpop.permute.xlu1 %2278  ;;  %v1177_v45 = vpop.permute.xlu0 %1176  ;;  %v2624_v26 = vsel %vm241_vm0, %v2620_v17, %v2596_v0 }
 0x31b   : > { %v1213_v5 = vsel %vm750_vm12, %v1211_v21, %v1177_v45  ;;  %v3929_v24 = vsel %vm1921_vm2, %v2624_v26, %v2600_v1  ;;  %v763_v21 = vsel %vm741_vm9, %v761_v63, %v3524_v20 }
 0x31c   : > { %2303 = vrot.lane.b32.xlu0 %v2996_v28, %s3044_s29  ;;  %v1215_v42 = vsel %vm753_vm13, %v1213_v5, %v1182_v38  ;;  %2658 = vperm.xlu1 %3032, %v2655_v47   ;;  %v765_v7 = vsel %vm744_vm10, %v763_v21, %v3556_v62 }
 0x31d   : > { %v767_v44 = vsel %vm747_vm11, %v765_v7, %v3588_v35 }
 0x31e   : > { %v957_v43 = vpop.permute.xlu1 %956  ;;  %v2494_v19 = vpop.permute.xlu0 %2493 }
 0x31f   : > { %v993_v57 = vsel %vm750_vm12, %v3879_v48, %v957_v43  ;;  %v2562_v59 = vsel %vm737_vm8, %v3553_v60, %v2494_v19  ;;  %v769_v60 = vsel %vm750_vm12, %v767_v44, %v3606_v52 }
 0x320   : > { %v995_v11 = vsel %vm753_vm13, %v993_v57, %v962_v25  ;;  %v2564_v41 = vsel %vm741_vm9, %v2562_v59, %v2499_v31  ;;  %v771_v3 = vsel %vm753_vm13, %v769_v60, %v3608_v53 }
 0x321   : > { %v773_v54 = vsel %vm756_vm14, %v771_v3, %v3615_v6 }
 0x322   : > { %v967_v38 = vpop.permute.xlu1 %966  ;;  %v2534_v51 = vpop.permute.xlu0 %2533 }
 0x323   : > { %v997_v48 = vsel %vm756_vm14, %v995_v11, %v967_v38 }
 0x324   : > { %v2593_v8 = vrot.slane %v997_v48, 7 }
 0x326   : > { %v1187_v25 = vpop.permute.xlu1 %1186  ;;  %v2274_v16 = vpop.permute.xlu0 %2273  ;;  %v2622_v52 = vsel %vm2618_vm15, %v773_v54, %v2593_v8 }
 0x327   : > { %v1217_v20 = vsel %vm756_vm14, %v1215_v42, %v1187_v25  ;;  %v2342_v62 = vsel %vm737_vm8, %v3570_v13, %v2274_v16 }
 0x328   : > { %v2597_v35 = vrot.slane %v1217_v20, 6  ;;  %v2344_v49 = vsel %vm741_vm9, %v2342_v62, %v2279_v27 }
 0x32a   : > { %v2314_v4 = vpop.permute.xlu1 %2313  ;;  %v2504_v61 = vpop.permute.xlu0 %2503  ;;  %v2626_v29 = vsel %vm241_vm0, %v2622_v52, %v2597_v35  ;;  %vm2632_vm0 = vcmask 1043456  }
 0x32b   : > { %v2566_v53 = vsel %vm744_vm10, %v2564_v41, %v2504_v61  ;;  %v3964_v2 = vsel %vm1921_vm2, %v2626_v29, %v2601_v9  ;;  %vm2642_vm2 = vcmask 1045504  }
 0x32e   : > { %v2509_v13 = vpop.permute.xlu1 %2508  ;;  %v2289_v23 = vpop.permute.xlu0 %2288 }
 0x32f   : > { %v2568_v8 = vsel %vm747_vm11, %v2566_v53, %v2509_v13 }
 0x332   : > { %v2284_v46 = vpop.permute.xlu1 %2283  ;;  %v2519_v6 = vpop.permute.xlu0 %2518 }
 0x333   : > { %v2346_v37 = vsel %vm744_vm10, %v2344_v49, %v2284_v46 }
 0x334   : > { %v2348_v15 = vsel %vm747_vm11, %v2346_v37, %v2289_v23  ;;  %v2122_v37 = vsel %vm737_vm8, %v3342_v30, %v3633_v36  ;;  %v4121_v36 = vld [vmem:[#allocation7_spill] sm:$0xff] }
 0x336   : > { %v1604_v34 = vpop.permute.xlu1 %1603  ;;  %v2299_v14 = vpop.permute.xlu0 %2298 }
 0x33a   : > { %v2529_v31 = vpop.permute.xlu1 %2528  ;;  %v1824_v22 = vpop.permute.xlu0 %1823 }
 0x33b   : > { %v2577_v44 = vsel %vm737_vm8, %v3602_v10, %v2529_v31 }
 0x33c   : > { %v2579_v25 = vsel %vm741_vm9, %v2577_v44, %v2534_v51 }
 0x33e   : > { %v2539_v55 = vpop.permute.xlu1 %2538  ;;  %v2309_v33 = vpop.permute.xlu0 %2308 }
 0x33f   : > { %v2357_v32 = vsel %vm737_vm8, %v3629_v58, %v2309_v33  ;;  %v2581_v16 = vsel %vm744_vm10, %v2579_v25, %v2539_v55  ;;  %v4128_v25 = vld [vmem:[#allocation9_spill] sm:$0xff] }
 0x340   : > { %v2359_v50 = vsel %vm741_vm9, %v2357_v32, %v2314_v4 }
 0x342   : > { %v2514_v18 = vpop.permute.xlu1 %2513  ;;  %v2319_v0 = vpop.permute.xlu0 %2318 }
 0x343   : > { %v2361_v1 = vsel %vm744_vm10, %v2359_v50, %v2319_v0  ;;  %v2570_v3 = vsel %vm750_vm12, %v2568_v8, %v2514_v18  ;;  %v4120_v18 = vld [vmem:[#allocation6_spill] sm:$0xff]  ;;  %v4122_v0 = vld [vmem:[#allocation11_spill] sm:$0xff]  ;;  %v4127_v8 = vld [vmem:[#allocation12_spill] sm:$0xff] }
 0x344   : > { %v2572_v49 = vsel %vm753_vm13, %v2570_v3, %v2519_v6 }
 0x346   : > { %v2554_v17 = vpop.permute.xlu1 %2553  ;;  %v2544_v47 = vpop.permute.xlu0 %2543 }
 0x347   : > { %v2583_v20 = vsel %vm747_vm11, %v2581_v16, %v2544_v47  ;;  %v4124_v47 = vld [vmem:[#allocation10_spill] sm:$0xff]  ;;  %v4129_v16 = vld [vmem:[#allocation15_spill] sm:$0xff] }
 0x34a   : > { %v2294_v27 = vpop.permute.xlu1 %2293  ;;  %v2324_v45 = vpop.permute.xlu0 %2323 }
 0x34b   : > { %v2350_v28 = vsel %vm750_vm12, %v2348_v15, %v2294_v27  ;;  %v3974_v26 = vsel %vm747_vm11, %v2361_v1, %v2324_v45  ;;  %v4123_v1 = vld [vmem:[#allocation4_spill] sm:$0xff] }
 0x34c   : > { %v3977_v5 = vsel %vm753_vm13, %v2350_v28, %v2299_v14 }
 0x34e   : > { %v2524_v42 = vpop.permute.xlu1 %2523  ;;  %v3979_v58 = vpop.permute.xlu0 %2333 }
 0x34f   : > { %v2574_v10 = vsel %vm756_vm14, %v2572_v49, %v2524_v42 }
 0x350   : > { %v2665_v61 = vsel %vm2618_vm15, %v2574_v10, 0 }
 0x352   : > { %v3981_v63 = vpop.permute.xlu1 %1638  ;;  %v1599_v43 = vpop.permute.xlu0 %1598 }
 0x353   : > { %v1667_v13 = vsel %vm737_vm8, %v3669_v56, %v1599_v43  ;;  %v2124_v56 = vsel %vm741_vm9, %v2122_v37, %v3617_v12  ;;  %v4125_v43 = vld [vmem:[#allocation17_spill] sm:$0xff] }
 0x354   : > { %v1669_v15 = vsel %vm741_vm9, %v1667_v13, %v1604_v34  ;;  %v2126_v30 = vsel %vm744_vm10, %v2124_v56, %v4120_v18  ;;  %v4133_v18 = vld [vmem:[#allocation16_spill] sm:$0xff] }
 0x355   : > { %v2128_v34 = vsel %vm747_vm11, %v2126_v30, %v4121_v36 }
 0x356   : > { %v1819_v19 = vpop.permute.xlu1 %1818  ;;  %v1859_v57 = vpop.permute.xlu0 %1858  ;;  %v2130_v12 = vsel %vm750_vm12, %v2128_v34, %v4124_v47 }
 0x357   : > { %v1887_v6 = vsel %vm737_vm8, %v3685_v40, %v1819_v19 }
 0x358   : > { %v1889_v55 = vsel %vm741_vm9, %v1887_v6, %v1824_v22 }
 0x35a   : > { %v1834_v59 = vpop.permute.xlu1 %1833  ;;  %v1609_v11 = vpop.permute.xlu0 %1608 }
 0x35b   : > { %v1671_v14 = vsel %vm744_vm10, %v1669_v15, %v1609_v11 }
 0x35e   : > { %v1624_v41 = vpop.permute.xlu1 %1623  ;;  %v1614_v21 = vpop.permute.xlu0 %1613 }
 0x35f   : > { %v1673_v31 = vsel %vm747_vm11, %v1671_v14, %v1614_v21 }
 0x362   : > { %v3983_v7 = vpop.permute.xlu1 %2328  ;;  %v1829_v38 = vpop.permute.xlu0 %1828 }
 0x363   : > { %v1891_v50 = vsel %vm744_vm10, %v1889_v55, %v1829_v38  ;;  %v4126_v38 = vld [vmem:[#allocation5_spill] sm:$0xff] }
 0x364   : > { %v1893_v27 = vsel %vm747_vm11, %v1891_v50, %v1834_v59  ;;  %v4132_v55 = vld [vmem:[#allocation13_spill] sm:$0xff] }
 0x366   : > { %v1634_v48 = vpop.permute.xlu1 %1633  ;;  %v2549_v60 = vpop.permute.xlu0 %2548 }
 0x367   : > { %v2585_v35 = vsel %vm750_vm12, %v2583_v20, %v2549_v60  ;;  %v1682_v19 = vsel %vm737_vm8, %v4125_v43, %v1634_v48 }
 0x368   : > { %v2587_v4 = vsel %vm753_vm13, %v2585_v35, %v2554_v17  ;;  %v2137_v17 = vsel %vm737_vm8, %v4123_v1, %v4122_v0  ;;  %v1684_v3 = vsel %vm741_vm9, %v1682_v19, %v3981_v63 }
 0x36a   : > { %v1649_v62 = vpop.permute.xlu1 %1648  ;;  %v1844_v54 = vpop.permute.xlu0 %1843 }
 0x36e   : > { %v1864_v9 = vpop.permute.xlu1 %1863  ;;  %v2559_v52 = vpop.permute.xlu0 %2558 }
 0x36f   : > { %v2589_v51 = vsel %vm756_vm14, %v2587_v4, %v2559_v52 }
 0x370   : > { %2926 = vmatprep.subr.msk.bf16.mxu1 %vm2618_vm15, %v2589_v51 }
 0x371   : > { %2682 = vmatpush1.bf16.msra.mxu1 %v2665_v61 }
 0x372   : > { %v1869_v29 = vpop.permute.xlu1 %1868  ;;  %v1854_v53 = vpop.permute.xlu0 %1853 }
 0x373   : > { %v1902_v22 = vsel %vm737_vm8, %v3782_v39, %v1854_v53  ;;  %v2139_v39 = vsel %vm741_vm9, %v2137_v17, %v4126_v38  ;;  %v4130_v53 = vld [vmem:[#allocation8_spill] sm:$0xff] }
 0x374   : > { %v1904_v44 = vsel %vm741_vm9, %v1902_v22, %v1859_v57  ;;  %v2141_v59 = vsel %vm744_vm10, %v2139_v39, %v4127_v8 }
 0x375   : > { %v1906_v4 = vsel %vm744_vm10, %v1904_v44, %v1864_v9  ;;  %v2143_v63 = vsel %vm747_vm11, %v2141_v59, %v4130_v53  ;;  %v4134_v44 = vld [vmem:[#allocation3_spill] sm:$0xff] }
 0x376   : > { %v1619_v23 = vpop.permute.xlu1 %1618  ;;  %v1644_v46 = vpop.permute.xlu0 %1643 }
 0x377   : > { %v1675_v40 = vsel %vm750_vm12, %v1673_v31, %v1619_v23  ;;  %v1686_v10 = vsel %vm744_vm10, %v1684_v3, %v1644_v46  ;;  %v1908_v23 = vsel %vm747_vm11, %v1906_v4, %v1869_v29  ;;  %v4131_v46 = vld [vmem:[#allocation14_spill] sm:$0xff]  ;;  %v2365_v31 = vsel %vm750_vm12, %v3974_v26, %v3983_v7 }
 0x378   : > { %v1677_v28 = vsel %vm753_vm13, %v1675_v40, %v1624_v41  ;;  %v2132_v41 = vsel %vm753_vm13, %v2130_v12, %v4128_v25  ;;  %v1688_v13 = vsel %vm747_vm11, %v1686_v10, %v1649_v62  ;;  %v2145_v37 = vsel %vm750_vm12, %v2143_v63, %v4131_v46 }
 0x379   : > { %v2134_v48 = vsel %vm756_vm14, %v2132_v41, %v4129_v16  ;;  %v2147_v29 = vsel %vm753_vm13, %v2145_v37, %v4132_v55  ;;  %v2367_v36 = vsel %vm753_vm13, %v2365_v31, %v3979_v58 }
 0x37a   : > { %v1839_v33 = vpop.permute.xlu1 %1838  ;;  %v1659_v32 = vpop.permute.xlu0 %1658  ;;  %v2612_v61 = vrot.slane %v2134_v48, 2  ;;  %v2149_v30 = vsel %vm756_vm14, %v2147_v29, %v4133_v18 }
 0x37b   : > { %v1895_v11 = vsel %vm750_vm12, %v1893_v27, %v1839_v33  ;;  %v2613_v1 = vrot.slane %v2149_v30, 2 }
 0x37c   : > { %v1897_v49 = vsel %vm753_vm13, %v1895_v11, %v1844_v54 }
 0x37e   : > { %v1629_v45 = vpop.permute.xlu1 %1628  ;;  %v1879_v42 = vpop.permute.xlu0 %1878 }
 0x37f   : > { %v1679_v21 = vsel %vm756_vm14, %v1677_v28, %v1629_v45 }
 0x380   : > { %v2604_v60 = vrot.slane %v1679_v21, 4 }
 0x382   : > { %v2634_v20 = vsel %vm2632_vm0, %v3929_v24, %v2604_v60  ;;  %v1654_v35 = vpop.permute.xlu1 %1653  ;;  %v1849_v57 = vpop.permute.xlu0 %1848 }
 0x383   : > { %v1899_v52 = vsel %vm756_vm14, %v1897_v49, %v1849_v57  ;;  %v1690_v9 = vsel %vm750_vm12, %v1688_v13, %v1654_v35 }
 0x384   : > { %v2608_v51 = vrot.slane %v1899_v52, 3  ;;  %v1692_v50 = vsel %vm753_vm13, %v1690_v9, %v1659_v32 }
 0x386   : > { %v1884_v24 = vpop.permute.xlu1 %1883  ;;  %v1874_v54 = vpop.permute.xlu0 %1873  ;;  %v2639_v6 = vsel %vm2637_vm1, %v2634_v20, %v2608_v51 }
 0x387   : > { %v1910_v15 = vsel %vm750_vm12, %v1908_v23, %v1874_v54  ;;  %v2644_v14 = vsel %vm2642_vm2, %v2639_v6, %v2612_v61 }
 0x388   : > { %v1912_v62 = vsel %vm753_vm13, %v1910_v15, %v1879_v42  ;;  %v3055_v42 = vmov 1966171168  }
 0x389   : > { %v1914_v33 = vsel %vm756_vm14, %v1912_v62, %v1884_v24  ;;  %v2716_v43 = vunpack.c.l.s4 %v3055_v42 }
 0x38a   : > { %v2339_v56 = vpop.permute.xlu1 %2338  ;;  %v1664_v40 = vpop.permute.xlu0 %1663  ;;  %v2609_v0 = vrot.slane %v1914_v33, 3 }
 0x38b   : > { %v1694_v34 = vsel %vm756_vm14, %v1692_v50, %v1664_v40  ;;  %v2369_v26 = vsel %vm756_vm14, %v2367_v36, %v2339_v56  ;;  %v2717_v19 = vunpack.c.0.s8 %v2716_v43 }
 0x38c   : > { %v2605_v7 = vrot.slane %v1694_v34, 4  ;;  %v2617_v32 = vrot.slane %v2369_v26, 1 }
 0x38d   : > { %v2720_v60 = vsub.s32 %v2717_v19, %v4134_v44 }
 0x38e   : > { %v2636_v17 = vsel %vm2632_vm0, %v3964_v2, %v2605_v7  ;;  %v2304_v22 = vpop.permute.xlu0 %2303  ;;  %v2654_v2 = vld [vmem:[%s4092_s3] sm:$0x1] }
 0x38f   : > { %v2354_v47 = vsel %vm756_vm14, %v3977_v5, %v2304_v22  ;;  %v2641_v12 = vsel %vm2637_vm1, %v2636_v17, %v2609_v0 }
 0x390   : > { %v2616_v58 = vrot.slane %v2354_v47, 1  ;;  %v2646_v27 = vsel %vm2642_vm2, %v2641_v12, %v2613_v1 }
 0x391   : > { %v2652_v45 = vsel %vm2647_vm3, %v2646_v27, %v2617_v32 }
 0x392   : > { %2683 = vmatprep.subr.bf16.mxu1 %v2652_v45  ;;  %v2649_v28 = vsel %vm2647_vm3, %v2644_v14, %v2616_v58 }
 0x393   : > { %2684 = vmatpush1.bf16.msra.mxu1 %v2649_v28 }
 0x396   : > { %2927 = vmatmul.mubr.msk.bf16.vlgmr.msra.gmra.mxu1 %vm2661_vm4, %v2654_v2 }
 0x397   : > { %v2659_v5 = vpop.permute.xlu1 %2658 }
 0x456   : > { %v2703_v11 = vpop.f32.mrf.mxu1 }
 0x457   : > { %v2704_v38 = vadd.f32 %v2703_v11, %v2659_v5 }
 0x458   : > { %v2705_v21 = vpop.f32.mrf.mxu1 }
 0x459   : > { %v2706_v39 = vadd.f32 %v2705_v21, %v2659_v5 }
 0x45a   : > { %v2707_v8 = vpop.f32.mrf.mxu1 }
 0x45b   : > { %v2928_v59 = vpack.c.bf16 %v2706_v39, %v2704_v38 }
 0x45c   : > { %v2708_v25 = vpop.f32.mrf.mxu1 }
 0x45d   : > { %v2721_v41 = vrot.slane %v2928_v59, %v2720_v60 }
 0x45f   : > { %2929 = vst.sshfl [vmem:[%s222_s22] sm:$0x5 pattern:$0x73625140] %v2721_v41 }
 0x460 PF: > { %s15_s18 = sadd.s32 1, %s3040_s18  }
 0x461   : > { %p12_p4 = scmp.ge.s32.totalorder %s15_s18, 4  }
 0x463   :  { %14 = sbr.rel (!%p12_p4) target bundleno = 1 (0x1), region = 70 }

// kernel: rfb2d_forward.4
= control target key start
LH: loop header
LB: loop body
LE: loop exit
PB: predicated region body
PF: predicated region fallthrough
CT: control target
= control target key end

     0   :  { %s5794_s24 = smov 0   ;;  %s7964_s0 = inlined_call_operand.vmem [shape: f32[2,4,256], index: 0, kind: input, shape index: {}]   ;;  %s7965_s1 = inlined_call_operand.vmem [shape: bf16[2,4], index: 1, kind: input, shape index: {}]   ;;  %s7966_s2 = inlined_call_operand.vmem [shape: f32[2,1], index: 2, kind: input, shape index: {}]   ;;  %s7967_s3 = inlined_call_operand.vmem [shape: bf16[2,18], index: 3, kind: input, shape index: {}]   ;;  %s7968_s4 = inlined_call_operand.vmem [shape: f32[2,1], index: 4, kind: input, shape index: {}]   ;;  %s7969_s5 = inlined_call_operand.vmem [shape: bf16[2,18], index: 5, kind: input, shape index: {}]   ;;  %s7970_s6 = inlined_call_operand.vmem [shape: f32[2,1], index: 6, kind: input, shape index: {}]   ;;  %s7971_s7 = inlined_call_operand.vmem [shape: bf16[2,2,256], index: 7, kind: output, shape index: {}]  }
   0x1 LB: > { %s5266_s25 = sadd.s32 4294967295, %s5735_s24   ;;  %p5270_p0 = scmp.ge.s32.totalorder %s5735_s24, 1  ;;  %s5735_s24 = sphi %s5794_s24, %s17_s24  }
   0x2   : > { %p237_p1 = scmp.lt.s32.totalorder %s5735_s24, 3 }
   0x4   : > { %p238_p2 = pnand %p5270_p0, %p237_p1 }
   0x6   : > { %241 = sbr.rel (%p238_p2) target bundleno = 2010 (0x7da), region = 48 }
   0xb   : > { %p268_p3 = scmp.lt.s32.totalorder %s5266_s25, 1  ;;  %v7972_v0 = vmov 0   ;;  %v285_v1 = vld [vmem:[%s7966_s2] sm:$0x3]  ;;  %vm295_vm0 = vcmask 1041408   ;;  %vm291_vm1 = vcmask 31744   ;;  %v424_v27 = vlaneseq }
   0xc   : > { %334 = vmatprep.mubr.bf16.mxu0 %v7972_v0  ;;  %5726 = vset.pattern.permute.xlu0 %v7972_v0  ;;  %v284_v7 = vld [vmem:[%s7965_s1] sm:$0x1]  ;;  %s5738_s11 = smov 96   ;;  %s5739_s12 = smov 112   ;;  %vm344_vm2 = vsmask.f32 256 }
   0xd   : > { %s8188_s25 = smov (!%p268_p3, %s5266_s25), 1  ;;  %288 = vperm.xlu0 %5726, %v285_v1   ;;  %2755 = vmatprep.mubr.bf16.mxu1 %v7972_v0  ;;  %s5740_s13 = smov 80   ;;  %vm343_vm3 = vcmask 139264   ;;  %v346_v15 = vld [vmem:[#allocation2] sm:$0x1]  ;;  %vm352_vm4 = vcmask 3072  }
   0xe   : > { %5727 = vset.pattern.permute.xlu1 %v7972_v0  ;;  %s5548_s28 = sshll.u32 %s8188_s25, 3  ;;  %s5741_s14 = smov 64   ;;  %v349_v16 = vld [vmem:[#allocation2 + $0xc] sm:$0x1]  ;;  %vm345_vm5 = vmand %vm343_vm3, %vm344_vm2  ;;  %vm355_vm6 = vcmask 0   ;;  %vm368_vm7 = vcmask 142472  }
   0xf   : > { %s272_s8 = scalar_lea.vmem %s7964_s0, %s5548_s28  ;;  %s5742_s15 = smov 48   ;;  %354 = vst.msk [vmem:[#allocation2 + $0x4] sm:$0xf] %vm352_vm4, %v7972_v0  ;;  %358 = vst.msk [vmem:[#allocation2 + $0x10] sm:$0xf] %vm352_vm4, %v7972_v0  ;;  %v347_v17 = vsel %vm345_vm5, 0, %v346_v15 }
  0x10   : > { %v278_v2 = vld [vmem:[%s272_s8] sm:$0xff]  ;;  %s5743_s16 = smov 32   ;;  %s5744_s17 = smov 16   ;;  %v350_v18 = vsel %vm345_vm5, 0, %v349_v16  ;;  %356 = vst.msk [vmem:[#allocation2 + $0x8] sm:$0x1] %vm355_vm6, %v7972_v0 }
  0x11   : > { %v280_v3 = vcombine.high %v278_v2, %v278_v2  ;;  %v282_v4 = vpack.c.bf16 %v278_v2, %v278_v2  ;;  %359 = vst.msk [vmem:[#allocation2 + $0x14] sm:$0x1] %vm355_vm6, %v7972_v0  ;;  %348 = vst [vmem:[#allocation2] sm:$0x1] %v347_v17  ;;  %vm360_vm8 = vsmask.f32 7938 }
  0x12   : > { %370 = vst.msk [vmem:[#allocation2 + $0x4] sm:$0xf] %vm368_vm7, %v7972_v0  ;;  %374 = vst.msk [vmem:[#allocation2 + $0x10] sm:$0xf] %vm368_vm7, %v7972_v0  ;;  %v5745_v25 = vmov 1983009808  }
  0x13   : > { %v283_v5 = vpack.c.bf16 %v280_v3, %v280_v3  ;;  %v297_v6 = vsel %vm295_vm0, %v282_v4, 0  ;;  %351 = vst [vmem:[#allocation2 + $0xc] sm:$0x1] %v350_v18  ;;  %353 = vst.msk [vmem:[#allocation2] sm:$0xf] %vm352_vm4, %v7972_v0  ;;  %v422_v26 = vunpack.c.l.s4 %v5745_v25  ;;  %v5867_v31 = vshrl.u32 %v424_v27, 7 }
  0x14   : > { %357 = vst.msk [vmem:[#allocation2 + $0xc] sm:$0xf] %vm352_vm4, %v7972_v0  ;;  %vm361_vm9 = vmand %vm343_vm3, %vm360_vm8  ;;  %v5746_v32 = vmov 1934713408   ;;  %vm371_vm10 = vcmask 139400   ;;  %s5747_s18 = smov 1  }
  0x15   : > { %5274 = vmatprep.subr.msk.bf16.mxu0 %vm295_vm0, %v283_v5  ;;  %369 = vst.msk [vmem:[#allocation2] sm:$0xf] %vm368_vm7, %v7972_v0  ;;  %373 = vst.msk [vmem:[#allocation2 + $0xc] sm:$0xf] %vm368_vm7, %v7972_v0  ;;  %v423_v30 = vunpack.c.0.s8 %v422_v26  ;;  %v454_v33 = vunpack.c.l.s4 %v5746_v32  ;;  %vm532_vm11 = vsmask.f32 4368 }
  0x16   : > { %317 = vmatpush1.bf16.msra.mxu0 %v297_v6  ;;  %7996 = vst [vmem:[#allocation4_spill] sm:$0xff] %v5867_v31  ;;  %vm533_vm12 = vmor %vm344_vm2, %vm532_vm11  ;;  %vm586_vm13 = vcmask 134152   ;;  %vm593_vm15 = vcmask 131080   ;;  %s5748_s19 = smov 127   ;;  %s5749_s20 = smov 126   ;;  %vm1976_vm3 = vcmask 1046532  }
  0x17   : > { %v362_v19 = vld [vmem:[#allocation2 + $0x8] sm:$0x1]  ;;  %v5870_v37 = vsub.s32 %v423_v30, %v5867_v31  ;;  %v455_v39 = vunpack.c.0.s8 %v454_v33  ;;  %vm587_vm14 = vmand %vm586_vm13, %vm360_vm8  ;;  %vm1274_vm5 = vsmask.f32 3328  ;;  %vm1275_vm6 = vsmask.f32 7440 }
  0x18   : > { %v365_v20 = vld [vmem:[#allocation2 + $0x14] sm:$0x1]  ;;  %v363_v21 = vsel %vm361_vm9, 0, %v362_v19  ;;  %vm5962_vm7 = vmor %vm1274_vm5, %vm1275_vm6  ;;  %vm791_vm8 = vcmask 130048   ;;  %vm801_vm11 = vcmask 523264   ;;  %vm7990_vm5 = vcmask 1046528  }
  0x19   : > { %5275 = vmatmul.mubr.msk.bf16.vlgmr.msra.gmra.mxu0 %vm291_vm1, %v284_v7  ;;  %v366_v22 = vsel %vm361_vm9, 0, %v365_v20  ;;  %364 = vst [vmem:[#allocation2 + $0x8] sm:$0x1] %v363_v21  ;;  %7997 = vst [vmem:[#allocation5_spill] sm:$0xff] %v5870_v37  ;;  %v5876_v46 = vsub.s32 %v455_v39, %v5867_v31  ;;  %vm795_vm9 = vcmask 261120   ;;  %vm7989_vm6 = vcmask 146432  }
  0x1a   : > { %5183 = vmatprep.mubr.bf16.mxu0 %v7972_v0  ;;  %367 = vst [vmem:[#allocation2 + $0x14] sm:$0x1] %v366_v22  ;;  %372 = vst.msk [vmem:[#allocation2 + $0x8] sm:$0x1] %vm371_vm10, %v7972_v0  ;;  %s5750_s27 = smov 3   ;;  %s5751_s28 = smov 125  }
  0x1b   : > { %7998 = vst [vmem:[#allocation6_spill] sm:$0xff] %v5876_v46  ;;  %375 = vst.msk [vmem:[#allocation2 + $0x14] sm:$0x1] %vm371_vm10, %v7972_v0  ;;  %vm798_vm10 = vcmask 392192   ;;  %s5752_s29 = smov 122  }
  0x1c   : > { %vm594_vm1 = vmand %vm593_vm15, %vm344_vm2  ;;  %vm7994_vm2 = vcmask 1042432   ;;  %vm2672_vm15 = vcmask 1040384  }
  0x1d   : > { %vm5917_vm4 = vmor %vm7994_vm2, %vm1976_vm3  ;;  %vm7992_vm3 = vcmask 1044480  }
  0x88   : > { %v289_v8 = vpop.permute.xlu0 %288 }
  0xd9   : > { %v336_v9 = vpop.f32.mrf.mxu0 }
  0xda   : > { %v5821_v10 = vadd.f32 %v336_v9, %v289_v8 }
  0xdb   : > { %v338_v11 = vpop.f32.mrf.mxu0 }
  0xdc   : > { %380 = vrot.lane.b32.xlu1 %v5821_v10, %s5738_s11  ;;  %377 = vrot.lane.b32.xlu0 %v5821_v10, %s5739_s12  ;;  %v5835_v14 = vadd.f32 %v338_v11, %v289_v8 }
  0xdd   : > { %v340_v12 = vpop.f32.mrf.mxu0 }
  0xdf   : > { %v341_v13 = vpop.f32.mrf.mxu0 }
  0xe0   : > { %383 = vrot.lane.b32.xlu1 %v5821_v10, %s5740_s13  ;;  %386 = vrot.lane.b32.xlu0 %v5821_v10, %s5741_s14 }
  0xe4   : > { %389 = vrot.lane.b32.xlu1 %v5821_v10, %s5742_s15  ;;  %392 = vrot.lane.b32.xlu0 %v5821_v10, %s5743_s16 }
  0xe8   : > { %395 = vrot.lane.b32.xlu1 %v5821_v10, %s5744_s17  ;;  %399 = vrot.lane.b32.xlu0 %v5835_v14, %s5739_s12 }
  0xec   : > { %402 = vrot.lane.b32.xlu1 %v5835_v14, %s5738_s11  ;;  %405 = vrot.lane.b32.xlu0 %v5835_v14, %s5740_s13 }
  0xf0   : > { %408 = vrot.lane.b32.xlu1 %v5835_v14, %s5741_s14  ;;  %411 = vrot.lane.b32.xlu0 %v5835_v14, %s5742_s15 }
  0xf4   : > { %414 = vrot.lane.b32.xlu1 %v5835_v14, %s5743_s16  ;;  %417 = vrot.lane.b32.xlu0 %v5835_v14, %s5744_s17 }
 0x14e   : > { %v381_v23 = vpop.permute.xlu1 %380  ;;  %v378_v24 = vpop.permute.xlu0 %377 }
 0x14f   : > { %v420_v38 = vcombine.low %v5821_v10, %v381_v23 }
 0x151   : > { %v427_v44 = vrot.slane %v420_v38, %v5870_v37 }
 0x152   : > { %v384_v28 = vpop.permute.xlu1 %383  ;;  %v387_v29 = vpop.permute.xlu0 %386 }
 0x153   : > { %v428_v34 = vcombine.low %v378_v24, %v384_v28 }
 0x155   : > { %v435_v40 = vrot.slane %v428_v34, %v5870_v37 }
 0x156   : > { %v390_v35 = vpop.permute.xlu1 %389  ;;  %v393_v36 = vpop.permute.xlu0 %392 }
 0x157   : > { %v436_v41 = vcombine.low %v387_v29, %v393_v36  ;;  %v452_v47 = vcombine.low %v427_v44, %v435_v40  ;;  %v588_v40 = vld [vmem:[#allocation2] sm:$0xf] }
 0x159   : > { %v443_v48 = vrot.slane %v436_v41, %v5870_v37  ;;  %v459_v55 = vrot.slane %v452_v47, %v5876_v46 }
 0x15a   : > { %v396_v42 = vpop.permute.xlu1 %395  ;;  %v400_v43 = vpop.permute.xlu0 %399 }
 0x15b   : > { %v444_v45 = vcombine.low %v390_v35, %v396_v42 }
 0x15d   : > { %v451_v49 = vrot.slane %v444_v45, %v5870_v37 }
 0x15e   : > { %v403_v50 = vpop.permute.xlu1 %402  ;;  %v406_v51 = vpop.permute.xlu0 %405 }
 0x15f   : > { %v460_v52 = vcombine.low %v443_v48, %v451_v49  ;;  %v470_v53 = vcombine.low %v5835_v14, %v403_v50  ;;  %v478_v54 = vcombine.low %v400_v43, %v406_v51  ;;  %v598_v43 = vld [vmem:[#allocation2 + $0xc] sm:$0xf]  ;;  %v602_v48 = vld [vmem:[#allocation2 + $0x14] sm:$0x1]  ;;  %v595_v49 = vld [vmem:[#allocation2 + $0x8] sm:$0x1] }
 0x161   : > { %v467_v56 = vrot.slane %v460_v52, %v5876_v46  ;;  %v477_v61 = vrot.slane %v470_v53, %v5870_v37  ;;  %v485_v62 = vrot.slane %v478_v54, %v5870_v37 }
 0x162   : > { %v409_v57 = vpop.permute.xlu1 %408  ;;  %v412_v58 = vpop.permute.xlu0 %411 }
 0x163   : > { %v468_v59 = vcombine.low %v459_v55, %v467_v56  ;;  %v469_v60 = vcombine.high %v459_v55, %v467_v56  ;;  %v502_v7 = vcombine.low %v477_v61, %v485_v62 }
 0x165   : > { %v5549_v63 = vpack.c.bf16 %v468_v59, %v468_v59  ;;  %v5551_v1 = vpack.c.bf16 %v469_v60, %v469_v60  ;;  %v509_v16 = vrot.slane %v502_v7, %v5876_v46 }
 0x166   : > { %v415_v2 = vpop.permute.xlu1 %414  ;;  %v418_v3 = vpop.permute.xlu0 %417 }
 0x167   : > { %v486_v4 = vcombine.low %v409_v57, %v415_v2  ;;  %v494_v5 = vcombine.low %v412_v58, %v418_v3  ;;  %v535_v6 = vshrl.u32 %v5549_v63, 16  ;;  %v552_v8 = vshrl.u32 %v5551_v1, 16 }
 0x168   : > { %v538_v12 = vshll.u32 %v5549_v63, 16  ;;  %v555_v18 = vshll.u32 %v5551_v1, 16 }
 0x169   : > { %v493_v9 = vrot.slane %v486_v4, %v5870_v37  ;;  %v501_v10 = vrot.slane %v494_v5, %v5870_v37  ;;  %v537_v11 = vrot.slane %v535_v6, 7  ;;  %v554_v15 = vrot.slane %v552_v8, 7 }
 0x16b   : > { %v510_v13 = vcombine.low %v493_v9, %v501_v10  ;;  %v540_v14 = vor.u32 %v538_v12, %v537_v11  ;;  %v557_v19 = vor.u32 %v555_v18, %v554_v15  ;;  %v541_v33 = vrot.slane %v537_v11, 4 }
 0x16c   : > { %v558_v38 = vrot.slane %v554_v15, 4 }
 0x16d   : > { %v517_v17 = vrot.slane %v510_v13, %v5876_v46  ;;  %568 = vrot.lane.b32.xlu1 %v540_v14, %s5747_s18 }
 0x16f   : > { %v519_v20 = vcombine.high %v509_v16, %v517_v17  ;;  %v518_v21 = vcombine.low %v509_v16, %v517_v17 }
 0x171   : > { %574 = vrot.lane.b32.xlu1 %v557_v19, %s5747_s18  ;;  %v5552_v22 = vpack.c.bf16 %v519_v20, %v519_v20  ;;  %v5550_v23 = vpack.c.bf16 %v518_v21, %v518_v21 }
 0x173   : > { %v560_v24 = vshrl.u32 %v5552_v22, 16  ;;  %v543_v25 = vshrl.u32 %v5550_v23, 16  ;;  %v546_v28 = vshll.u32 %v5550_v23, 16  ;;  %v563_v34 = vshll.u32 %v5552_v22, 16 }
 0x175   : > { %v562_v26 = vrot.slane %v560_v24, 7  ;;  %v545_v27 = vrot.slane %v543_v25, 7 }
 0x177   : > { %v567_v29 = vrot.slane %v562_v26, 4  ;;  %v550_v30 = vrot.slane %v545_v27, 4  ;;  %v548_v32 = vor.u32 %v546_v28, %v545_v27  ;;  %v565_v36 = vor.u32 %v563_v34, %v562_v26 }
 0x179   : > { %578 = vrot.lane.b32.xlu0 %v567_v29, %s5747_s18  ;;  %572 = vrot.lane.b32.xlu1 %v550_v30, %s5747_s18  ;;  %v549_v35 = vsel %vm533_vm12, %v541_v33, %v548_v32  ;;  %v566_v39 = vsel %vm533_vm12, %v558_v38, %v565_v36  ;;  %vm804_vm12 = vcmask 654336  }
 0x17d   : > { %570 = vrot.lane.b32.xlu0 %v549_v35, %s5747_s18 }
 0x181   : > { %576 = vrot.lane.b32.xlu0 %v566_v39, %s5747_s18 }
 0x1df   : > { %v569_v41 = vpop.permute.xlu1 %568 }
 0x1e0   : > { %v589_v42 = vsel %vm587_vm14, %v569_v41, %v588_v40 }
 0x1e1   : > { %590 = vst [vmem:[#allocation2] sm:$0xf] %v589_v42 }
 0x1e3   : > { %v575_v44 = vpop.permute.xlu1 %574 }
 0x1e4   : > { %v599_v45 = vsel %vm587_vm14, %v575_v44, %v598_v43  ;;  %vm810_vm14 = vcmask 916480  }
 0x1e5   : > { %600 = vst [vmem:[#allocation2 + $0xc] sm:$0xf] %v599_v45 }
 0x1e8   : > { %v5894_v47 = vld [vmem:[#allocation2] sm:$0xf] }
 0x1e9   : > { %832 = vrot.lane.b32.xlu1 %v5894_v47, %s5748_s19  ;;  %v1969_v58 = vld [vmem:[#allocation2] sm:$0xe]  ;;  %v612_v3 = vshrl.u32 %v5894_v47, 16  ;;  %v1279_v5 = vshll.u32 %v5894_v47, 16 }
 0x1ea   : > { %v5364_v62 = vrot.slane %v1969_v58, 9 }
 0x1eb   : > { %v579_v50 = vpop.permute.xlu0 %578  ;;  %v573_v51 = vpop.permute.xlu1 %572  ;;  %v1278_v10 = vrot.slane %v612_v3, 4  ;;  %v1281_v11 = vrot.slane %v1279_v5, 5 }
 0x1ec   : > { %v603_v52 = vsel %vm594_vm1, %v579_v50, %v602_v48  ;;  %v596_v53 = vsel %vm594_vm1, %v573_v51, %v595_v49  ;;  %v607_v54 = vld [vmem:[#allocation2 + $0xc] sm:$0xf]  ;;  %vm7993_vm1 = vcmask 1043456  }
 0x1ed   : > { %604 = vst [vmem:[#allocation2 + $0x14] sm:$0x1] %v603_v52  ;;  %597 = vst [vmem:[#allocation2 + $0x8] sm:$0x1] %v596_v53  ;;  %1052 = vrot.lane.b32.xlu1 %v5894_v47, %s5749_s20  ;;  %836 = vrot.lane.b32.xlu0 %v607_v54, %s5748_s19  ;;  %v1970_v63 = vld [vmem:[#allocation2 + $0xc] sm:$0xe]  ;;  %v611_v13 = vpack.i.b16 %v607_v54, %v5894_v47  ;;  %v1282_v19 = vor.u32 %v1281_v11, %v1278_v10 }
 0x1ee   : > { %v5365_v4 = vrot.slane %v1970_v63, 9  ;;  %v613_v14 = vshrl.u32 %v607_v54, 16  ;;  %v1299_v20 = vshll.u32 %v607_v54, 16 }
 0x1ef   : > { %v571_v55 = vpop.permute.xlu0 %570  ;;  %v628_v21 = vrot.slane %v611_v13, %v5870_v37  ;;  %v1283_v26 = vrot.slane %v1282_v19, 4 }
 0x1f0   : > { %592 = vst.msk [vmem:[#allocation2 + $0x4] sm:$0xf] %vm586_vm13, %v571_v55  ;;  %v614_v22 = vpack.i.b16 %v613_v14, %v612_v3  ;;  %v1298_v27 = vrot.slane %v613_v14, 4  ;;  %v1301_v28 = vrot.slane %v1299_v20, 5 }
 0x1f1   : > { %1056 = vrot.lane.b32.xlu0 %v607_v54, %s5749_s20  ;;  %v5967_v29 = vrot.slane %v628_v21, %v5876_v46  ;;  %v629_v52 = vcombine.high %v628_v21, %v7972_v0 }
 0x1f2   : > { %v653_v30 = vrot.slane %v614_v22, %v5870_v37  ;;  %v1302_v35 = vor.u32 %v1301_v28, %v1298_v27 }
 0x1f3   : > { %v577_v56 = vpop.permute.xlu0 %576  ;;  %v5553_v36 = vcombine.high %v5967_v29, %v5967_v29 }
 0x1f4   : > { %601 = vst.msk [vmem:[#allocation2 + $0x10] sm:$0xf] %vm586_vm13, %v577_v56  ;;  %v1272_v6 = vld [vmem:[#allocation2 + $0x8] sm:$0x1]  ;;  %v5940_v12 = vld [vmem:[#allocation2 + $0x14] sm:$0x1]  ;;  %v661_v38 = vrot.slane %v653_v30, %v5876_v46  ;;  %v654_v3 = vcombine.high %v653_v30, %v7972_v0 }
 0x1f5   : > { %v1983_v9 = vrot.slane %v1272_v6, 5  ;;  %v1990_v18 = vrot.slane %v5940_v12, 5  ;;  %v1303_v42 = vrot.slane %v1302_v35, 4  ;;  %v1293_v49 = vshll.u32 %v1272_v6, 16 }
 0x1f6   : > { %v5280_v43 = vcombine.low %v661_v38, %v661_v38  ;;  %v5554_v50 = vcombine.high %v661_v38, %v661_v38  ;;  %vm807_vm13 = vcmask 785408  }
 0x1f7   : > { %v5905_v57 = vld [vmem:[#allocation2 + $0x4] sm:$0xf]  ;;  %v1295_v55 = vrot.slane %v1293_v49, 5 }
 0x1f8   : > { %834 = vrot.lane.b32.xlu1 %v5905_v57, %s5748_s19  ;;  %v1980_v60 = vrot.slane %v5905_v57, 5  ;;  %v1284_v17 = vshll.u32 %v5905_v57, 16  ;;  %v618_v34 = vshrl.u32 %v5905_v57, 16 }
 0x1fa   : > { %v5923_v1 = vsel %vm5917_vm4, %v5364_v62, %v1980_v60  ;;  %v1982_v8 = vrot.slane %v1980_v60, 4  ;;  %v1286_v24 = vrot.slane %v1284_v17, 5  ;;  %v1289_v41 = vrot.slane %v618_v34, 4 }
 0x1fb   : > { %v5909_v59 = vld [vmem:[#allocation2 + $0x10] sm:$0xf]  ;;  %v1995_v19 = vshrl.u32 %v5923_v1, 16 }
 0x1fc   : > { %1054 = vrot.lane.b32.xlu1 %v5905_v57, %s5749_s20  ;;  %838 = vrot.lane.b32.xlu0 %v5909_v59, %s5748_s19  ;;  %v1987_v2 = vrot.slane %v5909_v59, 5  ;;  %v5945_v15 = vsel %vm5917_vm4, %v1982_v8, %v1983_v9  ;;  %v5972_v32 = vsel %vm5962_vm7, %v1283_v26, %v1286_v24  ;;  %v1304_v33 = vshll.u32 %v5909_v59, 16 }
 0x1fd   : > { %v617_v39 = vpack.i.b16 %v5909_v59, %v5905_v57  ;;  %v619_v45 = vshrl.u32 %v5909_v59, 16  ;;  %v1290_v48 = vor.u32 %v1289_v41, %v1286_v24  ;;  %v643_v57 = vrot.slane %v629_v52, %v5876_v46 }
 0x1fe   : > { %v5934_v7 = vsel %vm5917_vm4, %v5365_v4, %v1987_v2  ;;  %v1989_v16 = vrot.slane %v1987_v2, 4  ;;  %v1306_v40 = vrot.slane %v1304_v33, 5  ;;  %v1313_v2 = vshll.u32 %v5940_v12, 16 }
 0x1ff   : > { %v678_v44 = vrot.slane %v617_v39, %v5870_v37  ;;  %v620_v53 = vpack.i.b16 %v619_v45, %v618_v34  ;;  %v1291_v54 = vrot.slane %v1290_v48, 4  ;;  %v1309_v60 = vrot.slane %v619_v45, 4 }
 0x200   : > { %2424 = vrot.lane.b32.xlu1 %v5923_v1, %s5749_s20  ;;  %1058 = vrot.lane.b32.xlu0 %v5909_v59, %s5749_s20  ;;  %v5956_v23 = vsel %vm5917_vm4, %v1989_v16, %v1990_v18  ;;  %v5992_v47 = vsel %vm5962_vm7, %v1303_v42, %v1306_v40  ;;  %v5283_v61 = vcombine.low %v643_v57, %v643_v57  ;;  %v1315_v8 = vrot.slane %v1313_v2, 5 }
 0x201   : > { %v5998_v51 = vrot.slane %v678_v44, %v5876_v46  ;;  %v703_v58 = vrot.slane %v620_v53, %v5870_v37  ;;  %v6010_v59 = vsel %vm5962_vm7, %v1291_v54, %v1295_v55  ;;  %v1310_v63 = vor.u32 %v1309_v60, %v1306_v40 }
 0x202   : > { %v5555_v5 = vcombine.high %v643_v57, %v643_v57  ;;  %v668_v9 = vrot.slane %v654_v3, %v5876_v46  ;;  %v679_v11 = vcombine.high %v678_v44, %v7972_v0  ;;  %v1994_v14 = vpack.i.b16 %v5934_v7, %v5923_v1 }
 0x203   : > { %v5557_v56 = vcombine.high %v5998_v51, %v5998_v51  ;;  %v711_v62 = vrot.slane %v703_v58, %v5876_v46  ;;  %v1311_v6 = vrot.slane %v1310_v63, 4  ;;  %v1996_v16 = vshrl.u32 %v5934_v7, 16 }
 0x204   : > { %2208 = vrot.lane.b32.xlu0 %v5934_v7, %s5748_s19  ;;  %2428 = vrot.lane.b32.xlu1 %v5934_v7, %s5749_s20  ;;  %v5284_v12 = vcombine.low %v668_v9, %v668_v9  ;;  %v693_v17 = vrot.slane %v679_v11, %v5876_v46  ;;  %v704_v18 = vcombine.high %v703_v58, %v7972_v0  ;;  %v2002_v40 = vshrl.u32 %v5956_v23, 16 }
 0x205   : > { %v5287_v4 = vcombine.low %v711_v62, %v711_v62  ;;  %v5558_v10 = vcombine.high %v711_v62, %v711_v62  ;;  %v6027_v13 = vsel %vm5962_vm7, %v1311_v6, %v1315_v8  ;;  %v2000_v20 = vpack.i.b16 %v5956_v23, %v5945_v15 }
 0x206   : > { %v5556_v21 = vcombine.high %v668_v9, %v668_v9  ;;  %v1997_v22 = vpack.i.b16 %v1996_v16, %v1995_v19  ;;  %v5290_v24 = vcombine.low %v693_v17, %v693_v17  ;;  %v718_v25 = vrot.slane %v704_v18, %v5876_v46 }
 0x207   : > { %v2011_v7 = vrot.slane %v1994_v14, %v5870_v37  ;;  %v2061_v26 = vrot.slane %v2000_v20, %v5870_v37  ;;  %v5559_v28 = vcombine.high %v693_v17, %v693_v17  ;;  %v2001_v48 = vshrl.u32 %v5945_v15, 16 }
 0x208   : > { %2426 = vrot.lane.b32.xlu0 %v5945_v15, %s5749_s20  ;;  %2204 = vrot.lane.b32.xlu1 %v5923_v1, %s5748_s19  ;;  %v1319_v1 = vpack.i.b16 %v5992_v47, %v5972_v32  ;;  %v5291_v27 = vcombine.low %v718_v25, %v718_v25  ;;  %v2036_v33 = vrot.slane %v1997_v22, %v5870_v37  ;;  %v1320_v11 = vshrl.u32 %v5972_v32, 16 }
 0x209   : > { %v6051_v30 = vrot.slane %v2011_v7, %v5876_v46  ;;  %v6057_v34 = vrot.slane %v2061_v26, %v5876_v46  ;;  %v5560_v35 = vcombine.high %v718_v25, %v718_v25  ;;  %v2012_v44 = vcombine.high %v2011_v7, %v7972_v0 }
 0x20a   : > { %v2044_v38 = vrot.slane %v2036_v33, %v5876_v46  ;;  %v1336_v39 = vrot.slane %v1319_v1, %v5870_v37  ;;  %v2062_v45 = vcombine.high %v2061_v26, %v7972_v0  ;;  %v2003_v49 = vpack.i.b16 %v2002_v40, %v2001_v48 }
 0x20b   : > { %v5605_v41 = vcombine.high %v6057_v34, %v6057_v34  ;;  %v2026_v53 = vrot.slane %v2012_v44, %v5876_v46  ;;  %v2037_v55 = vcombine.high %v2036_v33, %v7972_v0  ;;  %vm7991_vm4 = vcmask 1045504  }
 0x20c   : > { %2430 = vrot.lane.b32.xlu0 %v5956_v23, %s5749_s20  ;;  %2206 = vrot.lane.b32.xlu1 %v5945_v15, %s5748_s19  ;;  %v5366_v42 = vcombine.low %v2044_v38, %v2044_v38  ;;  %v2076_v54 = vrot.slane %v2062_v45, %v5876_v46  ;;  %v2086_v15 = vrot.slane %v2003_v49, %v5870_v37  ;;  %vm2764_vm7 = vcmask 173056  }
 0x20d   : > { %v2051_v58 = vrot.slane %v2037_v55, %v5876_v46  ;;  %v5603_v62 = vcombine.high %v2026_v53, %v2026_v53 }
 0x20e   : > { %v5376_v57 = vcombine.low %v2076_v54, %v2076_v54  ;;  %v2094_v2 = vrot.slane %v2086_v15, %v5876_v46  ;;  %v5607_v18 = vcombine.high %v2076_v54, %v2076_v54 }
 0x20f   : > { %v5370_v63 = vcombine.low %v2051_v58, %v2051_v58  ;;  %v5604_v20 = vcombine.high %v2051_v58, %v2051_v58 }
 0x210   : > { %2210 = vrot.lane.b32.xlu0 %v5956_v23, %s5748_s19  ;;  %1529 = vrot.lane.b32.xlu1 %v5972_v32, %s5748_s19  ;;  %v1325_v23 = vpack.i.b16 %v6027_v13, %v6010_v59  ;;  %v5373_v6 = vcombine.low %v2094_v2, %v2094_v2  ;;  %v5606_v16 = vcombine.high %v2094_v2, %v2094_v2 }
 0x212   : > { %v1386_v60 = vrot.slane %v1325_v23, %v5870_v37 }
 0x214   : > { %729 = vrot.lane.b32.xlu0 %v5553_v36, %s5743_s16  ;;  %1749 = vrot.lane.b32.xlu1 %v5972_v32, %s5749_s20  ;;  %v5601_v36 = vcombine.high %v6051_v30, %v6051_v30  ;;  %v6093_v3 = vrot.slane %v1386_v60, %v5876_v46  ;;  %v1387_v25 = vcombine.high %v1386_v60, %v7972_v0 }
 0x216   : > { %v5581_v8 = vcombine.high %v6093_v3, %v6093_v3  ;;  %v1401_v26 = vrot.slane %v1387_v25, %v5876_v46 }
 0x218   : > { %724 = vrot.lane.b32.xlu1 %v5280_v43, %s5744_s17  ;;  %1533 = vrot.lane.b32.xlu0 %v5992_v47, %s5748_s19  ;;  %v6069_v43 = vrot.slane %v1336_v39, %v5876_v46  ;;  %v5583_v60 = vcombine.high %v1401_v26, %v1401_v26 }
 0x21a   : > { %v5577_v52 = vcombine.high %v6069_v43, %v6069_v43 }
 0x21c   : > { %734 = vrot.lane.b32.xlu1 %v5554_v50, %s5742_s15  ;;  %1753 = vrot.lane.b32.xlu0 %v5992_v47, %s5749_s20  ;;  %v5602_v50 = vcombine.high %v2044_v38, %v2044_v38 }
 0x220   : > { %1531 = vrot.lane.b32.xlu1 %v6010_v59, %s5748_s19  ;;  %764 = vrot.lane.b32.xlu0 %v5557_v56, %s5743_s16  ;;  %v5369_v56 = vcombine.low %v2026_v53, %v2026_v53 }
 0x224   : > { %1751 = vrot.lane.b32.xlu1 %v6010_v59, %s5749_s20  ;;  %739 = vrot.lane.b32.xlu0 %v5283_v61, %s5741_s14  ;;  %v1337_v61 = vcombine.high %v1336_v39, %v7972_v0 }
 0x226   : > { %v1351_v9 = vrot.slane %v1337_v61, %v5876_v46 }
 0x228   : > { %759 = vrot.lane.b32.xlu1 %v5287_v4, %s5744_s17  ;;  %749 = vrot.lane.b32.xlu0 %v5555_v5, %s5738_s11  ;;  %v1321_v4 = vshrl.u32 %v5992_v47, 16  ;;  %v1327_v5 = vshrl.u32 %v6027_v13, 16  ;;  %v5579_v44 = vcombine.high %v1351_v9, %v1351_v9 }
 0x22a   : > { %v1322_v14 = vpack.i.b16 %v1321_v4, %v1320_v11 }
 0x22c   : > { %769 = vrot.lane.b32.xlu1 %v5558_v10, %s5742_s15  ;;  %1535 = vrot.lane.b32.xlu0 %v6027_v13, %s5748_s19  ;;  %v2087_v10 = vcombine.high %v2086_v15, %v7972_v0  ;;  %v1361_v32 = vrot.slane %v1322_v14, %v5870_v37 }
 0x22e   : > { %v2101_v17 = vrot.slane %v2087_v10, %v5876_v46  ;;  %v1369_v22 = vrot.slane %v1361_v32, %v5876_v46 }
 0x230   : > { %744 = vrot.lane.b32.xlu1 %v5284_v12, %s5740_s13  ;;  %1755 = vrot.lane.b32.xlu0 %v6027_v13, %s5749_s20  ;;  %v1326_v12 = vshrl.u32 %v6010_v59, 16  ;;  %v5325_v13 = vcombine.low %v1351_v9, %v1351_v9  ;;  %v5377_v19 = vcombine.low %v2101_v17, %v2101_v17  ;;  %v5322_v7 = vcombine.low %v1369_v22, %v1369_v22 }
 0x232   : > { %v1328_v47 = vpack.i.b16 %v1327_v5, %v1326_v12 }
 0x234   : > { %754 = vrot.lane.b32.xlu1 %v5556_v21, %s5739_s12  ;;  %774 = vrot.lane.b32.xlu0 %v5290_v24, %s5741_s14  ;;  %v1411_v59 = vrot.slane %v1328_v47, %v5870_v37  ;;  %v5608_v21 = vcombine.high %v2101_v17, %v2101_v17 }
 0x236   : > { %v1419_v24 = vrot.slane %v1411_v59, %v5876_v46  ;;  %v1412_v40 = vcombine.high %v1411_v59, %v7972_v0 }
 0x238   : > { %779 = vrot.lane.b32.xlu1 %v5291_v27, %s5740_s13  ;;  %784 = vrot.lane.b32.xlu0 %v5559_v28, %s5738_s11  ;;  %v5329_v1 = vcombine.low %v1419_v24, %v1419_v24  ;;  %v1362_v27 = vcombine.high %v1361_v32, %v7972_v0 }
 0x23a   : > { %v1376_v38 = vrot.slane %v1362_v27, %v5876_v46 }
 0x23c   : > { %789 = vrot.lane.b32.xlu1 %v5560_v35, %s5739_s12  ;;  %2112 = vrot.lane.b32.xlu0 %v5601_v36, %s5743_s16  ;;  %v5578_v35 = vcombine.high %v1369_v22, %v1369_v22  ;;  %v5332_v36 = vcombine.low %v1401_v26, %v1401_v26  ;;  %v5326_v45 = vcombine.low %v1376_v38, %v1376_v38 }
 0x240   : > { %2147 = vrot.lane.b32.xlu1 %v5605_v41, %s5743_s16  ;;  %2107 = vrot.lane.b32.xlu0 %v5366_v42, %s5744_s17 }
 0x244   : > { %2117 = vrot.lane.b32.xlu1 %v5602_v50, %s5742_s15  ;;  %1437 = vrot.lane.b32.xlu0 %v5577_v52, %s5743_s16  ;;  %v5582_v50 = vcombine.high %v1419_v24, %v1419_v24  ;;  %v1426_v52 = vrot.slane %v1412_v40, %v5876_v46 }
 0x246   : > { %v5584_v4 = vcombine.high %v1426_v52, %v1426_v52 }
 0x248   : > { %2122 = vrot.lane.b32.xlu1 %v5369_v56, %s5741_s14  ;;  %2157 = vrot.lane.b32.xlu0 %v5376_v57, %s5741_s14  ;;  %v5580_v56 = vcombine.high %v1376_v38, %v1376_v38 }
 0x24c   : > { %2132 = vrot.lane.b32.xlu1 %v5603_v62, %s5738_s11  ;;  %2127 = vrot.lane.b32.xlu0 %v5370_v63, %s5740_s13 }
 0x250   : > { %2142 = vrot.lane.b32.xlu1 %v5373_v6, %s5744_s17  ;;  %1472 = vrot.lane.b32.xlu0 %v5581_v8, %s5743_s16  ;;  %v5333_v8 = vcombine.low %v1426_v52, %v1426_v52 }
 0x254   : > { %2152 = vrot.lane.b32.xlu1 %v5606_v16, %s5742_s15  ;;  %1447 = vrot.lane.b32.xlu0 %v5325_v13, %s5741_s14 }
 0x258   : > { %2167 = vrot.lane.b32.xlu1 %v5607_v18, %s5738_s11  ;;  %2162 = vrot.lane.b32.xlu0 %v5377_v19, %s5740_s13 }
 0x25b   : > { %v833_v28 = vpop.permute.xlu1 %832 }
 0x25c   : > { %2137 = vrot.lane.b32.xlu1 %v5604_v20, %s5739_s12  ;;  %2172 = vrot.lane.b32.xlu0 %v5608_v21, %s5739_s12  ;;  %v843_v48 = vshrl.u32 %v833_v28, 16 }
 0x25f   : > { %v837_v33 = vpop.permute.xlu0 %836  ;;  %v1053_v41 = vpop.permute.xlu1 %1052 }
 0x260   : > { %1432 = vrot.lane.b32.xlu1 %v5322_v7, %s5744_s17  ;;  %1467 = vrot.lane.b32.xlu0 %v5329_v1, %s5744_s17  ;;  %v844_v39 = vshrl.u32 %v837_v33, 16  ;;  %v842_v42 = vpack.i.b16 %v837_v33, %v833_v28  ;;  %v1063_v57 = vshrl.u32 %v1053_v41, 16 }
 0x262   : > { %v845_v23 = vpack.i.b16 %v844_v39, %v843_v48  ;;  %v859_v53 = vrot.slane %v842_v42, %v5870_v37 }
 0x263   : > { %v1057_v49 = vpop.permute.xlu0 %1056 }
 0x264   : > { %1442 = vrot.lane.b32.xlu1 %v5578_v35, %s5742_s15  ;;  %1482 = vrot.lane.b32.xlu0 %v5332_v36, %s5741_s14  ;;  %v1062_v54 = vpack.i.b16 %v1057_v49, %v1053_v41  ;;  %v1064_v55 = vshrl.u32 %v1057_v49, 16  ;;  %v6134_v58 = vrot.slane %v845_v23, %v5870_v37  ;;  %v6138_v5 = vrot.slane %v859_v53, %v5876_v46 }
 0x265   : > { %v860_v17 = vcombine.high %v859_v53, %v7972_v0 }
 0x266   : > { %v1065_v61 = vpack.i.b16 %v1064_v55, %v1063_v57  ;;  %v1079_v62 = vrot.slane %v1062_v54, %v5870_v37  ;;  %v892_v9 = vrot.slane %v6134_v58, %v5876_v46  ;;  %v5561_v47 = vcombine.high %v6138_v5, %v6138_v5 }
 0x267   : > { %v874_v24 = vrot.slane %v860_v17, %v5876_v46 }
 0x268   : > { %1457 = vrot.lane.b32.xlu1 %v5579_v44, %s5738_s11  ;;  %1452 = vrot.lane.b32.xlu0 %v5326_v45, %s5740_s13  ;;  %v6145_v10 = vrot.slane %v1065_v61, %v5870_v37  ;;  %v6153_v16 = vrot.slane %v1079_v62, %v5876_v46  ;;  %v5294_v18 = vcombine.low %v892_v9, %v892_v9 }
 0x269   : > { %v1080_v35 = vcombine.high %v1079_v62, %v7972_v0  ;;  %v5297_v41 = vcombine.low %v874_v24, %v874_v24  ;;  %v5562_v45 = vcombine.high %v892_v9, %v892_v9  ;;  %v885_v9 = vcombine.high %v6134_v58, %v7972_v0 }
 0x26a   : > { %v835_v15 = vpop.permute.xlu1 %834  ;;  %8003 = vst [vmem:[#allocation7_spill] sm:$0xff] %v6153_v16  ;;  %v5569_v20 = vcombine.high %v6153_v16, %v6153_v16  ;;  %v1112_v21 = vrot.slane %v6145_v10, %v5876_v46 }
 0x26b   : > { %v849_v33 = vshrl.u32 %v835_v15, 16  ;;  %v1094_v53 = vrot.slane %v1080_v35, %v5876_v46 }
 0x26c   : > { %1477 = vrot.lane.b32.xlu1 %v5582_v50, %s5742_s15  ;;  %1462 = vrot.lane.b32.xlu0 %v5580_v56, %s5739_s12  ;;  %v5308_v26 = vcombine.low %v1112_v21, %v1112_v21  ;;  %v5570_v52 = vcombine.high %v1112_v21, %v1112_v21  ;;  %v5563_v56 = vcombine.high %v874_v24, %v874_v24 }
 0x26d   : > { %v5311_v57 = vcombine.low %v1094_v53, %v1094_v53  ;;  %v5571_v61 = vcombine.high %v1094_v53, %v1094_v53  ;;  %v899_v24 = vrot.slane %v885_v9, %v5876_v46 }
 0x26e   : > { %v1055_v63 = vpop.permute.xlu1 %1054  ;;  %v839_v2 = vpop.permute.xlu0 %838 }
 0x26f   : > { %v848_v6 = vpack.i.b16 %v839_v2, %v835_v15  ;;  %v850_v25 = vshrl.u32 %v839_v2, 16  ;;  %v1069_v44 = vshrl.u32 %v1055_v63, 16 }
 0x270   : > { %1492 = vrot.lane.b32.xlu1 %v5583_v60, %s5738_s11  ;;  %1497 = vrot.lane.b32.xlu0 %v5584_v4, %s5739_s12 }
 0x271   : > { %v909_v11 = vrot.slane %v848_v6, %v5870_v37  ;;  %v851_v36 = vpack.i.b16 %v850_v25, %v849_v33  ;;  %v1105_v25 = vcombine.high %v6145_v10, %v7972_v0 }
 0x272   : > { %v6148_v12 = vpop.permute.xlu1 %2424  ;;  %v1059_v14 = vpop.permute.xlu0 %1058 }
 0x273   : > { %v1068_v13 = vpack.i.b16 %v1059_v14, %v1055_v63  ;;  %v6168_v22 = vrot.slane %v909_v11, %v5876_v46  ;;  %v1070_v38 = vshrl.u32 %v1059_v14, 16  ;;  %v6194_v48 = vrot.slane %v851_v36, %v5870_v37 }
 0x274   : > { %1487 = vrot.lane.b32.xlu1 %v5333_v8, %s5740_s13  ;;  %960 = vrot.lane.b32.xlu0 %v5561_v47, %s5743_s16  ;;  %v910_v62 = vcombine.high %v909_v11, %v7972_v0  ;;  %v5298_v36 = vcombine.low %v899_v24, %v899_v24  ;;  %v2435_v53 = vshrl.u32 %v6148_v12, 16 }
 0x275   : > { %v1129_v19 = vrot.slane %v1068_v13, %v5870_v37  ;;  %8004 = vst [vmem:[#allocation8_spill] sm:$0xff] %v6168_v22  ;;  %v5565_v27 = vcombine.high %v6168_v22, %v6168_v22  ;;  %v1071_v49 = vpack.i.b16 %v1070_v38, %v1069_v44  ;;  %v942_v60 = vrot.slane %v6194_v48, %v5876_v46 }
 0x276   : > { %v6159_v32 = vpop.permute.xlu1 %2428  ;;  %v6161_v59 = vpop.permute.xlu0 %2208  ;;  %v924_v17 = vrot.slane %v910_v62, %v5876_v46 }
 0x277   : > { %v6180_v28 = vrot.slane %v1129_v19, %v5876_v46  ;;  %v1154_v54 = vrot.slane %v1071_v49, %v5870_v37  ;;  %v1130_v63 = vcombine.high %v1129_v19, %v7972_v0  ;;  %v5301_v6 = vcombine.low %v942_v60, %v942_v60 }
 0x278   : > { %955 = vrot.lane.b32.xlu0 %v5294_v18, %s5744_s17  ;;  %1180 = vrot.lane.b32.xlu1 %v5569_v20, %s5743_s16  ;;  %v5566_v13 = vcombine.high %v942_v60, %v942_v60  ;;  %v5304_v21 = vcombine.low %v924_v17, %v924_v17  ;;  %v2436_v38 = vshrl.u32 %v6159_v32, 16  ;;  %v5567_v49 = vcombine.high %v924_v17, %v924_v17 }
 0x279   : > { %8005 = vst [vmem:[#allocation9_spill] sm:$0xff] %v6180_v28  ;;  %v5573_v42 = vcombine.high %v6180_v28, %v6180_v28  ;;  %v1162_v8 = vrot.slane %v1154_v54, %v5876_v46  ;;  %v1144_v18 = vrot.slane %v1130_v63, %v5876_v46 }
 0x27a   : > { %v6173_v7 = vpop.permute.xlu1 %2204  ;;  %v6175_v1 = vpop.permute.xlu0 %2426 }
 0x27b   : > { %v5315_v11 = vcombine.low %v1162_v8, %v1162_v8  ;;  %v5318_v58 = vcombine.low %v1144_v18, %v1144_v18  ;;  %v5574_v35 = vcombine.high %v1162_v8, %v1162_v8  ;;  %v2214_v10 = vpack.i.b16 %v6161_v59, %v6173_v7 }
 0x27c   : > { %1175 = vrot.lane.b32.xlu0 %v5308_v26, %s5744_s17  ;;  %995 = vrot.lane.b32.xlu1 %v5565_v27, %s5743_s16  ;;  %v2434_v26 = vpack.i.b16 %v6159_v32, %v6148_v12  ;;  %v1155_v32 = vcombine.high %v1154_v54, %v7972_v0  ;;  %v935_v12 = vcombine.high %v6194_v48, %v7972_v0  ;;  %v2215_v54 = vshrl.u32 %v6173_v7, 16 }
 0x27d   : > { %v2216_v7 = vshrl.u32 %v6161_v59, 16 }
 0x27e   : > { %v6185_v39 = vpop.permute.xlu1 %2206  ;;  %v6187_v40 = vpop.permute.xlu0 %2430  ;;  %v1169_v9 = vrot.slane %v1155_v32, %v5876_v46  ;;  %v949_v59 = vrot.slane %v935_v12, %v5876_v46 }
 0x27f   : > { %v2440_v17 = vpack.i.b16 %v6187_v40, %v6175_v1 }
 0x280   : > { %970 = vrot.lane.b32.xlu0 %v5297_v41, %s5741_s14  ;;  %1215 = vrot.lane.b32.xlu1 %v5573_v42, %s5743_s16  ;;  %v1119_v41 = vrot.slane %v1105_v25, %v5876_v46  ;;  %v2451_v42 = vrot.slane %v2434_v26, %v5870_v37 }
 0x281   : > { %v6293_v25 = vrot.slane %v2440_v17, %v5870_v37 }
 0x282   : > { %v6196_v23 = vpop.permute.xlu1 %1529  ;;  %v6198_v50 = vpop.permute.xlu0 %2210  ;;  %v6262_v60 = vrot.slane %v2451_v42, %v5876_v46  ;;  %v5572_v8 = vcombine.high %v1119_v41, %v1119_v41 }
 0x284   : > { %1185 = vrot.lane.b32.xlu0 %v5570_v52, %s5742_s15  ;;  %965 = vrot.lane.b32.xlu1 %v5562_v45, %s5742_s15  ;;  %v5575_v52 = vcombine.high %v1144_v18, %v1144_v18  ;;  %v5617_v48 = vcombine.high %v6262_v60, %v6262_v60 }
 0x286   : > { %v6204_v55 = vpop.permute.xlu1 %1749  ;;  %v6206_v15 = vpop.permute.xlu0 %729 }
 0x288   : > { %980 = vrot.lane.b32.xlu0 %v5563_v56, %s5738_s11  ;;  %1190 = vrot.lane.b32.xlu1 %v5311_v57, %s5741_s14  ;;  %v5564_v56 = vcombine.high %v899_v24, %v899_v24  ;;  %v2437_v57 = vpack.i.b16 %v2436_v38, %v2435_v53  ;;  %v5319_v24 = vcombine.low %v1169_v9, %v1169_v9 }
 0x28a   : > { %v6214_v2 = vpop.permute.xlu1 %724  ;;  %v6216_v4 = vpop.permute.xlu0 %1533 }
 0x28c   : > { %1200 = vrot.lane.b32.xlu0 %v5571_v61, %s5738_s11  ;;  %990 = vrot.lane.b32.xlu1 %v5301_v6, %s5744_s17  ;;  %v2231_v61 = vrot.slane %v2214_v10, %v5870_v37  ;;  %v5312_v6 = vcombine.low %v1119_v41, %v1119_v41  ;;  %v6311_v10 = vrot.slane %v6293_v25, %v5876_v46 }
 0x28e   : > { %v6223_v14 = vpop.permute.xlu1 %734  ;;  %v6225_v47 = vpop.permute.xlu0 %1753 }
 0x28f   : > { %v1759_v31 = vpack.i.b16 %v6225_v47, %v6204_v55 }
 0x290   : > { %1210 = vrot.lane.b32.xlu0 %v5315_v11, %s5744_s17  ;;  %1000 = vrot.lane.b32.xlu1 %v5566_v13, %s5742_s15  ;;  %v6276_v11 = vrot.slane %v2437_v57, %v5870_v37  ;;  %v6279_v13 = vrot.slane %v2231_v61, %v5876_v46 }
 0x292   : > { %v6231_v19 = vpop.permute.xlu1 %1531  ;;  %v6233_v20 = vpop.permute.xlu0 %764  ;;  %8007 = vst [vmem:[#allocation11_spill] sm:$0xff] %v6279_v13  ;;  %v2484_v38 = vrot.slane %v6276_v11, %v5876_v46 }
 0x294   : > { %1005 = vrot.lane.b32.xlu0 %v5304_v21, %s5741_s14  ;;  %1225 = vrot.lane.b32.xlu1 %v5318_v58, %s5741_s14  ;;  %v2217_v58 = vpack.i.b16 %v2216_v7, %v2215_v54  ;;  %v5394_v32 = vcombine.low %v2484_v38, %v2484_v38  ;;  %v5568_v54 = vcombine.high %v949_v59, %v949_v59 }
 0x295   : > { %v2232_v7 = vcombine.high %v2231_v61, %v7972_v0 }
 0x296   : > { %v6242_v27 = vpop.permute.xlu1 %1751  ;;  %v6244_v33 = vpop.permute.xlu0 %739  ;;  %v6307_v41 = vrot.slane %v2217_v58, %v5870_v37 }
 0x298   : > { %1220 = vrot.lane.b32.xlu0 %v5574_v35, %s5742_s15  ;;  %975 = vrot.lane.b32.xlu1 %v5298_v36, %s5740_s13  ;;  %v5609_v36 = vcombine.high %v6279_v13, %v6279_v13  ;;  %v2264_v17 = vrot.slane %v6307_v41, %v5876_v46 }
 0x29a   : > { %v6253_v44 = vpop.permute.xlu1 %759  ;;  %v6255_v45 = vpop.permute.xlu0 %749  ;;  %v5610_v22 = vcombine.high %v2264_v17, %v2264_v17 }
 0x29b   : > { %8006 = vst [vmem:[#allocation10_spill] sm:$0xff] %v6255_v45  ;;  %v1546_v45 = vshrl.u32 %v6231_v19, 16 }
 0x29c   : > { %1015 = vrot.lane.b32.xlu0 %v5567_v49, %s5738_s11  ;;  %1235 = vrot.lane.b32.xlu1 %v5575_v52, %s5738_s11  ;;  %v2220_v49 = vpack.i.b16 %v6198_v50, %v6185_v39 }
 0x29e   : > { %v6265_v62 = vpop.permute.xlu1 %769  ;;  %v6267_v63 = vpop.permute.xlu0 %1535  ;;  %v6322_v57 = vrot.slane %v2220_v49, %v5870_v37  ;;  %v5380_v49 = vcombine.low %v2264_v17, %v2264_v17 }
 0x2a0   : > { %1195 = vrot.lane.b32.xlu0 %v5312_v6, %s5740_s13  ;;  %985 = vrot.lane.b32.xlu1 %v5564_v56, %s5739_s12  ;;  %v5305_v56 = vcombine.low %v949_v59, %v949_v59  ;;  %v6338_v58 = vrot.slane %v6322_v57, %v5876_v46  ;;  %v5576_v59 = vcombine.high %v1169_v9, %v1169_v9 }
 0x2a1   : > { %v2246_v9 = vrot.slane %v2232_v7, %v5876_v46 }
 0x2a2   : > { %v6283_v18 = vpop.permute.xlu1 %744  ;;  %v6285_v21 = vpop.permute.xlu0 %1755  ;;  %8011 = vst [vmem:[#allocation15_spill] sm:$0xff] %v6338_v58 }
 0x2a4   : > { %1205 = vrot.lane.b32.xlu0 %v5572_v8, %s5739_s12  ;;  %2552 = vrot.lane.b32.xlu1 %v5617_v48, %s5743_s16  ;;  %v5621_v8 = vcombine.high %v6311_v10, %v6311_v10  ;;  %v2452_v48 = vcombine.high %v2451_v42, %v7972_v0  ;;  %v1539_v42 = vpack.i.b16 %v6216_v4, %v6196_v23 }
 0x2a6   : > { %v6295_v26 = vpop.permute.xlu1 %754  ;;  %v6297_v35 = vpop.permute.xlu0 %774  ;;  %v2466_v0 = vrot.slane %v2452_v48, %v5876_v46  ;;  %v5383_v48 = vcombine.low %v2246_v9, %v2246_v9 }
 0x2a7   : > { %8008 = vst [vmem:[#allocation12_spill] sm:$0xff] %v6295_v26 }
 0x2a8   : > { %1230 = vrot.lane.b32.xlu0 %v5319_v24, %s5740_s13  ;;  %2332 = vrot.lane.b32.xlu1 %v5609_v36, %s5743_s16  ;;  %v5397_v13 = vcombine.low %v2466_v0, %v2466_v0 }
 0x2aa   : > { %v6315_v52 = vpop.permute.xlu1 %779  ;;  %v6317_v53 = vpop.permute.xlu0 %784 }
 0x2ab   : > { %8009 = vst [vmem:[#allocation13_spill] sm:$0xff] %v6317_v53 }
 0x2ac   : > { %2547 = vrot.lane.b32.xlu0 %v5394_v32, %s5744_s17  ;;  %1010 = vrot.lane.b32.xlu1 %v5305_v56, %s5740_s13  ;;  %v2442_v32 = vshrl.u32 %v6187_v40, 16  ;;  %v5618_v56 = vcombine.high %v2484_v38, %v2484_v38  ;;  %v2222_v38 = vshrl.u32 %v6198_v50, 16 }
 0x2ae   : > { %v6324_v6 = vpop.permute.xlu1 %789  ;;  %v6326_v12 = vpop.permute.xlu0 %2112 }
 0x2af   : > { %8010 = vst [vmem:[#allocation14_spill] sm:$0xff] %v6324_v6 }
 0x2b0   : > { %1020 = vrot.lane.b32.xlu1 %v5568_v54, %s5739_s12  ;;  %2587 = vrot.lane.b32.xlu0 %v5621_v8, %s5743_s16  ;;  %v5613_v8 = vcombine.high %v6338_v58, %v6338_v58 }
 0x2b2   : > { %v6340_v24 = vpop.permute.xlu1 %2147  ;;  %v6342_v36 = vpop.permute.xlu0 %2107 }
 0x2b4   : > { %1240 = vrot.lane.b32.xlu1 %v5576_v59, %s5739_s12  ;;  %2327 = vrot.lane.b32.xlu0 %v5380_v49, %s5744_s17  ;;  %v2441_v59 = vshrl.u32 %v6175_v1, 16  ;;  %v6362_v49 = vrot.slane %v1539_v42, %v5870_v37  ;;  %v2221_v1 = vshrl.u32 %v6185_v39, 16  ;;  %v6381_v42 = vrot.slane %v1759_v31, %v5870_v37 }
 0x2b5   : > { %v5619_v39 = vcombine.high %v2466_v0, %v2466_v0 }
 0x2b6   : > { %v6349_v61 = vpop.permute.xlu1 %2117  ;;  %v6351_v54 = vpop.permute.xlu0 %1437  ;;  %v2443_v40 = vpack.i.b16 %v2442_v32, %v2441_v59  ;;  %v2223_v32 = vpack.i.b16 %v2222_v38, %v2221_v1 }
 0x2b8   : > { %2557 = vrot.lane.b32.xlu0 %v5618_v56, %s5742_s15  ;;  %2367 = vrot.lane.b32.xlu1 %v5613_v8, %s5743_s16  ;;  %v6374_v50 = vrot.slane %v2443_v40, %v5870_v37  ;;  %v6378_v56 = vrot.slane %v6362_v49, %v5876_v46  ;;  %v6394_v40 = vrot.slane %v6381_v42, %v5876_v46 }
 0x2ba   : > { %v6366_v58 = vpop.permute.xlu1 %2122  ;;  %v6368_v7 = vpop.permute.xlu0 %2157  ;;  %8012 = vst [vmem:[#allocation16_spill] sm:$0xff] %v6378_v56  ;;  %8014 = vst [vmem:[#allocation18_spill] sm:$0xff] %v6394_v40  ;;  %v5585_v0 = vcombine.high %v6378_v56, %v6378_v56  ;;  %v2534_v17 = vrot.slane %v6374_v50, %v5876_v46 }
 0x2bc   : > { %2342 = vrot.lane.b32.xlu0 %v5383_v48, %s5741_s14  ;;  %2562 = vrot.lane.b32.xlu1 %v5397_v13, %s5741_s14  ;;  %v6390_v13 = vrot.slane %v2223_v32, %v5870_v37  ;;  %v5611_v48 = vcombine.high %v2246_v9, %v2246_v9  ;;  %v5401_v6 = vcombine.low %v2534_v17, %v2534_v17 }
 0x2bd   : > { %v5593_v9 = vcombine.high %v6394_v40, %v6394_v40 }
 0x2be   : > { %v6383_v8 = vpop.permute.xlu1 %2132  ;;  %v6385_v59 = vpop.permute.xlu0 %2127  ;;  %v2314_v56 = vrot.slane %v6390_v13, %v5876_v46 }
 0x2bf   : > { %8013 = vst [vmem:[#allocation17_spill] sm:$0xff] %v6383_v8  ;;  %v5622_v8 = vcombine.high %v2534_v17, %v2534_v17 }
 0x2c0   : > { %2572 = vrot.lane.b32.xlu0 %v5619_v39, %s5738_s11  ;;  %2337 = vrot.lane.b32.xlu1 %v5610_v22, %s5742_s15  ;;  %v8015_v22 = vmov 0   ;;  %v5387_v53 = vcombine.low %v2314_v56, %v2314_v56 }
 0x2c1   : > { %v2477_v1 = vcombine.high %v6276_v11, %v8015_v22 }
 0x2c2   : > { %v6396_v38 = vpop.permute.xlu1 %2142  ;;  %v6398_v31 = vpop.permute.xlu0 %1472 }
 0x2c3   : > { %v2491_v26 = vrot.slane %v2477_v1, %v5876_v46  ;;  %v5614_v1 = vcombine.high %v2314_v56, %v2314_v56 }
 0x2c4   : > { %2352 = vrot.lane.b32.xlu0 %v5611_v48, %s5738_s11  ;;  %1657 = vrot.lane.b32.xlu1 %v5585_v0, %s5743_s16  ;;  %v2502_v48 = vcombine.high %v6293_v25, %v8015_v22  ;;  %v2282_v25 = vcombine.high %v6322_v57, %v8015_v22  ;;  %v1545_v57 = vpack.i.b16 %v6267_v63, %v6231_v19 }
 0x2c5   : > { %v5398_v28 = vcombine.low %v2491_v26, %v2491_v26  ;;  %v2527_v19 = vcombine.high %v6374_v50, %v8015_v22 }
 0x2c6   : > { %v6408_v32 = vpop.permute.xlu1 %2152  ;;  %v6410_v39 = vpop.permute.xlu0 %1447  ;;  %v2516_v40 = vrot.slane %v2502_v48, %v5876_v46  ;;  %v1761_v48 = vshrl.u32 %v6225_v47, 16 }
 0x2c8   : > { %2582 = vrot.lane.b32.xlu1 %v5401_v6, %s5744_s17  ;;  %1877 = vrot.lane.b32.xlu0 %v5593_v9, %s5743_s16  ;;  %v2257_v6 = vcombine.high %v6307_v41, %v8015_v22  ;;  %v1541_v9 = vshrl.u32 %v6216_v4, 16  ;;  %v5404_v56 = vcombine.low %v2516_v40, %v2516_v40 }
 0x2ca   : > { %v6420_v0 = vpop.permute.xlu1 %2167  ;;  %v6422_v11 = vpop.permute.xlu0 %2162  ;;  %v6441_v4 = vrot.slane %v2257_v6, %v5876_v46 }
 0x2cb   : > { %8016 = vst [vmem:[#allocation19_spill] sm:$0xff] %v6420_v0  ;;  %8017 = vst [vmem:[#allocation20_spill] sm:$0xff] %v6422_v11 }
 0x2cc   : > { %2592 = vrot.lane.b32.xlu1 %v5622_v8, %s5742_s15  ;;  %2362 = vrot.lane.b32.xlu0 %v5387_v53, %s5744_s17  ;;  %v1540_v8 = vshrl.u32 %v6196_v23, 16  ;;  %v5623_v53 = vcombine.high %v2516_v40, %v2516_v40  ;;  %v2296_v23 = vrot.slane %v2282_v25, %v5876_v46  ;;  %v5384_v47 = vcombine.low %v6441_v4, %v6441_v4 }
 0x2cd   : > { %v1765_v40 = vpack.i.b16 %v6285_v21, %v6242_v27 }
 0x2ce   : > { %v6433_v0 = vpop.permute.xlu1 %2137  ;;  %v6435_v17 = vpop.permute.xlu0 %2172  ;;  %v1542_v41 = vpack.i.b16 %v1541_v9, %v1540_v8 }
 0x2cf   : > { %8018 = vst [vmem:[#allocation21_spill] sm:$0xff] %v6433_v0  ;;  %8019 = vst [vmem:[#allocation22_spill] sm:$0xff] %v6435_v17 }
 0x2d0   : > { %2567 = vrot.lane.b32.xlu1 %v5398_v28, %s5740_s13  ;;  %2372 = vrot.lane.b32.xlu0 %v5614_v1, %s5742_s15  ;;  %v1760_v28 = vshrl.u32 %v6204_v55, 16  ;;  %v6455_v6 = vrot.slane %v1542_v41, %v5870_v37  ;;  %v1606_v1 = vrot.slane %v1545_v57, %v5870_v37  ;;  %v5390_v55 = vcombine.low %v2296_v23, %v2296_v23 }
 0x2d1   : > { %v5620_v41 = vcombine.high %v2491_v26, %v2491_v26  ;;  %v6475_v57 = vrot.slane %v1765_v40, %v5870_v37  ;;  %v1777_v26 = vcombine.high %v6381_v42, %v8015_v22  ;;  %v1557_v42 = vcombine.high %v6362_v49, %v8015_v22 }
 0x2d2   : > { %v6446_v0 = vpop.permute.xlu1 %1432  ;;  %v6448_v17 = vpop.permute.xlu0 %1467  ;;  %v1762_v9 = vpack.i.b16 %v1761_v48, %v1760_v28  ;;  %v6472_v48 = vrot.slane %v1606_v1, %v5876_v46  ;;  %v2307_v49 = vcombine.high %v6390_v13, %v8015_v22  ;;  %v1767_v13 = vshrl.u32 %v6285_v21, 16 }
 0x2d3   : > { %v1791_v11 = vrot.slane %v1777_v26, %v5876_v46 }
 0x2d4   : > { %2607 = vrot.lane.b32.xlu1 %v5623_v53, %s5738_s11  ;;  %2597 = vrot.lane.b32.xlu0 %v5404_v56, %s5741_s14  ;;  %v5615_v53 = vcombine.high %v2296_v23, %v2296_v23  ;;  %v6469_v56 = vrot.slane %v1762_v9, %v5870_v37  ;;  %8021 = vst [vmem:[#allocation24_spill] sm:$0xff] %v6472_v48 }
 0x2d5   : > { %v6489_v23 = vrot.slane %v6475_v57, %v5876_v46 }
 0x2d6   : > { %v6462_v8 = vpop.permute.xlu1 %1442  ;;  %v6464_v25 = vpop.permute.xlu0 %1482 }
 0x2d7   : > { %8020 = vst [vmem:[#allocation23_spill] sm:$0xff] %v6464_v25  ;;  %8024 = vst [vmem:[#allocation27_spill] sm:$0xff] %v6489_v23 }
 0x2d8   : > { %2347 = vrot.lane.b32.xlu1 %v5384_v47, %s5740_s13  ;;  %2377 = vrot.lane.b32.xlu0 %v5390_v55, %s5741_s14  ;;  %v1589_v47 = vrot.slane %v6455_v6, %v5876_v46 }
 0x2da   : > { %v6477_v28 = vpop.permute.xlu1 %1457  ;;  %v6479_v16 = vpop.permute.xlu0 %1452  ;;  %v5336_v55 = vcombine.low %v1589_v47, %v1589_v47 }
 0x2db   : > { %8022 = vst [vmem:[#allocation25_spill] sm:$0xff] %v6477_v28  ;;  %8023 = vst [vmem:[#allocation26_spill] sm:$0xff] %v6479_v16  ;;  %v5589_v28 = vcombine.high %v6472_v48, %v6472_v48  ;;  %v5597_v48 = vcombine.high %v6489_v23, %v6489_v23  ;;  %v1571_v23 = vrot.slane %v1557_v42, %v5876_v46 }
 0x2dc   : > { %2577 = vrot.lane.b32.xlu1 %v5620_v41, %s5739_s12  ;;  %2387 = vrot.lane.b32.xlu0 %v5615_v53, %s5738_s11  ;;  %v1809_v41 = vrot.slane %v6469_v56, %v5876_v46  ;;  %v1547_v53 = vshrl.u32 %v6267_v63, 16 }
 0x2dd   : > { %v5339_v42 = vcombine.low %v1571_v23, %v1571_v23 }
 0x2de   : > { %v6491_v9 = vpop.permute.xlu1 %1477  ;;  %v6493_v40 = vpop.permute.xlu0 %1462  ;;  %v1548_v63 = vpack.i.b16 %v1547_v53, %v1546_v45  ;;  %v1607_v53 = vcombine.high %v1606_v1, %v8015_v22 }
 0x2df   : > { %8025 = vst [vmem:[#allocation28_spill] sm:$0xff] %v6493_v40  ;;  %v5350_v40 = vcombine.low %v1809_v41, %v1809_v41 }
 0x2e0   : > { %1652 = vrot.lane.b32.xlu0 %v5336_v55, %s5744_s17  ;;  %1692 = vrot.lane.b32.xlu1 %v5589_v28, %s5743_s16  ;;  %v1631_v45 = vrot.slane %v1548_v63, %v5870_v37 }
 0x2e2   : > { %v6504_v25 = vpop.permute.xlu1 %1492  ;;  %v6506_v16 = vpop.permute.xlu0 %1497 }
 0x2e3   : > { %8026 = vst [vmem:[#allocation29_spill] sm:$0xff] %v6504_v25  ;;  %8027 = vst [vmem:[#allocation30_spill] sm:$0xff] %v6506_v16  ;;  %v5353_v16 = vcombine.low %v1791_v11, %v1791_v11  ;;  %v5586_v25 = vcombine.high %v1589_v47, %v1589_v47  ;;  %v5587_v47 = vcombine.high %v1571_v23, %v1571_v23 }
 0x2e4   : > { %1872 = vrot.lane.b32.xlu1 %v5350_v40, %s5744_s17  ;;  %1912 = vrot.lane.b32.xlu0 %v5597_v48, %s5743_s16  ;;  %v6526_v48 = vrot.slane %v2307_v49, %v5876_v46  ;;  %v1639_v23 = vrot.slane %v1631_v45, %v5876_v46 }
 0x2e6   : > { %v6516_v28 = vpop.permute.xlu1 %1487  ;;  %v6518_v55 = vpop.permute.xlu0 %960  ;;  %v5391_v50 = vcombine.low %v6526_v48, %v6526_v48 }
 0x2e8   : > { %1887 = vrot.lane.b32.xlu1 %v5353_v16, %s5741_s14  ;;  %1662 = vrot.lane.b32.xlu0 %v5586_v25, %s5742_s15  ;;  %v1766_v16 = vshrl.u32 %v6242_v27, 16  ;;  %v2541_v25 = vrot.slane %v2527_v19, %v5876_v46  ;;  %v5343_v19 = vcombine.low %v1639_v23, %v1639_v23 }
 0x2ea   : > { %v6530_v26 = vpop.permute.xlu1 %1180  ;;  %v6532_v40 = vpop.permute.xlu0 %955  ;;  %v1768_v21 = vpack.i.b16 %v1767_v13, %v1766_v16  ;;  %v5405_v1 = vcombine.low %v2541_v25, %v2541_v25  ;;  %v1621_v13 = vrot.slane %v1607_v53, %v5876_v46  ;;  %v1582_v53 = vcombine.high %v6455_v6, %v8015_v22 }
 0x2eb   : > { %8028 = vst [vmem:[#allocation31_spill] sm:$0xff] %v6530_v26  ;;  %v5594_v26 = vcombine.high %v1809_v41, %v1809_v41  ;;  %v1827_v41 = vcombine.high %v6475_v57, %v8015_v22 }
 0x2ec   : > { %1677 = vrot.lane.b32.xlu1 %v5587_v47, %s5738_s11  ;;  %1667 = vrot.lane.b32.xlu0 %v5339_v42, %s5741_s14  ;;  %v1851_v27 = vrot.slane %v1768_v21, %v5870_v37  ;;  %v5595_v21 = vcombine.high %v1791_v11, %v1791_v11  ;;  %v1802_v11 = vcombine.high %v6469_v56, %v8015_v22 }
 0x2ee   : > { %v6541_v49 = vpop.permute.xlu1 %995  ;;  %v6543_v63 = vpop.permute.xlu0 %1175  ;;  %v1859_v37 = vrot.slane %v1851_v27, %v5876_v46  ;;  %v1816_v56 = vrot.slane %v1802_v11, %v5876_v46 }
 0x2ef   : > { %8029 = vst [vmem:[#allocation32_spill] sm:$0xff] %v6541_v49  ;;  %v5624_v49 = vcombine.high %v2541_v25, %v2541_v25 }
 0x2f0   : > { %2382 = vrot.lane.b32.xlu1 %v5391_v50, %s5740_s13  ;;  %1882 = vrot.lane.b32.xlu0 %v5594_v26, %s5742_s15  ;;  %v5346_v50 = vcombine.low %v1621_v13, %v1621_v13  ;;  %v5598_v57 = vcombine.high %v1859_v37, %v1859_v37 }
 0x2f2   : > { %v6549_v47 = vpop.permute.xlu1 %1215  ;;  %v6551_v42 = vpop.permute.xlu0 %970 }
 0x2f3   : > { %8030 = vst [vmem:[#allocation33_spill] sm:$0xff] %v6549_v47  ;;  %8031 = vst [vmem:[#allocation34_spill] sm:$0xff] %v6551_v42  ;;  %v1841_v42 = vrot.slane %v1827_v41, %v5876_v46 }
 0x2f4   : > { %1687 = vrot.lane.b32.xlu1 %v5343_v19, %s5744_s17  ;;  %2602 = vrot.lane.b32.xlu0 %v5405_v1, %s5740_s13 }
 0x2f5   : > { %v5360_v6 = vcombine.low %v1841_v42, %v1841_v42 }
 0x2f6   : > { %v6558_v16 = vpop.permute.xlu1 %965  ;;  %v6560_v26 = vpop.permute.xlu0 %1185 }
 0x2f7   : > { %8032 = vst [vmem:[#allocation35_spill] sm:$0xff] %v6560_v26  ;;  %v5357_v26 = vcombine.low %v1859_v37, %v1859_v37  ;;  %v1632_v37 = vcombine.high %v1631_v45, %v8015_v22 }
 0x2f8   : > { %1702 = vrot.lane.b32.xlu1 %v5346_v50, %s5741_s14  ;;  %1897 = vrot.lane.b32.xlu0 %v5595_v21, %s5738_s11 }
 0x2f9   : > { %v1646_v45 = vrot.slane %v1632_v37, %v5876_v46 }
 0x2fa   : > { %v6567_v19 = vpop.permute.xlu1 %1190  ;;  %v6569_v1 = vpop.permute.xlu0 %980 }
 0x2fb   : > { %8033 = vst [vmem:[#allocation36_spill] sm:$0xff] %v6567_v19  ;;  %8034 = vst [vmem:[#allocation37_spill] sm:$0xff] %v6569_v1  ;;  %v1596_v19 = vrot.slane %v1582_v53, %v5876_v46 }
 0x2fc   : > { %1917 = vrot.lane.b32.xlu1 %v5598_v57, %s5742_s15  ;;  %2612 = vrot.lane.b32.xlu0 %v5624_v49, %s5739_s12  ;;  %v5590_v57 = vcombine.high %v1639_v23, %v1639_v23  ;;  %v1852_v23 = vcombine.high %v1851_v27, %v8015_v22 }
 0x2fd   : > { %v5340_v49 = vcombine.low %v1596_v19, %v1596_v19 }
 0x2fe   : > { %v6576_v50 = vpop.permute.xlu1 %990  ;;  %v6578_v21 = vpop.permute.xlu0 %1200  ;;  %v1866_v27 = vrot.slane %v1852_v23, %v5876_v46  ;;  %v5592_v23 = vcombine.high %v1646_v45, %v1646_v45 }
 0x2ff   : > { %8035 = vst [vmem:[#allocation38_spill] sm:$0xff] %v6578_v21 }
 0x300   : > { %1922 = vrot.lane.b32.xlu1 %v5360_v6, %s5741_s14  ;;  %1907 = vrot.lane.b32.xlu0 %v5357_v26, %s5744_s17  ;;  %v5354_v6 = vcombine.low %v1816_v56, %v1816_v56  ;;  %v5591_v26 = vcombine.high %v1621_v13, %v1621_v13  ;;  %v5600_v37 = vcombine.high %v1866_v27, %v1866_v27 }
 0x302   : > { %v6583_v25 = vpop.permute.xlu1 %1000  ;;  %v6585_v41 = vpop.permute.xlu0 %1210 }
 0x303   : > { %8036 = vst [vmem:[#allocation39_spill] sm:$0xff] %v6583_v25 }
 0x304   : > { %1672 = vrot.lane.b32.xlu1 %v5340_v49, %s5740_s13  ;;  %1697 = vrot.lane.b32.xlu0 %v5590_v57, %s5742_s15  ;;  %v5588_v49 = vcombine.high %v1596_v19, %v1596_v19  ;;  %v5599_v57 = vcombine.high %v1841_v42, %v1841_v42 }
 0x306   : > { %v6591_v21 = vpop.permute.xlu1 %1225  ;;  %v6593_v53 = vpop.permute.xlu0 %1005 }
 0x307   : > { %8037 = vst [vmem:[#allocation40_spill] sm:$0xff] %v6591_v21  ;;  %8038 = vst [vmem:[#allocation41_spill] sm:$0xff] %v6593_v53 }
 0x308   : > { %1892 = vrot.lane.b32.xlu1 %v5354_v6, %s5740_s13  ;;  %1712 = vrot.lane.b32.xlu0 %v5591_v26, %s5738_s11  ;;  %v5347_v6 = vcombine.low %v1646_v45, %v1646_v45  ;;  %v5596_v26 = vcombine.high %v1816_v56, %v1816_v56  ;;  %v5616_v56 = vcombine.high %v6526_v48, %v6526_v48 }
 0x30a   : > { %v6598_v1 = vpop.permute.xlu1 %975  ;;  %v6600_v11 = vpop.permute.xlu0 %1220 }
 0x30b   : > { %8039 = vst [vmem:[#allocation42_spill] sm:$0xff] %v6598_v1  ;;  %8040 = vst [vmem:[#allocation43_spill] sm:$0xff] %v6600_v11 }
 0x30c   : > { %1682 = vrot.lane.b32.xlu1 %v5588_v49, %s5739_s12  ;;  %1932 = vrot.lane.b32.xlu0 %v5599_v57, %s5738_s11  ;;  %v5361_v49 = vcombine.low %v1866_v27, %v1866_v27 }
 0x30e   : > { %v6605_v21 = vpop.permute.xlu1 %1235  ;;  %v6607_v13 = vpop.permute.xlu0 %1015 }
 0x30f   : > { %8041 = vst [vmem:[#allocation44_spill] sm:$0xff] %v6605_v21  ;;  %8042 = vst [vmem:[#allocation45_spill] sm:$0xff] %v6607_v13 }
 0x310   : > { %1707 = vrot.lane.b32.xlu1 %v5347_v6, %s5740_s13  ;;  %1902 = vrot.lane.b32.xlu0 %v5596_v26, %s5739_s12  ;;  %v2709_v6 = vld [vmem:[%s7968_s4] sm:$0x3] }
 0x312   : > { %v6612_v19 = vpop.permute.xlu1 %985  ;;  %v6614_v42 = vpop.permute.xlu0 %1195 }
 0x313   : > { %8043 = vst [vmem:[#allocation46_spill] sm:$0xff] %v6612_v19  ;;  %8044 = vst [vmem:[#allocation47_spill] sm:$0xff] %v6614_v42 }
 0x314   : > { %1937 = vrot.lane.b32.xlu1 %v5600_v37, %s5739_s12  ;;  %1927 = vrot.lane.b32.xlu0 %v5361_v49, %s5740_s13  ;;  %v5612_v37 = vcombine.high %v6441_v4, %v6441_v4 }
 0x316   : > { %v2553_v57 = vpop.permute.xlu1 %2552  ;;  %v6618_v22 = vpop.permute.xlu0 %1205 }
 0x317   : > { %8045 = vst [vmem:[#allocation48_spill] sm:$0xff] %v6618_v22 }
 0x318   : > { %2392 = vrot.lane.b32.xlu1 %v5616_v56, %s5739_s12  ;;  %1717 = vrot.lane.b32.xlu0 %v5592_v23, %s5739_s12 }
 0x31a   : > { %v6627_v26 = vpop.permute.xlu1 %2332  ;;  %v6629_v27 = vpop.permute.xlu0 %1230 }
 0x31b   : > { %8046 = vst [vmem:[#allocation49_spill] sm:$0xff] %v6627_v26  ;;  %8047 = vst [vmem:[#allocation50_spill] sm:$0xff] %v6629_v27 }
 0x31c   : > { %2357 = vrot.lane.b32.xlu0 %v5612_v37, %s5739_s12  ;;  %2712 = vperm.xlu1 %5727, %v2709_v6  }
 0x31e   : > { %v6634_v48 = vpop.permute.xlu1 %1010  ;;  %v2548_v45 = vpop.permute.xlu0 %2547 }
 0x31f   : > { %8048 = vst [vmem:[#allocation51_spill] sm:$0xff] %v6634_v48 }
 0x322   : > { %v6636_v49 = vpop.permute.xlu1 %1020  ;;  %v2588_v56 = vpop.permute.xlu0 %2587 }
 0x323   : > { %8049 = vst [vmem:[#allocation52_spill] sm:$0xff] %v6636_v49 }
 0x326   : > { %v6638_v23 = vpop.permute.xlu1 %1240  ;;  %v6640_v46 = vpop.permute.xlu0 %2327 }
 0x327   : > { %8050 = vst [vmem:[#allocation53_spill] sm:$0xff] %v6638_v23  ;;  %8051 = vst [vmem:[#allocation54_spill] sm:$0xff] %v6640_v46 }
 0x32a   : > { %v6642_v21 = vpop.permute.xlu1 %2367  ;;  %v2558_v26 = vpop.permute.xlu0 %2557 }
 0x32b   : > { %8052 = vst [vmem:[#allocation55_spill] sm:$0xff] %v6642_v21 }
 0x32e   : > { %v2563_v13 = vpop.permute.xlu1 %2562  ;;  %v6644_v22 = vpop.permute.xlu0 %2342 }
 0x32f   : > { %8053 = vst [vmem:[#allocation56_spill] sm:$0xff] %v6644_v22 }
 0x332   : > { %v6646_v4 = vpop.permute.xlu1 %2337  ;;  %v2573_v37 = vpop.permute.xlu0 %2572 }
 0x333   : > { %8054 = vst [vmem:[#allocation57_spill] sm:$0xff] %v6646_v4 }
 0x336   : > { %v6648_v6 = vpop.permute.xlu1 %1657  ;;  %v6650_v19 = vpop.permute.xlu0 %2352 }
 0x337   : > { %8055 = vst [vmem:[#allocation58_spill] sm:$0xff] %v6648_v6  ;;  %8056 = vst [vmem:[#allocation59_spill] sm:$0xff] %v6650_v19 }
 0x33a   : > { %v2583_v48 = vpop.permute.xlu1 %2582  ;;  %v6652_v49 = vpop.permute.xlu0 %1877 }
 0x33b   : > { %8057 = vst [vmem:[#allocation60_spill] sm:$0xff] %v6652_v49 }
 0x33e   : > { %v2593_v27 = vpop.permute.xlu1 %2592  ;;  %v6654_v23 = vpop.permute.xlu0 %2362 }
 0x33f   : > { %8058 = vst [vmem:[#allocation61_spill] sm:$0xff] %v6654_v23 }
 0x342   : > { %v2568_v46 = vpop.permute.xlu1 %2567  ;;  %v6656_v53 = vpop.permute.xlu0 %2372 }
 0x343   : > { %8059 = vst [vmem:[#allocation62_spill] sm:$0xff] %v6656_v53 }
 0x346   : > { %v2608_v21 = vpop.permute.xlu1 %2607  ;;  %v2598_v42 = vpop.permute.xlu0 %2597 }
 0x34a   : > { %v6658_v25 = vpop.permute.xlu1 %2347  ;;  %v6660_v22 = vpop.permute.xlu0 %2377 }
 0x34b   : > { %8060 = vst [vmem:[#allocation63_spill] sm:$0xff] %v6658_v25  ;;  %8061 = vst [vmem:[#allocation64_spill] sm:$0xff] %v6660_v22 }
 0x34e   : > { %v2578_v4 = vpop.permute.xlu1 %2577  ;;  %v6662_v1 = vpop.permute.xlu0 %2387 }
 0x34f   : > { %8062 = vst [vmem:[#allocation65_spill] sm:$0xff] %v6662_v1 }
 0x352   : > { %v6664_v6 = vpop.permute.xlu1 %1692  ;;  %v6666_v19 = vpop.permute.xlu0 %1652 }
 0x353   : > { %8063 = vst [vmem:[#allocation66_spill] sm:$0xff] %v6664_v6  ;;  %v2616_v6 = vsel %vm791_vm8, %v6262_v60, %v2548_v45 }
 0x356   : > { %v6668_v49 = vpop.permute.xlu1 %1872  ;;  %v6670_v11 = vpop.permute.xlu0 %1912 }
 0x357   : > { %8064 = vst [vmem:[#allocation67_spill] sm:$0xff] %v6670_v11  ;;  %v2631_v11 = vsel %vm791_vm8, %v6311_v10, %v2583_v48 }
 0x358   : > { %v2633_v45 = vsel %vm795_vm9, %v2631_v11, %v2588_v56  ;;  %v1501_v11 = vsel %vm791_vm8, %v6069_v43, %v6446_v0  ;;  %v8072_v56 = vld [vmem:[#allocation20_spill] sm:$0xff] }
 0x359   : > { %v2635_v10 = vsel %vm798_vm10, %v2633_v45, %v2593_v27  ;;  %v1503_v0 = vsel %vm795_vm9, %v1501_v11, %v6351_v54 }
 0x35a   : > { %v6672_v23 = vpop.permute.xlu1 %1887  ;;  %v6674_v53 = vpop.permute.xlu0 %1662 }
 0x35b   : > { %8065 = vst [vmem:[#allocation68_spill] sm:$0xff] %v6672_v23  ;;  %8066 = vst [vmem:[#allocation69_spill] sm:$0xff] %v6674_v53  ;;  %v2618_v23 = vsel %vm795_vm9, %v2616_v6, %v2553_v57  ;;  %v2637_v57 = vsel %vm801_vm11, %v2635_v10, %v2598_v42  ;;  %v8077_v10 = vld [vmem:[#allocation12_spill] sm:$0xff] }
 0x35e   : > { %v6676_v47 = vpop.permute.xlu1 %1677  ;;  %v6678_v25 = vpop.permute.xlu0 %1667 }
 0x35f   : > { %8067 = vst [vmem:[#allocation70_spill] sm:$0xff] %v6676_v47  ;;  %8068 = vst [vmem:[#allocation71_spill] sm:$0xff] %v6678_v25  ;;  %v2620_v25 = vsel %vm798_vm10, %v2618_v23, %v2558_v26 }
 0x360   : > { %v2622_v60 = vsel %vm801_vm11, %v2620_v25, %v2563_v13  ;;  %v2191_v25 = vsel %vm791_vm8, %v6057_v34, %v6396_v38 }
 0x361   : > { %v2624_v48 = vsel %vm804_vm12, %v2622_v60, %v2568_v46  ;;  %v2176_v46 = vsel %vm791_vm8, %v6051_v30, %v6342_v36  ;;  %v8076_v60 = vld [vmem:[#allocation9_spill] sm:$0xff] }
 0x362   : > { %v6680_v22 = vpop.permute.xlu1 %2382  ;;  %v6682_v1 = vpop.permute.xlu0 %1882  ;;  %v1259_v45 = vsel %vm791_vm8, %v8076_v60, %v6585_v41  ;;  %v8081_v41 = vld [vmem:[#allocation21_spill] sm:$0xff]  ;;  %v8101_v60 = vld [vmem:[#allocation40_spill] sm:$0xff] }
 0x363   : > { %8069 = vst [vmem:[#allocation72_spill] sm:$0xff] %v6680_v22  ;;  %v794_v22 = vsel %vm791_vm8, %v5967_v29, %v6214_v2  ;;  %v815_v29 = vsel %vm791_vm8, %v5998_v51, %v6253_v44  ;;  %v1516_v44 = vsel %vm791_vm8, %v6093_v3, %v6448_v17  ;;  %v2193_v3 = vsel %vm795_vm9, %v2191_v25, %v6340_v24 }
 0x364   : > { %v797_v26 = vsel %vm795_vm9, %v794_v22, %v6206_v15  ;;  %v2626_v15 = vsel %vm807_vm13, %v2624_v48, %v2573_v37  ;;  %v817_v34 = vsel %vm795_vm9, %v815_v29, %v6233_v20  ;;  %v2195_v20 = vsel %vm798_vm10, %v2193_v3, %v6408_v32  ;;  %v8079_v29 = vld [vmem:[#allocation17_spill] sm:$0xff] }
 0x365   : > { %v800_v51 = vsel %vm798_vm10, %v797_v26, %v6223_v14  ;;  %v2628_v22 = vsel %vm810_vm14, %v2626_v15, %v2578_v4  ;;  %v2178_v14 = vsel %vm795_vm9, %v2176_v46, %v6326_v12  ;;  %v1505_v17 = vsel %vm798_vm10, %v1503_v0, %v6462_v8  ;;  %v8074_v4 = vld [vmem:[#allocation23_spill] sm:$0xff]  ;;  %v8087_v3 = vld [vmem:[#allocation33_spill] sm:$0xff] }
 0x366   : > { %v6689_v53 = vpop.permute.xlu1 %1687  ;;  %v2603_v47 = vpop.permute.xlu0 %2602  ;;  %v803_v30 = vsel %vm801_vm11, %v800_v51, %v6244_v33  ;;  %v2719_v12 = vsel %vm2672_vm15, %v2628_v22, 0  ;;  %v819_v24 = vsel %vm798_vm10, %v817_v34, %v6265_v62  ;;  %v1024_v62 = vsel %vm791_vm8, %v6138_v5, %v6532_v40  ;;  %v8073_v40 = vld [vmem:[#allocation26_spill] sm:$0xff]  ;;  %v8082_v15 = vld [vmem:[#allocation19_spill] sm:$0xff]  ;;  %v8085_v34 = vld [vmem:[#allocation29_spill] sm:$0xff] }
 0x367   : > { %8070 = vst [vmem:[#allocation73_spill] sm:$0xff] %v6689_v53  ;;  %v2639_v2 = vsel %vm804_vm12, %v2637_v57, %v2603_v47  ;;  %v1518_v47 = vsel %vm795_vm9, %v1516_v44, %v6398_v31  ;;  %v806_v54 = vsel %vm804_vm12, %v803_v30, %v6283_v18  ;;  %v821_v31 = vsel %vm801_vm11, %v819_v24, %v6297_v35  ;;  %v8078_v57 = vld [vmem:[#allocation13_spill] sm:$0xff]  ;;  %v8083_v44 = vld [vmem:[#allocation8_spill] sm:$0xff]  ;;  %v8091_v24 = vld [vmem:[#allocation43_spill] sm:$0xff] }
 0x368   : > { %v2641_v38 = vsel %vm807_vm13, %v2639_v2, %v2608_v21  ;;  %v2180_v21 = vsel %vm798_vm10, %v2178_v14, %v6349_v61  ;;  %v1520_v32 = vsel %vm798_vm10, %v1518_v47, %v6491_v9  ;;  %v823_v61 = vsel %vm804_vm12, %v821_v31, %v6315_v52  ;;  %v8084_v30 = vld [vmem:[#allocation25_spill] sm:$0xff]  ;;  %v8093_v31 = vld [vmem:[#allocation36_spill] sm:$0xff] }
 0x369   : > { %v2182_v8 = vsel %vm801_vm11, %v2180_v21, %v6366_v58  ;;  %v2197_v42 = vsel %vm801_vm11, %v2195_v20, %v6368_v7  ;;  %v1507_v35 = vsel %vm801_vm11, %v1505_v17, %v6410_v39  ;;  %v8071_v58 = vld [vmem:[#allocation10_spill] sm:$0xff]  ;;  %v1522_v52 = vsel %vm801_vm11, %v1520_v32, %v8074_v4  ;;  %v8075_v7 = vld [vmem:[#allocation7_spill] sm:$0xff] }
 0x36a   : > { %v6700_v6 = vpop.permute.xlu1 %1702  ;;  %v6702_v53 = vpop.permute.xlu0 %1897  ;;  %v2184_v9 = vsel %vm804_vm12, %v2182_v8, %v6385_v59  ;;  %v809_v27 = vsel %vm807_vm13, %v806_v54, %v8071_v58  ;;  %v2199_v5 = vsel %vm804_vm12, %v2197_v42, %v8072_v56  ;;  %v1509_v23 = vsel %vm804_vm12, %v1507_v35, %v8073_v40  ;;  %v8089_v17 = vld [vmem:[#allocation35_spill] sm:$0xff]  ;;  %v8092_v21 = vld [vmem:[#allocation22_spill] sm:$0xff] }
 0x36b   : > { %v1524_v59 = vsel %vm804_vm12, %v1522_v52, %v6516_v28  ;;  %v1244_v37 = vsel %vm791_vm8, %v8075_v7, %v6543_v63  ;;  %v1026_v39 = vsel %vm795_vm9, %v1024_v62, %v6518_v55  ;;  %v6793_v48 = vsel %vm810_vm14, %v809_v27, %v8077_v10  ;;  %v8080_v55 = vld [vmem:[#allocation14_spill] sm:$0xff]  ;;  %v8094_v62 = vld [vmem:[#allocation32_spill] sm:$0xff] }
 0x36c   : > { %v825_v26 = vsel %vm807_vm13, %v823_v61, %v8078_v57  ;;  %v2186_v28 = vsel %vm807_vm13, %v2184_v9, %v8079_v29  ;;  %v1028_v63 = vsel %vm798_vm10, %v1026_v39, %v6558_v16  ;;  %v2201_v51 = vsel %vm807_vm13, %v2199_v5, %v8082_v15  ;;  %v8095_v9 = vld [vmem:[#allocation42_spill] sm:$0xff]  ;;  %v8097_v5 = vld [vmem:[#allocation39_spill] sm:$0xff]  ;;  %v8102_v10 = vld [vmem:[#allocation16_spill] sm:$0xff] }
 0x36d   : > { %v6803_v25 = vsel %vm810_vm14, %v825_v26, %v8080_v55  ;;  %v6807_v11 = vsel %vm810_vm14, %v2186_v28, %v8081_v41  ;;  %v1039_v22 = vsel %vm791_vm8, %v8083_v44, %v6576_v50  ;;  %v1511_v16 = vsel %vm807_vm13, %v1509_v23, %v8084_v30  ;;  %v8090_v50 = vld [vmem:[#allocation34_spill] sm:$0xff]  ;;  %v8098_v23 = vld [vmem:[#allocation47_spill] sm:$0xff]  ;;  %v8103_v26 = vld [vmem:[#allocation37_spill] sm:$0xff] }
 0x36e   : > { %v6730_v36 = vpop.permute.xlu1 %1917  ;;  %v2613_v43 = vpop.permute.xlu0 %2612  ;;  %v1261_v0 = vsel %vm795_vm9, %v1259_v45, %v8087_v3  ;;  %v6834_v32 = vsel %vm810_vm14, %v2201_v51, %v8092_v21  ;;  %v1041_v61 = vsel %vm795_vm9, %v1039_v22, %v8094_v62  ;;  %v8096_v27 = vld [vmem:[#allocation30_spill] sm:$0xff]  ;;  %v1721_v57 = vsel %vm791_vm8, %v8102_v10, %v6666_v19  ;;  %v8105_v55 = vld [vmem:[#allocation51_spill] sm:$0xff] }
 0x36f   : > { %v2643_v33 = vsel %vm810_vm14, %v2641_v38, %v2613_v43  ;;  %v1526_v43 = vsel %vm807_vm13, %v1524_v59, %v8085_v34  ;;  %v8086_v38 = vld [vmem:[#allocation31_spill] sm:$0xff]  ;;  %v1263_v54 = vsel %vm798_vm10, %v1261_v0, %v8091_v24  ;;  %v1043_v40 = vsel %vm798_vm10, %v1041_v61, %v8097_v5  ;;  %v8099_v52 = vld [vmem:[#allocation18_spill] sm:$0xff] }
 0x370   : > { %5408 = vmatprep.subr.msk.bf16.mxu1 %vm2672_vm15, %v2643_v33  ;;  %v1246_v14 = vsel %vm795_vm9, %v1244_v37, %v8086_v38  ;;  %v8088_v33 = vld [vmem:[#allocation28_spill] sm:$0xff]  ;;  %v6846_v56 = vsel %vm810_vm14, %v1526_v43, %v8096_v27  ;;  %v1941_v59 = vsel %vm791_vm8, %v8099_v52, %v6668_v49  ;;  %v8100_v37 = vld [vmem:[#allocation41_spill] sm:$0xff]  ;;  %v1265_v45 = vsel %vm801_vm11, %v1263_v54, %v8101_v60  ;;  %v8104_v28 = vld [vmem:[#allocation50_spill] sm:$0xff] }
 0x371   : > { %2736 = vmatpush1.bf16.msra.mxu1 %v2719_v12  ;;  %v6824_v20 = vsel %vm810_vm14, %v1511_v16, %v8088_v33  ;;  %v1248_v47 = vsel %vm798_vm10, %v1246_v14, %v8089_v17  ;;  %v1030_v12 = vsel %vm801_vm11, %v1028_v63, %v8090_v50  ;;  %v1045_v39 = vsel %vm801_vm11, %v1043_v40, %v8100_v37  ;;  %v8106_v41 = vld [vmem:[#allocation27_spill] sm:$0xff]  ;;  %v8107_v44 = vld [vmem:[#allocation46_spill] sm:$0xff]  ;;  %v8109_v16 = vld [vmem:[#allocation60_spill] sm:$0xff] }
 0x372   : > { %v6763_v13 = vpop.permute.xlu1 %1922  ;;  %v1908_v18 = vpop.permute.xlu0 %1907  ;;  %v1250_v8 = vsel %vm801_vm11, %v1248_v47, %v8093_v31  ;;  %v1032_v42 = vsel %vm804_vm12, %v1030_v12, %v8095_v9  ;;  %v2654_v7 = vrot.slane %v6824_v20, 5  ;;  %v1267_v63 = vsel %vm804_vm12, %v1265_v45, %v8104_v28  ;;  %v8108_v30 = vld [vmem:[#allocation38_spill] sm:$0xff]  ;;  %v8110_v14 = vld [vmem:[#allocation48_spill] sm:$0xff]  ;;  %v8112_v17 = vld [vmem:[#allocation73_spill] sm:$0xff] }
 0x373   : > { %v1252_v4 = vsel %vm804_vm12, %v1250_v8, %v8098_v23  ;;  %v1034_v29 = vsel %vm807_vm13, %v1032_v42, %v8103_v26  ;;  %v1047_v49 = vsel %vm804_vm12, %v1045_v39, %v8105_v55  ;;  %v1956_v15 = vsel %vm791_vm8, %v8106_v41, %v1908_v18  ;;  %v8111_v0 = vld [vmem:[#allocation58_spill] sm:$0xff]  ;;  %v8113_v47 = vld [vmem:[#allocation24_spill] sm:$0xff]  ;;  %v8114_v12 = vld [vmem:[#allocation45_spill] sm:$0xff] }
 0x374   : > { %v2655_v51 = vrot.slane %v6846_v56, 5  ;;  %v1036_v22 = vsel %vm810_vm14, %v1034_v29, %v8107_v44  ;;  %v1254_v19 = vsel %vm807_vm13, %v1252_v4, %v8108_v30  ;;  %v1943_v34 = vsel %vm795_vm9, %v1941_v59, %v8109_v16  ;;  %v8115_v54 = vld [vmem:[#allocation44_spill] sm:$0xff]  ;;  %v8116_v31 = vld [vmem:[#allocation69_spill] sm:$0xff]  ;;  %v8117_v62 = vld [vmem:[#allocation67_spill] sm:$0xff] }
 0x375   : > { %v1256_v3 = vsel %vm810_vm14, %v1254_v19, %v8110_v14  ;;  %v1723_v33 = vsel %vm795_vm9, %v1721_v57, %v8111_v0  ;;  %v1945_v18 = vsel %vm798_vm10, %v1943_v34, %v6682_v1  ;;  %v1736_v50 = vsel %vm791_vm8, %v8113_v47, %v8112_v17  ;;  %v8118_v9 = vld [vmem:[#allocation52_spill] sm:$0xff]  ;;  %v8119_v1 = vld [vmem:[#allocation54_spill] sm:$0xff]  ;;  %v8120_v27 = vld [vmem:[#allocation11_spill] sm:$0xff] }
 0x376   : > { %v1673_v2 = vpop.permute.xlu1 %1672  ;;  %v1698_v46 = vpop.permute.xlu0 %1697  ;;  %v1049_v24 = vsel %vm807_vm13, %v1047_v49, %v8114_v12  ;;  %v1269_v21 = vsel %vm807_vm13, %v1267_v63, %v8115_v54  ;;  %v1725_v8 = vsel %vm798_vm10, %v1723_v33, %v8116_v31  ;;  %v1958_v61 = vsel %vm795_vm9, %v1956_v15, %v8117_v62  ;;  %v8121_v40 = vld [vmem:[#allocation61_spill] sm:$0xff]  ;;  %v8122_v23 = vld [vmem:[#allocation15_spill] sm:$0xff]  ;;  %v8125_v45 = vld [vmem:[#allocation66_spill] sm:$0xff] }
 0x377   : > { %v1051_v42 = vsel %vm810_vm14, %v1049_v24, %v8118_v9  ;;  %v2396_v5 = vsel %vm791_vm8, %v8120_v27, %v8119_v1  ;;  %v2411_v4 = vsel %vm791_vm8, %v8122_v23, %v8121_v40  ;;  %v8123_v52 = vld [vmem:[#allocation71_spill] sm:$0xff]  ;;  %v8124_v37 = vld [vmem:[#allocation53_spill] sm:$0xff]  ;;  %v1738_v10 = vsel %vm795_vm9, %v1736_v50, %v8125_v45  ;;  %v8126_v57 = vld [vmem:[#allocation68_spill] sm:$0xff] }
 0x378   : > { %v1727_v59 = vsel %vm801_vm11, %v1725_v8, %v8123_v52  ;;  %v1271_v39 = vsel %vm810_vm14, %v1269_v21, %v8124_v37  ;;  %v1947_v26 = vsel %vm801_vm11, %v1945_v18, %v8126_v57  ;;  %v2646_v63 = vrot.slane %v1036_v22, 7  ;;  %v8127_v30 = vld [vmem:[#allocation49_spill] sm:$0xff]  ;;  %v8128_v19 = vld [vmem:[#allocation55_spill] sm:$0xff]  ;;  %v8130_v22 = vld [vmem:[#allocation62_spill] sm:$0xff] }
 0x379   : > { %v1729_v60 = vsel %vm804_vm12, %v1727_v59, %v1673_v2  ;;  %v1740_v55 = vsel %vm798_vm10, %v1738_v10, %v1698_v46  ;;  %v1960_v41 = vsel %vm798_vm10, %v1958_v61, %v6730_v36  ;;  %v2650_v15 = vrot.slane %v1256_v3, 6  ;;  %v8129_v14 = vld [vmem:[#allocation57_spill] sm:$0xff]  ;;  %v8131_v33 = vld [vmem:[#allocation70_spill] sm:$0xff]  ;;  %v8132_v12 = vld [vmem:[#allocation64_spill] sm:$0xff] }
 0x37a   : > { %v1893_v35 = vpop.permute.xlu1 %1892  ;;  %v6842_v58 = vpop.permute.xlu0 %1712  ;;  %v2647_v44 = vrot.slane %v1051_v42, 7  ;;  %v2398_v2 = vsel %vm795_vm9, %v2396_v5, %v8127_v30  ;;  %v2413_v16 = vsel %vm795_vm9, %v2411_v4, %v8128_v19  ;;  %v2651_v34 = vrot.slane %v1271_v39, 6  ;;  %v8133_v31 = vld [vmem:[#allocation72_spill] sm:$0xff]  ;;  %v8135_v23 = vld [vmem:[#allocation63_spill] sm:$0xff]  ;;  %v8136_v4 = vld [vmem:[#allocation65_spill] sm:$0xff] }
 0x37b   : > { %v1949_v49 = vsel %vm804_vm12, %v1947_v26, %v1893_v35  ;;  %v2400_v0 = vsel %vm798_vm10, %v2398_v2, %v8129_v14  ;;  %v2415_v46 = vsel %vm798_vm10, %v2413_v16, %v8130_v22  ;;  %v1731_v35 = vsel %vm807_vm13, %v1729_v60, %v8131_v33  ;;  %v8134_v42 = vld [vmem:[#allocation56_spill] sm:$0xff]  ;;  %v2767_v22 = vld [vmem:[#allocation3] sm:$0x3] }
 0x37c   : > { %v1742_v3 = vsel %vm801_vm11, %v1740_v55, %v6700_v6  ;;  %v1951_v18 = vsel %vm807_vm13, %v1949_v49, %v6702_v53  ;;  %v1962_v47 = vsel %vm801_vm11, %v1960_v41, %v6763_v13  ;;  %v2417_v24 = vsel %vm801_vm11, %v2415_v46, %v8132_v12  ;;  %v2770_v46 = vld [vmem:[#allocation3 + $0xc] sm:$0x3] }
 0x37d   : > { %v2674_v6 = vsel %vm2672_vm15, %v6793_v48, %v2646_v63  ;;  %v2676_v53 = vsel %vm2672_vm15, %v6803_v25, %v2647_v44  ;;  %v2419_v8 = vsel %vm804_vm12, %v2417_v24, %v8133_v31  ;;  %v2402_v1 = vsel %vm801_vm11, %v2400_v0, %v8134_v42  ;;  %v8139_v31 = vld [vmem:[#allocation5_spill] sm:$0xff] }
 0x37e   : > { %v1683_v43 = vpop.permute.xlu1 %1682  ;;  %v1933_v38 = vpop.permute.xlu0 %1932  ;;  %v2678_v62 = vsel %vm295_vm0, %v2674_v6, %v2650_v15  ;;  %v2680_v61 = vsel %vm295_vm0, %v2676_v53, %v2651_v34  ;;  %v2421_v52 = vsel %vm807_vm13, %v2419_v8, %v8136_v4  ;;  %v2667_v37 = vrot.slane %v6834_v32, 2  ;;  %v8140_v4 = vld [vmem:[#allocation6_spill] sm:$0xff] }
 0x37f   : > { %v1733_v36 = vsel %vm810_vm14, %v1731_v35, %v1683_v43  ;;  %v2683_v39 = vsel %vm7994_vm2, %v2678_v62, %v2654_v7  ;;  %v2685_v57 = vsel %vm7994_vm2, %v2680_v61, %v2655_v51  ;;  %v2666_v7 = vrot.slane %v6807_v11, 2  ;;  %v2708_v11 = vld [vmem:[%s7967_s3] sm:$0x1] }
 0x380   : > { %v2658_v9 = vrot.slane %v1733_v36, 4  ;;  %v8138_v36 = vmov 0  }
 0x382   : > { %v1708_v29 = vpop.permute.xlu1 %1707  ;;  %v1903_v28 = vpop.permute.xlu0 %1902 }
 0x383   : > { %v1744_v54 = vsel %vm804_vm12, %v1742_v3, %v1708_v29  ;;  %v1953_v21 = vsel %vm810_vm14, %v1951_v18, %v1903_v28  ;;  %v8137_v29 = vld [vmem:[#allocation59_spill] sm:$0xff] }
 0x384   : > { %v2662_v27 = vrot.slane %v1953_v21, 3  ;;  %v1746_v25 = vsel %vm807_vm13, %v1744_v54, %v6842_v58  ;;  %v2688_v58 = vsel %vm7993_vm1, %v2683_v39, %v2658_v9 }
 0x386   : > { %v1938_v17 = vpop.permute.xlu1 %1937  ;;  %v1928_v50 = vpop.permute.xlu0 %1927  ;;  %v2693_v20 = vsel %vm7992_vm3, %v2688_v58, %v2662_v27 }
 0x387   : > { %v1964_v43 = vsel %vm804_vm12, %v1962_v47, %v1928_v50  ;;  %v2698_v15 = vsel %vm7991_vm4, %v2693_v20, %v2666_v7 }
 0x388   : > { %v1966_v13 = vsel %vm807_vm13, %v1964_v43, %v1933_v38  ;;  %v2404_v38 = vsel %vm804_vm12, %v2402_v1, %v8135_v23 }
 0x389   : > { %v1968_v48 = vsel %vm810_vm14, %v1966_v13, %v1938_v17  ;;  %v2406_v32 = vsel %vm807_vm13, %v2404_v38, %v8137_v29 }
 0x38a   : > { %v2393_v5 = vpop.permute.xlu1 %2392  ;;  %v1718_v40 = vpop.permute.xlu0 %1717  ;;  %v2663_v10 = vrot.slane %v1968_v48, 3 }
 0x38b   : > { %v1748_v59 = vsel %vm810_vm14, %v1746_v25, %v1718_v40  ;;  %v2423_v60 = vsel %vm810_vm14, %v2421_v52, %v2393_v5 }
 0x38c   : > { %v2659_v45 = vrot.slane %v1748_v59, 4  ;;  %v2671_v63 = vrot.slane %v2423_v60, 1 }
 0x38e   : > { %v2690_v26 = vsel %vm7993_vm1, %v2685_v57, %v2659_v45  ;;  %v2358_v28 = vpop.permute.xlu0 %2357  ;;  %vm2782_vm1 = vsmask.f32 7942 }
 0x38f   : > { %v2408_v55 = vsel %vm810_vm14, %v2406_v32, %v2358_v28  ;;  %v2695_v49 = vsel %vm7992_vm3, %v2690_v26, %v2663_v10  ;;  %vm2776_vm3 = vcmask 18432  }
 0x390   : > { %v2670_v56 = vrot.slane %v2408_v55, 1  ;;  %v2700_v51 = vsel %vm7991_vm4, %v2695_v49, %v2667_v37  ;;  %vm2773_vm4 = vcmask 19456   ;;  %2777 = vst.msk [vmem:[#allocation3 + $0x8] sm:$0x7] %vm2776_vm3, %v8138_v36  ;;  %2780 = vst.msk [vmem:[#allocation3 + $0x14] sm:$0x7] %vm2776_vm3, %v8138_v36 }
 0x391   : > { %v2706_v41 = vsel %vm7990_vm5, %v2700_v51, %v2671_v63  ;;  %2775 = vst.msk [vmem:[#allocation3 + $0x4] sm:$0xf] %vm2773_vm4, %v8138_v36  ;;  %2779 = vst.msk [vmem:[#allocation3 + $0x10] sm:$0xf] %vm2773_vm4, %v8138_v36  ;;  %vm2954_vm3 = vsmask.f32 5392 }
 0x392   : > { %2737 = vmatprep.subr.bf16.mxu1 %v2706_v41  ;;  %v2703_v44 = vsel %vm7990_vm5, %v2698_v15, %v2670_v56 }
 0x393   : > { %2738 = vmatpush1.bf16.msra.mxu1 %v2703_v44 }
 0x396   : > { %5409 = vmatmul.mubr.msk.bf16.vlgmr.msra.gmra.mxu1 %vm7989_vm6, %v2708_v11  ;;  %vm2765_vm6 = vsmask.f32 1280 }
 0x397   : > { %v2713_v30 = vpop.permute.xlu1 %2712  ;;  %vm2766_vm5 = vmand %vm2764_vm7, %vm2765_vm6  ;;  %vm2790_vm7 = vcmask 175256   ;;  %v2784_v3 = vld [vmem:[#allocation3 + $0x8] sm:$0x6]  ;;  %v2787_v18 = vld [vmem:[#allocation3 + $0x14] sm:$0x6] }
 0x398   : > { %v2768_v33 = vsel %vm2766_vm5, 0, %v2767_v22  ;;  %v2771_v35 = vsel %vm2766_vm5, 0, %v2770_v46  ;;  %2792 = vst.msk [vmem:[#allocation3 + $0x4] sm:$0xf] %vm2790_vm7, %v8138_v36  ;;  %2796 = vst.msk [vmem:[#allocation3 + $0x10] sm:$0xf] %vm2790_vm7, %v8138_v36 }
 0x399   : > { %2769 = vst [vmem:[#allocation3] sm:$0x3] %v2768_v33  ;;  %2772 = vst [vmem:[#allocation3 + $0xc] sm:$0x3] %v2771_v35  ;;  %vm2781_vm5 = vcmask 174081  }
 0x39a   : > { %2774 = vst.msk [vmem:[#allocation3] sm:$0xf] %vm2773_vm4, %v8138_v36  ;;  %2778 = vst.msk [vmem:[#allocation3 + $0xc] sm:$0xf] %vm2773_vm4, %v8138_v36 }
 0x39b   : > { %2791 = vst.msk [vmem:[#allocation3] sm:$0xf] %vm2790_vm7, %v8138_v36  ;;  %2795 = vst.msk [vmem:[#allocation3 + $0xc] sm:$0xf] %vm2790_vm7, %v8138_v36  ;;  %vm3012_vm7 = vcmask 150553  }
 0x39c   : > { %vm2783_vm2 = vmand %vm2781_vm5, %vm2782_vm1 }
 0x39d   : > { %v2785_v17 = vsel %vm2783_vm2, 0, %v2784_v3  ;;  %v2788_v47 = vsel %vm2783_vm2, 0, %v2787_v18  ;;  %vm2793_vm2 = vcmask 174232   ;;  %vm2955_vm4 = vmor %vm2765_vm6, %vm2954_vm3  ;;  %vm3017_vm3 = vcmask 150552  }
 0x39e   : > { %2786 = vst [vmem:[#allocation3 + $0x8] sm:$0x6] %v2785_v17  ;;  %2789 = vst [vmem:[#allocation3 + $0x14] sm:$0x6] %v2788_v47 }
 0x39f   : > { %2794 = vst.msk [vmem:[#allocation3 + $0x8] sm:$0x7] %vm2793_vm2, %v8138_v36  ;;  %2797 = vst.msk [vmem:[#allocation3 + $0x14] sm:$0x7] %vm2793_vm2, %v8138_v36  ;;  %vm3019_vm2 = vcmask 148504  }
 0x3a0   : > { %vm3013_vm5 = vmand %vm3012_vm7, %vm2782_vm1  ;;  %vm4411_vm1 = vcmask 1044484   ;;  %vm3695_vm7 = vsmask.f32 2304 }
 0x456   : > { %v2757_v2 = vpop.f32.mrf.mxu1 }
 0x457   : > { %v6981_v19 = vadd.f32 %v2757_v2, %v2713_v30 }
 0x458   : > { %v2759_v16 = vpop.f32.mrf.mxu1 }
 0x459   : > { %2802 = vrot.lane.b32.xlu1 %v6981_v19, %s5738_s11  ;;  %2799 = vrot.lane.b32.xlu0 %v6981_v19, %s5739_s12  ;;  %v6995_v0 = vadd.f32 %v2759_v16, %v2713_v30 }
 0x45a   : > { %v2761_v34 = vpop.f32.mrf.mxu1 }
 0x45c   : > { %v2762_v14 = vpop.f32.mrf.mxu1 }
 0x45d   : > { %2808 = vrot.lane.b32.xlu1 %v6981_v19, %s5741_s14  ;;  %2805 = vrot.lane.b32.xlu0 %v6981_v19, %s5740_s13 }
 0x461   : > { %2814 = vrot.lane.b32.xlu1 %v6981_v19, %s5743_s16  ;;  %2811 = vrot.lane.b32.xlu0 %v6981_v19, %s5742_s15 }
 0x465   : > { %2821 = vrot.lane.b32.xlu1 %v6995_v0, %s5739_s12  ;;  %2817 = vrot.lane.b32.xlu0 %v6981_v19, %s5744_s17 }
 0x469   : > { %2827 = vrot.lane.b32.xlu1 %v6995_v0, %s5740_s13  ;;  %2824 = vrot.lane.b32.xlu0 %v6995_v0, %s5738_s11 }
 0x46d   : > { %2833 = vrot.lane.b32.xlu1 %v6995_v0, %s5742_s15  ;;  %2830 = vrot.lane.b32.xlu0 %v6995_v0, %s5741_s14 }
 0x471   : > { %2839 = vrot.lane.b32.xlu1 %v6995_v0, %s5744_s17  ;;  %2836 = vrot.lane.b32.xlu0 %v6995_v0, %s5743_s16 }
 0x4cb   : > { %v2803_v50 = vpop.permute.xlu1 %2802  ;;  %v2800_v12 = vpop.permute.xlu0 %2799 }
 0x4cc   : > { %v2842_v53 = vcombine.low %v6981_v19, %v2803_v50 }
 0x4ce   : > { %v2849_v9 = vrot.slane %v2842_v53, %v8139_v31 }
 0x4cf   : > { %v2809_v24 = vpop.permute.xlu1 %2808  ;;  %v2806_v54 = vpop.permute.xlu0 %2805 }
 0x4d0   : > { %v2850_v21 = vcombine.low %v2800_v12, %v2806_v54 }
 0x4d2   : > { %v2857_v8 = vrot.slane %v2850_v21, %v8139_v31 }
 0x4d3   : > { %v2815_v43 = vpop.permute.xlu1 %2814  ;;  %v2812_v6 = vpop.permute.xlu0 %2811 }
 0x4d4   : > { %v2858_v13 = vcombine.low %v2809_v24, %v2815_v43  ;;  %v2874_v1 = vcombine.low %v2849_v9, %v2857_v8 }
 0x4d6   : > { %v2865_v27 = vrot.slane %v2858_v13, %v8139_v31  ;;  %v2881_v52 = vrot.slane %v2874_v1, %v8140_v4  ;;  %v3024_v1 = vld [vmem:[#allocation3 + $0xc] sm:$0xe] }
 0x4d7   : > { %v2822_v62 = vpop.permute.xlu1 %2821  ;;  %v2818_v61 = vpop.permute.xlu0 %2817 }
 0x4d8   : > { %v2866_v42 = vcombine.low %v2812_v6, %v2818_v61  ;;  %v3014_v61 = vld [vmem:[#allocation3] sm:$0xe] }
 0x4da   : > { %v2873_v48 = vrot.slane %v2866_v42, %v8139_v31 }
 0x4db   : > { %v2828_v5 = vpop.permute.xlu1 %2827  ;;  %v2825_v25 = vpop.permute.xlu0 %2824 }
 0x4dc   : > { %v2882_v40 = vcombine.low %v2865_v27, %v2873_v48  ;;  %v2900_v23 = vcombine.low %v2822_v62, %v2828_v5  ;;  %v2892_v38 = vcombine.low %v6995_v0, %v2825_v25 }
 0x4de   : > { %v2889_v59 = vrot.slane %v2882_v40, %v8140_v4  ;;  %v2907_v58 = vrot.slane %v2900_v23, %v8139_v31  ;;  %v2899_v10 = vrot.slane %v2892_v38, %v8139_v31  ;;  %v3021_v40 = vld [vmem:[#allocation3 + $0x8] sm:$0x3] }
 0x4df   : > { %v2834_v37 = vpop.permute.xlu1 %2833  ;;  %v2831_v39 = vpop.permute.xlu0 %2830 }
 0x4e0   : > { %v2890_v60 = vcombine.low %v2881_v52, %v2889_v59  ;;  %v2891_v45 = vcombine.high %v2881_v52, %v2889_v59  ;;  %v2924_v55 = vcombine.low %v2899_v10, %v2907_v58 }
 0x4e2   : > { %v5625_v57 = vpack.c.bf16 %v2890_v60, %v2890_v60  ;;  %v5627_v26 = vpack.c.bf16 %v2891_v45, %v2891_v45  ;;  %v2931_v16 = vrot.slane %v2924_v55, %v8140_v4 }
 0x4e3   : > { %v2840_v29 = vpop.permute.xlu1 %2839  ;;  %v2837_v32 = vpop.permute.xlu0 %2836 }
 0x4e4   : > { %v2916_v28 = vcombine.low %v2834_v37, %v2840_v29  ;;  %v2908_v20 = vcombine.low %v2831_v39, %v2837_v32  ;;  %v2957_v7 = vshrl.u32 %v5625_v57, 16  ;;  %v2960_v63 = vshll.u32 %v5625_v57, 16  ;;  %v3028_v39 = vld [vmem:[#allocation3 + $0x14] sm:$0x3] }
 0x4e5   : > { %v2976_v49 = vshrl.u32 %v5627_v26, 16  ;;  %v2979_v56 = vshll.u32 %v5627_v26, 16 }
 0x4e6   : > { %v2923_v51 = vrot.slane %v2916_v28, %v8139_v31  ;;  %v2915_v41 = vrot.slane %v2908_v20, %v8139_v31  ;;  %v2959_v15 = vrot.slane %v2957_v7, 6  ;;  %v2962_v44 = vrot.slane %v2960_v63, 7 }
 0x4e7   : > { %v2978_v2 = vrot.slane %v2976_v49, 6  ;;  %v2981_v19 = vrot.slane %v2979_v56, 7 }
 0x4e8   : > { %v2932_v11 = vcombine.low %v2915_v41, %v2923_v51  ;;  %v2963_v30 = vor.u32 %v2962_v44, %v2959_v15 }
 0x4e9   : > { %v2982_v22 = vor.u32 %v2981_v19, %v2978_v2 }
 0x4ea   : > { %v2939_v34 = vrot.slane %v2932_v11, %v8140_v4  ;;  %2994 = vrot.lane.b32.xlu0 %v2963_v30, %s5750_s27  ;;  %v2964_v54 = vrot.slane %v2963_v30, 4 }
 0x4eb   : > { %v2983_v8 = vrot.slane %v2982_v22, 4 }
 0x4ec   : > { %v2940_v14 = vcombine.low %v2931_v16, %v2939_v34  ;;  %v2941_v0 = vcombine.high %v2931_v16, %v2939_v34 }
 0x4ee   : > { %v5626_v46 = vpack.c.bf16 %v2940_v14, %v2940_v14  ;;  %v5628_v33 = vpack.c.bf16 %v2941_v0, %v2941_v0  ;;  %3000 = vrot.lane.b32.xlu0 %v2982_v22, %s5750_s27 }
 0x4f0   : > { %v2966_v35 = vshrl.u32 %v5626_v46, 16  ;;  %v2969_v3 = vshll.u32 %v5626_v46, 16  ;;  %v2985_v18 = vshrl.u32 %v5628_v33, 16  ;;  %v2988_v17 = vshll.u32 %v5628_v33, 16 }
 0x4f2   : > { %v2968_v47 = vrot.slane %v2966_v35, 6  ;;  %v2971_v50 = vrot.slane %v2969_v3, 7  ;;  %v2987_v12 = vrot.slane %v2985_v18, 6  ;;  %v2990_v24 = vrot.slane %v2988_v17, 7 }
 0x4f4   : > { %v2972_v21 = vor.u32 %v2971_v50, %v2968_v47  ;;  %v2991_v53 = vor.u32 %v2990_v24, %v2987_v12 }
 0x4f6   : > { %v2973_v43 = vsel %vm2955_vm4, %v2964_v54, %v2972_v21  ;;  %v2974_v6 = vrot.slane %v2972_v21, 4  ;;  %v2992_v13 = vsel %vm2955_vm4, %v2983_v8, %v2991_v53  ;;  %v2993_v62 = vrot.slane %v2991_v53, 4  ;;  %vm7054_vm4 = vmand %vm3019_vm2, %vm2765_vm6 }
 0x4f7   : > { %2996 = vrot.lane.b32.xlu1 %v2973_v43, %s5750_s27  ;;  %vm7082_vm6 = vmor %vm2672_vm15, %vm4411_vm1  ;;  %vm8185_vm1 = vcmask 146432  }
 0x4f8   : > { %2998 = vrot.lane.b32.xlu0 %v2974_v6, %s5750_s27 }
 0x4fb   : > { %3002 = vrot.lane.b32.xlu1 %v2992_v13, %s5750_s27 }
 0x4ff   : > { %3004 = vrot.lane.b32.xlu1 %v2993_v62, %s5750_s27 }
 0x55c   : > { %v2995_v9 = vpop.permute.xlu0 %2994 }
 0x55d   : > { %v3015_v42 = vsel %vm3013_vm5, %v2995_v9, %v3014_v61 }
 0x55e   : > { %3016 = vst [vmem:[#allocation3] sm:$0xe] %v3015_v42 }
 0x560   : > { %v3001_v27 = vpop.permute.xlu0 %3000 }
 0x561   : > { %v3025_v48 = vsel %vm3013_vm5, %v3001_v27, %v3024_v1  ;;  %vm3696_vm5 = vsmask.f32 6416 }
 0x562   : > { %3026 = vst [vmem:[#allocation3 + $0xc] sm:$0xe] %v3025_v48  ;;  %vm7130_vm2 = vmor %vm3695_vm7, %vm3696_vm5 }
 0x565   : > { %v7049_v5 = vld [vmem:[#allocation3] sm:$0xf] }
 0x566   : > { %3251 = vrot.lane.b32.xlu0 %v7049_v5, %s5751_s28  ;;  %v4402_v10 = vld [vmem:[#allocation3] sm:$0x8]  ;;  %v3038_v3 = vshrl.u32 %v7049_v5, 16 }
 0x567   : > { %v5498_v32 = vrot.slane %v4402_v10, 11  ;;  %v3691_v20 = vld [vmem:[#allocation3] sm:$0xe] }
 0x568   : > { %v3699_v56 = vshrl.u32 %v3691_v20, 16  ;;  %v3702_v51 = vshll.u32 %v3691_v20, 16 }
 0x569   : > { %v2997_v23 = vpop.permute.xlu1 %2996  ;;  %v7058_v38 = vld [vmem:[#allocation3 + $0xc] sm:$0xf] }
 0x56a   : > { %3018 = vst.msk [vmem:[#allocation3 + $0x4] sm:$0xf] %vm3017_vm3, %v2997_v23  ;;  %3471 = vrot.lane.b32.xlu0 %v7049_v5, %s5752_s29  ;;  %3255 = vrot.lane.b32.xlu1 %v7058_v38, %s5751_s28  ;;  %v2999_v52 = vpop.permute.xlu0 %2998  ;;  %v4404_v28 = vld [vmem:[#allocation3 + $0xc] sm:$0x8]  ;;  %v3701_v19 = vrot.slane %v3699_v56, 5  ;;  %v3704_v16 = vrot.slane %v3702_v51, 6  ;;  %v3037_v34 = vpack.i.b16 %v7058_v38, %v7049_v5 }
 0x56b   : > { %v3022_v59 = vsel %vm7054_vm4, %v2999_v52, %v3021_v40  ;;  %v5499_v49 = vrot.slane %v4404_v28, 11  ;;  %v3039_v14 = vshrl.u32 %v7058_v38, 16  ;;  %v3693_v0 = vld [vmem:[#allocation3 + $0xc] sm:$0xe] }
 0x56c   : > { %3023 = vst [vmem:[#allocation3 + $0x8] sm:$0x3] %v3022_v59  ;;  %v3705_v17 = vor.u32 %v3704_v16, %v3701_v19  ;;  %v3725_v47 = vshrl.u32 %v3693_v0, 16  ;;  %v3728_v50 = vshll.u32 %v3693_v0, 16  ;;  %v3054_v24 = vrot.slane %v3037_v34, %v8139_v31 }
 0x56d   : > { %v3003_v37 = vpop.permute.xlu1 %3002  ;;  %v3040_v12 = vpack.i.b16 %v3039_v14, %v3038_v3 }
 0x56e   : > { %3027 = vst.msk [vmem:[#allocation3 + $0x10] sm:$0xf] %vm3017_vm3, %v3003_v37  ;;  %3475 = vrot.lane.b32.xlu1 %v7058_v38, %s5752_s29  ;;  %v3706_v8 = vrot.slane %v3705_v17, 4  ;;  %v3727_v13 = vrot.slane %v3725_v47, 5  ;;  %v3730_v62 = vrot.slane %v3728_v50, 6  ;;  %v7135_v61 = vrot.slane %v3054_v24, %v8140_v4 }
 0x56f   : > { %v3079_v9 = vrot.slane %v3040_v12, %v8139_v31  ;;  %vm8161_vm3 = vcmask 1042432  }
 0x570   : > { %v3731_v5 = vor.u32 %v3730_v62, %v3727_v13  ;;  %v5629_v25 = vcombine.high %v7135_v61, %v7135_v61 }
 0x571   : > { %v3005_v60 = vpop.permute.xlu1 %3004  ;;  %v7068_v45 = vld [vmem:[#allocation3 + $0x4] sm:$0xf]  ;;  %v3087_v40 = vrot.slane %v3079_v9, %v8140_v4  ;;  %v3080_v14 = vcombine.high %v3079_v9, %v8138_v36 }
 0x572   : > { %v3029_v58 = vsel %vm7054_vm4, %v3005_v60, %v3028_v39  ;;  %3253 = vrot.lane.b32.xlu0 %v7068_v45, %s5751_s28  ;;  %v4415_v26 = vrot.slane %v7068_v45, 7  ;;  %v3044_v41 = vshrl.u32 %v7068_v45, 16  ;;  %v3709_v30 = vshll.u32 %v7068_v45, 16  ;;  %vm8162_vm4 = vmmov %vm8161_vm3 }
 0x573   : > { %3030 = vst [vmem:[#allocation3 + $0x14] sm:$0x3] %v3029_v58  ;;  %v4403_v55 = vld [vmem:[#allocation3 + $0x8] sm:$0x7]  ;;  %v3732_v37 = vrot.slane %v3731_v5, 4  ;;  %v5414_v39 = vcombine.low %v3087_v40, %v3087_v40 }
 0x574   : > { %v7088_v7 = vsel %vm7082_vm6, %v5498_v32, %v4415_v26  ;;  %v4417_v44 = vrot.slane %v4415_v26, 4  ;;  %v4418_v11 = vrot.slane %v4403_v55, 7  ;;  %v3708_v33 = vrot.slane %v3044_v41, 5  ;;  %v3692_v48 = vld [vmem:[#allocation3 + $0x8] sm:$0x3] }
 0x575   : > { %v7074_v57 = vld [vmem:[#allocation3 + $0x10] sm:$0xf]  ;;  %v3711_v35 = vrot.slane %v3709_v30, 6  ;;  %v3716_v52 = vshrl.u32 %v3692_v48, 16  ;;  %v3719_v59 = vshll.u32 %v3692_v48, 16  ;;  %v3055_v32 = vcombine.high %v3054_v24, %v8138_v36 }
 0x576   : > { %3473 = vrot.lane.b32.xlu0 %v7068_v45, %s5752_s29  ;;  %3257 = vrot.lane.b32.xlu1 %v7074_v57, %s5751_s28  ;;  %v4422_v63 = vrot.slane %v7074_v57, 7  ;;  %v7110_v22 = vsel %vm7082_vm6, %v4417_v44, %v4418_v11  ;;  %v3045_v43 = vshrl.u32 %v7074_v57, 16  ;;  %v3735_v6 = vshll.u32 %v7074_v57, 16 }
 0x577   : > { %v3712_v21 = vor.u32 %v3711_v35, %v3708_v33  ;;  %v3043_v23 = vpack.i.b16 %v7074_v57, %v7068_v45  ;;  %v3718_v10 = vrot.slane %v3716_v52, 5  ;;  %v3721_v26 = vrot.slane %v3719_v59, 6 }
 0x578   : > { %v7098_v15 = vsel %vm7082_vm6, %v5499_v49, %v4422_v63  ;;  %v4424_v18 = vrot.slane %v4422_v63, 4  ;;  %v3734_v1 = vrot.slane %v3045_v43, 5  ;;  %v3737_v27 = vrot.slane %v3735_v6, 6 }
 0x579   : > { %v7140_v42 = vsel %vm7130_vm2, %v3706_v8, %v3712_v21  ;;  %v3104_v60 = vrot.slane %v3043_v23, %v8139_v31  ;;  %v3046_v28 = vpack.i.b16 %v3045_v43, %v3044_v41  ;;  %v3714_v20 = vrot.slane %v3712_v21, 4 }
 0x57a   : > { %4859 = vrot.lane.b32.xlu0 %v7088_v7, %s5752_s29  ;;  %3477 = vrot.lane.b32.xlu1 %v7074_v57, %s5752_s29  ;;  %v4405_v2 = vld [vmem:[#allocation3 + $0x14] sm:$0x7]  ;;  %v3738_v38 = vor.u32 %v3737_v27, %v3734_v1  ;;  %v5630_v57 = vcombine.high %v3087_v40, %v3087_v40  ;;  %v3722_v63 = vor.u32 %v3721_v26, %v3718_v10  ;;  %v4431_v17 = vshrl.u32 %v7098_v15, 16 }
 0x57b   : > { %v4425_v46 = vrot.slane %v4405_v2, 7  ;;  %v7163_v29 = vrot.slane %v3104_v60, %v8140_v4  ;;  %v3694_v55 = vld [vmem:[#allocation3 + $0x14] sm:$0x3]  ;;  %v3069_v56 = vrot.slane %v3055_v32, %v8140_v4  ;;  %v3129_v51 = vrot.slane %v3046_v28, %v8139_v31 }
 0x57c   : > { %v7157_v58 = vsel %vm7130_vm2, %v3732_v37, %v3738_v38  ;;  %v7177_v44 = vsel %vm7130_vm2, %v3714_v20, %v3722_v63  ;;  %v3742_v45 = vshrl.u32 %v3694_v55, 16  ;;  %v3745_v41 = vshll.u32 %v3694_v55, 16 }
 0x57d   : > { %v7122_v54 = vsel %vm7082_vm6, %v4424_v18, %v4425_v46  ;;  %v5633_v49 = vcombine.high %v7163_v29, %v7163_v29  ;;  %v5417_v11 = vcombine.low %v3069_v56, %v3069_v56  ;;  %v3137_v30 = vrot.slane %v3129_v51, %v8140_v4 }
 0x57e   : > { %4863 = vrot.lane.b32.xlu0 %v7098_v15, %s5752_s29  ;;  %4643 = vrot.lane.b32.xlu1 %v7098_v15, %s5751_s28  ;;  %v3744_v2 = vrot.slane %v3742_v45, 5  ;;  %v3747_v19 = vrot.slane %v3745_v41, 6  ;;  %v5631_v16 = vcombine.high %v3069_v56, %v3069_v56  ;;  %v3740_v46 = vrot.slane %v3738_v38, 4 }
 0x57f   : > { %v5421_v34 = vcombine.low %v3137_v30, %v3137_v30  ;;  %v5634_v33 = vcombine.high %v3137_v30, %v3137_v30  ;;  %v3094_v35 = vrot.slane %v3080_v14, %v8140_v4  ;;  %v3105_v3 = vcombine.high %v3104_v60, %v8138_v36 }
 0x580   : > { %v3748_v0 = vor.u32 %v3747_v19, %v3744_v2  ;;  %v4429_v47 = vpack.i.b16 %v7098_v15, %v7088_v7  ;;  %v3130_v24 = vcombine.high %v3129_v51, %v8138_v36  ;;  %v4430_v21 = vshrl.u32 %v7088_v7, 16 }
 0x581   : > { %v5418_v50 = vcombine.low %v3094_v35, %v3094_v35  ;;  %v3119_v12 = vrot.slane %v3105_v3, %v8140_v4  ;;  %v4435_v6 = vpack.i.b16 %v7122_v54, %v7110_v22  ;;  %v5632_v15 = vcombine.high %v3094_v35, %v3094_v35 }
 0x582   : > { %4639 = vrot.lane.b32.xlu0 %v7088_v7, %s5751_s28  ;;  %4861 = vrot.lane.b32.xlu1 %v7110_v22, %s5752_s29  ;;  %v7193_v18 = vsel %vm7130_vm2, %v3740_v46, %v3748_v0  ;;  %v4432_v43 = vpack.i.b16 %v4431_v17, %v4430_v21  ;;  %v4446_v53 = vrot.slane %v4429_v47, %v8139_v31  ;;  %v4437_v52 = vshrl.u32 %v7122_v54, 16 }
 0x583   : > { %v5424_v8 = vcombine.low %v3119_v12, %v3119_v12  ;;  %v3144_v13 = vrot.slane %v3130_v24, %v8140_v4  ;;  %v4496_v7 = vrot.slane %v4435_v6, %v8139_v31  ;;  %v3752_v62 = vpack.i.b16 %v7157_v58, %v7140_v42 }
 0x584   : > { %v5635_v9 = vcombine.high %v3119_v12, %v3119_v12  ;;  %v7217_v27 = vrot.slane %v4446_v53, %v8140_v4  ;;  %v4471_v48 = vrot.slane %v4432_v43, %v8139_v31  ;;  %v4447_v10 = vcombine.high %v4446_v53, %v8138_v36 }
 0x585   : > { %v5425_v1 = vcombine.low %v3144_v13, %v3144_v13  ;;  %v7223_v5 = vrot.slane %v4496_v7, %v8140_v4  ;;  %v5636_v23 = vcombine.high %v3144_v13, %v3144_v13  ;;  %v4497_v60 = vcombine.high %v4496_v7, %v8138_v36 }
 0x586   : > { %4641 = vrot.lane.b32.xlu0 %v7110_v22, %s5751_s28  ;;  %4865 = vrot.lane.b32.xlu1 %v7122_v54, %s5752_s29  ;;  %v5677_v40 = vcombine.high %v7217_v27, %v7217_v27  ;;  %v4479_v38 = vrot.slane %v4471_v48, %v8140_v4  ;;  %v4436_v26 = vshrl.u32 %v7110_v22, 16  ;;  %v4461_v63 = vrot.slane %v4447_v10, %v8140_v4 }
 0x587   : > { %8147 = vst [vmem:[#allocation10_spill] sm:$0xff] %v7223_v5  ;;  %v5681_v59 = vcombine.high %v7223_v5, %v7223_v5  ;;  %v4511_v20 = vrot.slane %v4497_v60, %v8140_v4  ;;  %v4472_v55 = vcombine.high %v4471_v48, %v8138_v36  ;;  %v3753_v35 = vshrl.u32 %v7140_v42, 16 }
 0x588   : > { %v5500_v37 = vcombine.low %v4479_v38, %v4479_v38  ;;  %v5678_v32 = vcombine.high %v4479_v38, %v4479_v38  ;;  %v5503_v56 = vcombine.low %v4461_v63, %v4461_v63  ;;  %v5679_v30 = vcombine.high %v4461_v63, %v4461_v63 }
 0x589   : > { %v4486_v51 = vrot.slane %v4472_v55, %v8140_v4  ;;  %v3759_v3 = vshrl.u32 %v7177_v44, 16  ;;  %v5683_v12 = vcombine.high %v4511_v20, %v4511_v20 }
 0x58a   : > { %3962 = vrot.lane.b32.xlu0 %v7140_v42, %s5751_s28  ;;  %4645 = vrot.lane.b32.xlu1 %v7122_v54, %s5751_s28  ;;  %v3758_v54 = vpack.i.b16 %v7193_v18, %v7177_v44 }
 0x58b   : > { %v5680_v21 = vcombine.high %v4486_v51, %v4486_v51 }
 0x58c   : > { %v3819_v22 = vrot.slane %v3758_v54, %v8139_v31 }
 0x58e   : > { %4182 = vrot.lane.b32.xlu0 %v7140_v42, %s5752_s29  ;;  %3155 = vrot.lane.b32.xlu1 %v5629_v25, %s5743_s16  ;;  %v3769_v25 = vrot.slane %v3752_v62, %v8139_v31  ;;  %v7257_v41 = vrot.slane %v3819_v22, %v8140_v4 }
 0x590   : > { %v3770_v19 = vcombine.high %v3769_v25, %v8138_v36  ;;  %v5657_v0 = vcombine.high %v7257_v41, %v7257_v41 }
 0x592   : > { %3150 = vrot.lane.b32.xlu0 %v5414_v39, %s5744_s17  ;;  %3966 = vrot.lane.b32.xlu1 %v7157_v58, %s5751_s28  ;;  %v7235_v39 = vrot.slane %v3769_v25, %v8140_v4  ;;  %v3784_v46 = vrot.slane %v3770_v19, %v8140_v4 }
 0x594   : > { %v5653_v28 = vcombine.high %v7235_v39, %v7235_v39 }
 0x596   : > { %3160 = vrot.lane.b32.xlu0 %v5630_v57, %s5742_s15  ;;  %4186 = vrot.lane.b32.xlu1 %v7157_v58, %s5752_s29  ;;  %v4438_v57 = vpack.i.b16 %v4437_v52, %v4436_v26 }
 0x598   : > { %v4521_v45 = vrot.slane %v4438_v57, %v8139_v31 }
 0x59a   : > { %3190 = vrot.lane.b32.xlu1 %v5633_v49, %s5743_s16  ;;  %3964 = vrot.lane.b32.xlu0 %v7177_v44, %s5751_s28  ;;  %v5510_v49 = vcombine.low %v4511_v20, %v4511_v20  ;;  %v4529_v2 = vrot.slane %v4521_v45, %v8140_v4 }
 0x59c   : > { %v5507_v14 = vcombine.low %v4529_v2, %v4529_v2  ;;  %v5682_v47 = vcombine.high %v4529_v2, %v4529_v2 }
 0x59e   : > { %3165 = vrot.lane.b32.xlu1 %v5417_v11, %s5741_s14  ;;  %4184 = vrot.lane.b32.xlu0 %v7177_v44, %s5752_s29  ;;  %v5504_v11 = vcombine.low %v4486_v51, %v4486_v51 }
 0x5a2   : > { %3175 = vrot.lane.b32.xlu1 %v5631_v16, %s5738_s11  ;;  %3185 = vrot.lane.b32.xlu0 %v5421_v34, %s5744_s17  ;;  %v3754_v16 = vshrl.u32 %v7157_v58, 16  ;;  %v3760_v34 = vshrl.u32 %v7193_v18, 16 }
 0x5a4   : > { %v3755_v17 = vpack.i.b16 %v3754_v16, %v3753_v35  ;;  %v3761_v58 = vpack.i.b16 %v3760_v34, %v3759_v3 }
 0x5a6   : > { %3968 = vrot.lane.b32.xlu1 %v7193_v18, %s5751_s28  ;;  %3195 = vrot.lane.b32.xlu0 %v5634_v33, %s5742_s15  ;;  %v4522_v33 = vcombine.high %v4521_v45, %v8138_v36  ;;  %v3794_v42 = vrot.slane %v3755_v17, %v8139_v31  ;;  %v3844_v44 = vrot.slane %v3761_v58, %v8139_v31 }
 0x5a8   : > { %v3802_v6 = vrot.slane %v3794_v42, %v8140_v4  ;;  %v3852_v53 = vrot.slane %v3844_v44, %v8140_v4  ;;  %v3795_v62 = vcombine.high %v3794_v42, %v8138_v36  ;;  %v3845_v60 = vcombine.high %v3844_v44, %v8138_v36 }
 0x5aa   : > { %4188 = vrot.lane.b32.xlu1 %v7193_v18, %s5752_s29  ;;  %3170 = vrot.lane.b32.xlu0 %v5418_v50, %s5740_s13  ;;  %v5459_v18 = vcombine.low %v3784_v46, %v3784_v46  ;;  %v4536_v50 = vrot.slane %v4522_v33, %v8140_v4  ;;  %v5463_v13 = vcombine.low %v3852_v53, %v3852_v53 }
 0x5ab   : > { %v5654_v48 = vcombine.high %v3802_v6, %v3802_v6  ;;  %v5658_v54 = vcombine.high %v3852_v53, %v3852_v53 }
 0x5ac   : > { %v5511_v24 = vcombine.low %v4536_v50, %v4536_v50  ;;  %v5684_v43 = vcombine.high %v4536_v50, %v4536_v50 }
 0x5ae   : > { %3200 = vrot.lane.b32.xlu1 %v5424_v8, %s5741_s14  ;;  %3180 = vrot.lane.b32.xlu0 %v5632_v15, %s5739_s12  ;;  %v3820_v8 = vcombine.high %v3819_v22, %v8138_v36  ;;  %v5456_v15 = vcombine.low %v3802_v6, %v3802_v6  ;;  %v3859_v22 = vrot.slane %v3845_v60, %v8140_v4 }
 0x5b0   : > { %v3834_v7 = vrot.slane %v3820_v8, %v8140_v4  ;;  %v5660_v16 = vcombine.high %v3859_v22, %v3859_v22 }
 0x5b2   : > { %3210 = vrot.lane.b32.xlu1 %v5635_v9, %s5738_s11  ;;  %3205 = vrot.lane.b32.xlu0 %v5425_v1, %s5740_s13  ;;  %v5466_v25 = vcombine.low %v3834_v7, %v3834_v7  ;;  %v5659_v51 = vcombine.high %v3834_v7, %v3834_v7 }
 0x5b6   : > { %4547 = vrot.lane.b32.xlu1 %v5677_v40, %s5743_s16  ;;  %3215 = vrot.lane.b32.xlu0 %v5636_v23, %s5739_s12  ;;  %v3809_v40 = vrot.slane %v3795_v62, %v8140_v4 }
 0x5ba   : > { %4542 = vrot.lane.b32.xlu1 %v5500_v37, %s5744_s17  ;;  %4582 = vrot.lane.b32.xlu0 %v5681_v59, %s5743_s16  ;;  %v5655_v59 = vcombine.high %v3784_v46, %v3784_v46  ;;  %v5460_v37 = vcombine.low %v3809_v40, %v3809_v40 }
 0x5be   : > { %3870 = vrot.lane.b32.xlu1 %v5653_v28, %s5743_s16  ;;  %4552 = vrot.lane.b32.xlu0 %v5678_v32, %s5742_s15  ;;  %v5656_v32 = vcombine.high %v3809_v40, %v3809_v40 }
 0x5c2   : > { %4592 = vrot.lane.b32.xlu1 %v5510_v49, %s5741_s14  ;;  %4557 = vrot.lane.b32.xlu0 %v5503_v56, %s5741_s14 }
 0x5c6   : > { %4562 = vrot.lane.b32.xlu1 %v5504_v11, %s5740_s13  ;;  %4567 = vrot.lane.b32.xlu0 %v5679_v30, %s5738_s11 }
 0x5ca   : > { %4577 = vrot.lane.b32.xlu0 %v5507_v14, %s5744_s17  ;;  %3905 = vrot.lane.b32.xlu1 %v5657_v0, %s5743_s16  ;;  %v5467_v14 = vcombine.low %v3859_v22, %v3859_v22 }
 0x5ce   : > { %4587 = vrot.lane.b32.xlu0 %v5682_v47, %s5742_s15  ;;  %3880 = vrot.lane.b32.xlu1 %v5459_v18, %s5741_s14 }
 0x5d2   : > { %4602 = vrot.lane.b32.xlu0 %v5683_v12, %s5738_s11  ;;  %4597 = vrot.lane.b32.xlu1 %v5511_v24, %s5740_s13 }
 0x5d6   : > { %4572 = vrot.lane.b32.xlu0 %v5680_v21, %s5739_s12  ;;  %4607 = vrot.lane.b32.xlu1 %v5684_v43, %s5739_s12 }
 0x5d8   : > { %v3252_v9 = vpop.permute.xlu0 %3251 }
 0x5d9   : > { %v3262_v10 = vshrl.u32 %v3252_v9, 16 }
 0x5da   : > { %3865 = vrot.lane.b32.xlu0 %v5456_v15, %s5744_s17  ;;  %3900 = vrot.lane.b32.xlu1 %v5463_v13, %s5744_s17 }
 0x5dc   : > { %v3256_v1 = vpop.permute.xlu1 %3255  ;;  %v3472_v52 = vpop.permute.xlu0 %3471 }
 0x5dd   : > { %v3263_v23 = vshrl.u32 %v3256_v1, 16  ;;  %v3261_v38 = vpack.i.b16 %v3256_v1, %v3252_v9  ;;  %v3482_v49 = vshrl.u32 %v3472_v52, 16 }
 0x5de   : > { %3875 = vrot.lane.b32.xlu0 %v5654_v48, %s5742_s15  ;;  %3915 = vrot.lane.b32.xlu1 %v5466_v25, %s5741_s14 }
 0x5df   : > { %v3264_v57 = vpack.i.b16 %v3263_v23, %v3262_v10  ;;  %v3278_v28 = vrot.slane %v3261_v38, %v8139_v31 }
 0x5e0   : > { %v3476_v26 = vpop.permute.xlu1 %3475 }
 0x5e1   : > { %v3481_v20 = vpack.i.b16 %v3476_v26, %v3472_v52  ;;  %v3483_v63 = vshrl.u32 %v3476_v26, 16  ;;  %v7300_v56 = vrot.slane %v3264_v57, %v8139_v31  ;;  %v7303_v45 = vrot.slane %v3278_v28, %v8140_v4 }
 0x5e2   : > { %3890 = vrot.lane.b32.xlu0 %v5655_v59, %s5738_s11  ;;  %3885 = vrot.lane.b32.xlu1 %v5460_v37, %s5740_s13  ;;  %v3279_v18 = vcombine.high %v3278_v28, %v8138_v36 }
 0x5e3   : > { %v3484_v11 = vpack.i.b16 %v3483_v63, %v3482_v49  ;;  %v3498_v30 = vrot.slane %v3481_v20, %v8139_v31  ;;  %v3311_v0 = vrot.slane %v7300_v56, %v8140_v4  ;;  %v5637_v58 = vcombine.high %v7303_v45, %v7303_v45 }
 0x5e4   : > { %v3254_v55 = vpop.permute.xlu0 %3253  ;;  %v3293_v6 = vrot.slane %v3279_v18, %v8140_v4 }
 0x5e5   : > { %v7311_v46 = vrot.slane %v3498_v30, %v8140_v4  ;;  %v7314_v33 = vrot.slane %v3484_v11, %v8139_v31  ;;  %v5428_v50 = vcombine.low %v3311_v0, %v3311_v0  ;;  %v3268_v9 = vshrl.u32 %v3254_v55, 16 }
 0x5e6   : > { %3910 = vrot.lane.b32.xlu0 %v5658_v54, %s5742_s15  ;;  %3895 = vrot.lane.b32.xlu1 %v5656_v32, %s5739_s12  ;;  %v3499_v1 = vcombine.high %v3498_v30, %v8138_v36  ;;  %v5431_v38 = vcombine.low %v3293_v6, %v3293_v6  ;;  %v5638_v37 = vcombine.high %v3311_v0, %v3311_v0 }
 0x5e7   : > { %v5645_v21 = vcombine.high %v7311_v46, %v7311_v46  ;;  %v3531_v43 = vrot.slane %v7314_v33, %v8140_v4 }
 0x5e8   : > { %v3258_v2 = vpop.permute.xlu1 %3257  ;;  %v3474_v19 = vpop.permute.xlu0 %3473  ;;  %v3513_v32 = vrot.slane %v3499_v1, %v8140_v4 }
 0x5e9   : > { %v3267_v34 = vpack.i.b16 %v3258_v2, %v3254_v55  ;;  %v3269_v53 = vshrl.u32 %v3258_v2, 16  ;;  %v5442_v7 = vcombine.low %v3531_v43, %v3531_v43  ;;  %v3488_v59 = vshrl.u32 %v3474_v19, 16 }
 0x5ea   : > { %3925 = vrot.lane.b32.xlu0 %v5659_v51, %s5738_s11  ;;  %3930 = vrot.lane.b32.xlu1 %v5660_v16, %s5739_s12  ;;  %v5646_v54 = vcombine.high %v3531_v43, %v3531_v43  ;;  %v5639_v55 = vcombine.high %v3293_v6, %v3293_v6  ;;  %v5445_v22 = vcombine.low %v3513_v32, %v3513_v32 }
 0x5eb   : > { %v3328_v35 = vrot.slane %v3267_v34, %v8139_v31  ;;  %v3270_v48 = vpack.i.b16 %v3269_v53, %v3268_v9  ;;  %v5647_v51 = vcombine.high %v3513_v32, %v3513_v32  ;;  %v3524_v6 = vcombine.high %v7314_v33, %v8138_v36 }
 0x5ec   : > { %v3478_v3 = vpop.permute.xlu1 %3477  ;;  %v7317_v17 = vpop.permute.xlu0 %4859 }
 0x5ed   : > { %v3487_v47 = vpack.i.b16 %v3478_v3, %v3474_v19  ;;  %v7325_v12 = vrot.slane %v3328_v35, %v8140_v4  ;;  %v3489_v25 = vshrl.u32 %v3478_v3, 16  ;;  %v7360_v60 = vrot.slane %v3270_v48, %v8139_v31 }
 0x5ee   : > { %3920 = vrot.lane.b32.xlu0 %v5467_v14, %s5740_s13  ;;  %3379 = vrot.lane.b32.xlu1 %v5637_v58, %s5743_s16  ;;  %v3329_v11 = vcombine.high %v3328_v35, %v8138_v36  ;;  %v3304_v14 = vcombine.high %v7300_v56, %v8138_v36 }
 0x5ef   : > { %v3548_v24 = vrot.slane %v3487_v47, %v8139_v31  ;;  %v5641_v62 = vcombine.high %v7325_v12, %v7325_v12  ;;  %v3490_v10 = vpack.i.b16 %v3489_v25, %v3488_v59  ;;  %v3361_v49 = vrot.slane %v7360_v60, %v8140_v4 }
 0x5f0   : > { %v7328_v42 = vpop.permute.xlu1 %4643  ;;  %v7330_v44 = vpop.permute.xlu0 %4863  ;;  %v3343_v47 = vrot.slane %v3329_v11, %v8140_v4  ;;  %v3318_v43 = vrot.slane %v3304_v14, %v8140_v4  ;;  %v3538_v25 = vrot.slane %v3524_v6, %v8140_v4 }
 0x5f1   : > { %v7340_v8 = vrot.slane %v3548_v24, %v8140_v4  ;;  %v3573_v28 = vrot.slane %v3490_v10, %v8139_v31  ;;  %v3549_v30 = vcombine.high %v3548_v24, %v8138_v36  ;;  %v5435_v16 = vcombine.low %v3361_v49, %v3361_v49 }
 0x5f2   : > { %3374 = vrot.lane.b32.xlu1 %v5428_v50, %s5744_s17  ;;  %3599 = vrot.lane.b32.xlu0 %v5645_v21, %s5743_s16  ;;  %v5642_v58 = vcombine.high %v3361_v49, %v3361_v49  ;;  %v5438_v21 = vcombine.low %v3343_v47, %v3343_v47  ;;  %v4869_v53 = vpack.i.b16 %v7330_v44, %v7317_v17  ;;  %v4871_v48 = vshrl.u32 %v7330_v44, 16 }
 0x5f3   : > { %v5649_v52 = vcombine.high %v7340_v8, %v7340_v8  ;;  %v3581_v34 = vrot.slane %v3573_v28, %v8140_v4  ;;  %v3563_v18 = vrot.slane %v3549_v30, %v8140_v4  ;;  %v5432_v1 = vcombine.low %v3318_v43, %v3318_v43 }
 0x5f4   : > { %v7342_v15 = vpop.permute.xlu1 %4861  ;;  %v7344_v13 = vpop.permute.xlu0 %4639  ;;  %v5640_v32 = vcombine.high %v3318_v43, %v3318_v43  ;;  %v5446_v30 = vcombine.low %v3538_v25, %v3538_v25 }
 0x5f5   : > { %v5449_v35 = vcombine.low %v3581_v34, %v3581_v34  ;;  %v5452_v56 = vcombine.low %v3563_v18, %v3563_v18  ;;  %v5650_v9 = vcombine.high %v3581_v34, %v3581_v34  ;;  %v4649_v33 = vpack.i.b16 %v7328_v42, %v7344_v13 }
 0x5f6   : > { %3594 = vrot.lane.b32.xlu1 %v5442_v7, %s5744_s17  ;;  %3414 = vrot.lane.b32.xlu0 %v5641_v62, %s5743_s16  ;;  %v5651_v10 = vcombine.high %v3563_v18, %v3563_v18  ;;  %v5648_v34 = vcombine.high %v3538_v25, %v3538_v25 }
 0x5f7   : > { %v4666_v49 = vrot.slane %v4649_v33, %v8139_v31 }
 0x5f8   : > { %v7351_v40 = vpop.permute.xlu1 %4865  ;;  %v7353_v23 = vpop.permute.xlu0 %4641 }
 0x5f9   : > { %v7444_v14 = vrot.slane %v4666_v49, %v8140_v4 }
 0x5fa   : > { %3389 = vrot.lane.b32.xlu1 %v5431_v38, %s5741_s14  ;;  %3634 = vrot.lane.b32.xlu0 %v5649_v52, %s5743_s16  ;;  %v4886_v38 = vrot.slane %v4869_v53, %v8139_v31 }
 0x5fc   : > { %v7362_v26 = vpop.permute.xlu1 %4645  ;;  %v7364_v57 = vpop.permute.xlu0 %3962 }
 0x5fd   : > { %v4655_v33 = vpack.i.b16 %v7362_v26, %v7353_v23 }
 0x5fe   : > { %3604 = vrot.lane.b32.xlu1 %v5646_v54, %s5742_s15  ;;  %3384 = vrot.lane.b32.xlu0 %v5638_v37, %s5742_s15  ;;  %v5643_v37 = vcombine.high %v3343_v47, %v3343_v47  ;;  %v4870_v54 = vshrl.u32 %v7317_v17, 16  ;;  %v3354_v17 = vcombine.high %v7360_v60, %v8138_v36 }
 0x600   : > { %v7370_v20 = vpop.permute.xlu1 %3155  ;;  %v7372_v63 = vpop.permute.xlu0 %4182  ;;  %v4872_v44 = vpack.i.b16 %v4871_v48, %v4870_v54 }
 0x602   : > { %3399 = vrot.lane.b32.xlu1 %v5639_v55, %s5738_s11  ;;  %3609 = vrot.lane.b32.xlu0 %v5445_v22, %s5741_s14  ;;  %v3574_v55 = vcombine.high %v3573_v28, %v8138_v36  ;;  %v7428_v22 = vrot.slane %v4886_v38, %v8140_v4  ;;  %v4650_v28 = vshrl.u32 %v7344_v13, 16 }
 0x604   : > { %v7380_v2 = vpop.permute.xlu1 %3966  ;;  %v7382_v19 = vpop.permute.xlu0 %3150  ;;  %v5693_v18 = vcombine.high %v7428_v22, %v7428_v22  ;;  %v3588_v60 = vrot.slane %v3574_v55, %v8140_v4 }
 0x606   : > { %3619 = vrot.lane.b32.xlu1 %v5647_v51, %s5738_s11  ;;  %3409 = vrot.lane.b32.xlu0 %v5435_v16, %s5744_s17  ;;  %v7440_v16 = vrot.slane %v4872_v44, %v8139_v31 }
 0x608   : > { %v7389_v0 = vpop.permute.xlu1 %4186  ;;  %v7391_v3 = vpop.permute.xlu0 %3160 }
 0x60a   : > { %3629 = vrot.lane.b32.xlu1 %v5449_v35, %s5744_s17  ;;  %3419 = vrot.lane.b32.xlu0 %v5642_v58, %s5742_s15  ;;  %v4875_v35 = vpack.i.b16 %v7351_v40, %v7342_v15 }
 0x60c   : > { %v7397_v50 = vpop.permute.xlu1 %3190  ;;  %v7399_v24 = vpop.permute.xlu0 %3964  ;;  %v7461_v43 = vrot.slane %v4875_v35, %v8139_v31  ;;  %v4887_v35 = vcombine.high %v4886_v38, %v8138_v36  ;;  %v3972_v38 = vpack.i.b16 %v7380_v2, %v7364_v57 }
 0x60e   : > { %3424 = vrot.lane.b32.xlu1 %v5438_v21, %s5741_s14  ;;  %3644 = vrot.lane.b32.xlu0 %v5452_v56, %s5741_s14  ;;  %v4651_v21 = vshrl.u32 %v7328_v42, 16  ;;  %v4919_v56 = vrot.slane %v7440_v16, %v8140_v4  ;;  %v3368_v42 = vrot.slane %v3354_v17, %v8140_v4  ;;  %v7477_v25 = vrot.slane %v7461_v43, %v8140_v4 }
 0x610   : > { %v7408_v7 = vpop.permute.xlu1 %3165  ;;  %v7410_v62 = vpop.permute.xlu0 %4184  ;;  %v4652_v13 = vpack.i.b16 %v4651_v21, %v4650_v28  ;;  %v5528_v54 = vcombine.low %v4919_v56, %v4919_v56  ;;  %v5439_v44 = vcombine.low %v3368_v42, %v3368_v42  ;;  %v5697_v17 = vcombine.high %v7477_v25, %v7477_v25 }
 0x611   : > { %v5644_v28 = vcombine.high %v3368_v42, %v3368_v42  ;;  %v5652_v42 = vcombine.high %v3588_v60, %v3588_v60 }
 0x612   : > { %3639 = vrot.lane.b32.xlu1 %v5650_v9, %s5742_s15  ;;  %3394 = vrot.lane.b32.xlu0 %v5432_v1, %s5740_s13  ;;  %v5453_v9 = vcombine.low %v3588_v60, %v3588_v60  ;;  %v5685_v1 = vcombine.high %v7444_v14, %v7444_v14  ;;  %v7473_v48 = vrot.slane %v4652_v13, %v8139_v31 }
 0x613   : > { %v4901_v60 = vrot.slane %v4887_v35, %v8140_v4 }
 0x614   : > { %v7419_v52 = vpop.permute.xlu1 %3175  ;;  %v7421_v59 = vpop.permute.xlu0 %3185 }
 0x616   : > { %3434 = vrot.lane.b32.xlu1 %v5643_v37, %s5738_s11  ;;  %3654 = vrot.lane.b32.xlu0 %v5651_v10, %s5738_s11 }
 0x618   : > { %v7431_v51 = vpop.permute.xlu1 %3968  ;;  %v7433_v11 = vpop.permute.xlu0 %3195 }
 0x61a   : > { %3614 = vrot.lane.b32.xlu1 %v5446_v30, %s5740_s13  ;;  %3404 = vrot.lane.b32.xlu0 %v5640_v32, %s5739_s12  ;;  %v7488_v32 = vrot.slane %v4655_v33, %v8139_v31  ;;  %v4877_v33 = vshrl.u32 %v7351_v40, 16 }
 0x61c   : > { %v7448_v58 = vpop.permute.xlu1 %4188  ;;  %v7450_v47 = vpop.permute.xlu0 %3170  ;;  %v7504_v21 = vrot.slane %v7488_v32, %v8140_v4 }
 0x61e   : > { %3624 = vrot.lane.b32.xlu1 %v5648_v34, %s5739_s12  ;;  %4987 = vrot.lane.b32.xlu0 %v5693_v18, %s5743_s16  ;;  %v4699_v34 = vrot.slane %v7473_v48, %v8140_v4  ;;  %v4667_v18 = vcombine.high %v4666_v49, %v8138_v36 }
 0x620   : > { %v7463_v6 = vpop.permute.xlu1 %3200  ;;  %v7465_v53 = vpop.permute.xlu0 %3180 }
 0x622   : > { %3649 = vrot.lane.b32.xlu1 %v5453_v9, %s5740_s13  ;;  %4767 = vrot.lane.b32.xlu0 %v5685_v1, %s5743_s16  ;;  %v5514_v1 = vcombine.low %v4699_v34, %v4699_v34 }
 0x624   : > { %v7481_v37 = vpop.permute.xlu1 %3210  ;;  %v7483_v10 = vpop.permute.xlu0 %3205 }
 0x626   : > { %4982 = vrot.lane.b32.xlu1 %v5528_v54, %s5744_s17  ;;  %3429 = vrot.lane.b32.xlu0 %v5439_v44, %s5740_s13  ;;  %v5694_v54 = vcombine.high %v4919_v56, %v4919_v56  ;;  %v4657_v56 = vshrl.u32 %v7362_v26, 16 }
 0x628   : > { %v7490_v55 = vpop.permute.xlu1 %4547  ;;  %v7492_v30 = vpop.permute.xlu0 %3215 }
 0x629   : > { %8148 = vst [vmem:[#allocation20_spill] sm:$0xff] %v7490_v55 }
 0x62a   : > { %5022 = vrot.lane.b32.xlu1 %v5697_v17, %s5743_s16  ;;  %3439 = vrot.lane.b32.xlu0 %v5644_v28, %s5739_s12  ;;  %v5689_v17 = vcombine.high %v7504_v21, %v7504_v21  ;;  %v4681_v28 = vrot.slane %v4667_v18, %v8140_v4 }
 0x62c   : > { %v7506_v13 = vpop.permute.xlu1 %4542  ;;  %v7508_v9 = vpop.permute.xlu0 %4582  ;;  %v5517_v35 = vcombine.low %v4681_v28, %v4681_v28 }
 0x62d   : > { %8149 = vst [vmem:[#allocation26_spill] sm:$0xff] %v7508_v9  ;;  %v4192_v9 = vpack.i.b16 %v7389_v0, %v7372_v63 }
 0x62e   : > { %4762 = vrot.lane.b32.xlu1 %v5514_v1, %s5744_s17  ;;  %3659 = vrot.lane.b32.xlu0 %v5652_v42, %s5739_s12  ;;  %v4876_v1 = vshrl.u32 %v7342_v15, 16  ;;  %v7528_v42 = vrot.slane %v3972_v38, %v8139_v31  ;;  %v4656_v15 = vshrl.u32 %v7353_v23, 16  ;;  %v5695_v23 = vcombine.high %v4901_v60, %v4901_v60 }
 0x62f   : > { %v7547_v38 = vrot.slane %v4192_v9, %v8139_v31 }
 0x630   : > { %v7515_v49 = vpop.permute.xlu1 %3870  ;;  %v7517_v44 = vpop.permute.xlu0 %4552  ;;  %v4878_v40 = vpack.i.b16 %v4877_v33, %v4876_v1  ;;  %v4658_v33 = vpack.i.b16 %v4657_v56, %v4656_v15 }
 0x631   : > { %8150 = vst [vmem:[#allocation23_spill] sm:$0xff] %v7517_v44  ;;  %v5531_v44 = vcombine.low %v4901_v60, %v4901_v60  ;;  %v7562_v9 = vrot.slane %v7547_v38, %v8140_v4  ;;  %v5687_v60 = vcombine.high %v4681_v28, %v4681_v28 }
 0x632   : > { %4992 = vrot.lane.b32.xlu1 %v5694_v54, %s5742_s15  ;;  %4802 = vrot.lane.b32.xlu0 %v5689_v17, %s5743_s16  ;;  %v7540_v26 = vrot.slane %v4878_v40, %v8139_v31  ;;  %v7544_v54 = vrot.slane %v7528_v42, %v8140_v4  ;;  %v7558_v40 = vrot.slane %v4658_v33, %v8139_v31 }
 0x634   : > { %v7532_v5 = vpop.permute.xlu1 %4592  ;;  %v7534_v18 = vpop.permute.xlu0 %4557  ;;  %v4749_v28 = vrot.slane %v7558_v40, %v8140_v4 }
 0x635   : > { %8151 = vst [vmem:[#allocation7_spill] sm:$0xff] %v7532_v5  ;;  %8152 = vst [vmem:[#allocation9_spill] sm:$0xff] %v7534_v18  ;;  %v5686_v5 = vcombine.high %v4699_v34, %v4699_v34  ;;  %v5661_v34 = vcombine.high %v7544_v54, %v7544_v54 }
 0x636   : > { %4777 = vrot.lane.b32.xlu1 %v5517_v35, %s5741_s14  ;;  %4997 = vrot.lane.b32.xlu0 %v5531_v44, %s5741_s14  ;;  %v4969_v44 = vrot.slane %v7540_v26, %v8140_v4 }
 0x638   : > { %v7549_v17 = vpop.permute.xlu1 %4562  ;;  %v7551_v1 = vpop.permute.xlu0 %4567 }
 0x639   : > { %8153 = vst [vmem:[#allocation12_spill] sm:$0xff] %v7549_v17  ;;  %8154 = vst [vmem:[#allocation13_spill] sm:$0xff] %v7551_v1  ;;  %v5669_v1 = vcombine.high %v7562_v9, %v7562_v9 }
 0x63a   : > { %5007 = vrot.lane.b32.xlu1 %v5695_v23, %s5738_s11  ;;  %4772 = vrot.lane.b32.xlu0 %v5686_v5, %s5742_s15  ;;  %v4912_v5 = vcombine.high %v7440_v16, %v8138_v36  ;;  %v5535_v23 = vcombine.low %v4969_v44, %v4969_v44 }
 0x63c   : > { %v7564_v56 = vpop.permute.xlu1 %3905  ;;  %v7566_v35 = vpop.permute.xlu0 %4577  ;;  %v4926_v17 = vrot.slane %v4912_v5, %v8140_v4 }
 0x63d   : > { %8155 = vst [vmem:[#allocation17_spill] sm:$0xff] %v7566_v35  ;;  %v5698_v35 = vcombine.high %v4969_v44, %v4969_v44 }
 0x63e   : > { %4787 = vrot.lane.b32.xlu1 %v5687_v60, %s5738_s11  ;;  %4090 = vrot.lane.b32.xlu0 %v5661_v34, %s5743_s16  ;;  %v4937_v60 = vcombine.high %v7461_v43, %v8138_v36  ;;  %v3974_v43 = vshrl.u32 %v7380_v2, 16  ;;  %v5532_v44 = vcombine.low %v4926_v17, %v4926_v17  ;;  %v4194_v2 = vshrl.u32 %v7389_v0, 16 }
 0x640   : > { %v3881_v15 = vpop.permute.xlu1 %3880  ;;  %v7574_v33 = vpop.permute.xlu0 %4587  ;;  %v4951_v5 = vrot.slane %v4937_v60, %v8140_v4 }
 0x641   : > { %8156 = vst [vmem:[#allocation14_spill] sm:$0xff] %v7574_v33  ;;  %v5521_v33 = vcombine.low %v4749_v28, %v4749_v28 }
 0x642   : > { %5017 = vrot.lane.b32.xlu0 %v5535_v23, %s5744_s17  ;;  %4310 = vrot.lane.b32.xlu1 %v5669_v1, %s5743_s16  ;;  %v4692_v23 = vcombine.high %v7473_v48, %v8138_v36  ;;  %v4717_v1 = vcombine.high %v7488_v32, %v8138_v36  ;;  %v5699_v60 = vcombine.high %v4951_v5, %v4951_v5 }
 0x643   : > { %v5538_v55 = vcombine.low %v4951_v5, %v4951_v5 }
 0x644   : > { %v7584_v34 = vpop.permute.xlu1 %4597  ;;  %v7586_v16 = vpop.permute.xlu0 %4602  ;;  %v7606_v32 = vrot.slane %v4692_v23, %v8140_v4 }
 0x645   : > { %8157 = vst [vmem:[#allocation21_spill] sm:$0xff] %v7584_v34  ;;  %8158 = vst [vmem:[#allocation19_spill] sm:$0xff] %v7586_v16  ;;  %v5690_v16 = vcombine.high %v4749_v28, %v4749_v28 }
 0x646   : > { %5027 = vrot.lane.b32.xlu0 %v5698_v35, %s5742_s15  ;;  %4797 = vrot.lane.b32.xlu1 %v5521_v33, %s5744_s17  ;;  %v3973_v35 = vshrl.u32 %v7364_v57, 16  ;;  %v4731_v33 = vrot.slane %v4717_v1, %v8140_v4  ;;  %v5518_v1 = vcombine.low %v7606_v32, %v7606_v32 }
 0x648   : > { %v7596_v18 = vpop.permute.xlu1 %4607  ;;  %v7598_v34 = vpop.permute.xlu0 %4572  ;;  %v3975_v48 = vpack.i.b16 %v3974_v43, %v3973_v35  ;;  %v5524_v0 = vcombine.low %v4731_v33, %v4731_v33  ;;  %v5691_v35 = vcombine.high %v4731_v33, %v4731_v33 }
 0x649   : > { %8159 = vst [vmem:[#allocation8_spill] sm:$0xff] %v7596_v18  ;;  %8160 = vst [vmem:[#allocation25_spill] sm:$0xff] %v7598_v34  ;;  %v3978_v18 = vpack.i.b16 %v7431_v51, %v7399_v24 }
 0x64a   : > { %5002 = vrot.lane.b32.xlu0 %v5532_v44, %s5740_s13  ;;  %4807 = vrot.lane.b32.xlu1 %v5690_v16, %s5742_s15  ;;  %v4193_v16 = vshrl.u32 %v7372_v63, 16  ;;  %v7617_v23 = vrot.slane %v3975_v48, %v8139_v31  ;;  %v5696_v48 = vcombine.high %v4926_v17, %v4926_v17 }
 0x64b   : > { %v7622_v44 = vrot.slane %v3978_v18, %v8139_v31 }
 0x64c   : > { %v3901_v28 = vpop.permute.xlu1 %3900  ;;  %v3866_v34 = vpop.permute.xlu0 %3865  ;;  %v4195_v43 = vpack.i.b16 %v4194_v2, %v4193_v16  ;;  %v4022_v18 = vrot.slane %v7617_v23, %v8140_v4 }
 0x64d   : > { %v3934_v57 = vsel %vm791_vm8, %v7235_v39, %v3866_v34  ;;  %v4198_v39 = vpack.i.b16 %v7448_v58, %v7410_v62  ;;  %v3949_v17 = vsel %vm791_vm8, %v7257_v41, %v3901_v28 }
 0x64e   : > { %5042 = vrot.lane.b32.xlu0 %v5699_v60, %s5738_s11  ;;  %5032 = vrot.lane.b32.xlu1 %v5538_v55, %s5741_s14  ;;  %v3936_v63 = vsel %vm795_vm9, %v3934_v57, %v7515_v49  ;;  %v7634_v2 = vrot.slane %v4195_v43, %v8139_v31  ;;  %v7638_v60 = vrot.slane %v7622_v44, %v8140_v4 }
 0x64f   : > { %v7641_v49 = vrot.slane %v4198_v39, %v8139_v31  ;;  %v4210_v43 = vcombine.high %v7547_v38, %v8138_v36  ;;  %v5470_v39 = vcombine.low %v4022_v18, %v4022_v18  ;;  %v3951_v41 = vsel %vm795_vm9, %v3949_v17, %v7564_v56 }
 0x650   : > { %v3916_v34 = vpop.permute.xlu1 %3915  ;;  %v3876_v5 = vpop.permute.xlu0 %3875  ;;  %v3990_v56 = vcombine.high %v7528_v42, %v8138_v36 }
 0x651   : > { %v3938_v55 = vsel %vm798_vm10, %v3936_v63, %v3876_v5  ;;  %v7654_v63 = vrot.slane %v7641_v49, %v8140_v4  ;;  %v5665_v5 = vcombine.high %v7638_v60, %v7638_v60 }
 0x652   : > { %4812 = vrot.lane.b32.xlu1 %v5524_v0, %s5741_s14  ;;  %4782 = vrot.lane.b32.xlu0 %v5518_v1, %s5740_s13  ;;  %v3940_v16 = vsel %vm801_vm11, %v3938_v55, %v3881_v15  ;;  %v4242_v55 = vrot.slane %v7634_v2, %v8140_v4 }
 0x654   : > { %v3886_v57 = vpop.permute.xlu1 %3885  ;;  %v3891_v0 = vpop.permute.xlu0 %3890  ;;  %v5484_v17 = vcombine.low %v4242_v55, %v4242_v55 }
 0x655   : > { %v3942_v33 = vsel %vm804_vm12, %v3940_v16, %v3886_v57  ;;  %v3980_v57 = vshrl.u32 %v7431_v51, 16 }
 0x656   : > { %v3944_v1 = vsel %vm807_vm13, %v3942_v33, %v3891_v0  ;;  %4822 = vrot.lane.b32.xlu1 %v5691_v35, %s5738_s11  ;;  %5012 = vrot.lane.b32.xlu0 %v5696_v48, %s5739_s12  ;;  %v5673_v33 = vcombine.high %v7654_v63, %v7654_v63 }
 0x658   : > { %v3896_v15 = vpop.permute.xlu1 %3895  ;;  %v3911_v28 = vpop.permute.xlu0 %3910 }
 0x659   : > { %v7663_v35 = vsel %vm810_vm14, %v3944_v1, %v3896_v15  ;;  %v3953_v38 = vsel %vm798_vm10, %v3951_v41, %v3911_v28  ;;  %v4224_v1 = vrot.slane %v4210_v43, %v8140_v4  ;;  %v3979_v15 = vshrl.u32 %v7399_v24, 16 }
 0x65a   : > { %4085 = vrot.lane.b32.xlu1 %v5470_v39, %s5744_s17  ;;  %4125 = vrot.lane.b32.xlu0 %v5665_v5, %s5743_s16  ;;  %v3955_v48 = vsel %vm801_vm11, %v3953_v38, %v3916_v34  ;;  %v4742_v34 = vcombine.high %v7558_v40, %v8138_v36  ;;  %v5662_v41 = vcombine.high %v4022_v18, %v4022_v18 }
 0x65b   : > { %v3981_v42 = vpack.i.b16 %v3980_v57, %v3979_v15  ;;  %v5487_v28 = vcombine.low %v4224_v1, %v4224_v1  ;;  %v4004_v5 = vrot.slane %v3990_v56, %v8140_v4  ;;  %v4962_v24 = vcombine.high %v7540_v26, %v8138_v36 }
 0x65c   : > { %v3931_v16 = vpop.permute.xlu1 %3930  ;;  %v3926_v0 = vpop.permute.xlu0 %3925  ;;  %v7691_v57 = vrot.slane %v4742_v34, %v8140_v4  ;;  %v4199_v26 = vshrl.u32 %v7410_v62, 16 }
 0x65d   : > { %v7694_v18 = vrot.slane %v3981_v42, %v8139_v31  ;;  %v4040_v42 = vcombine.high %v7622_v44, %v8138_v36 }
 0x65e   : > { %4305 = vrot.lane.b32.xlu0 %v5484_v17, %s5744_s17  ;;  %4345 = vrot.lane.b32.xlu1 %v5673_v33, %s5743_s16  ;;  %v5473_v17 = vcombine.low %v4004_v5, %v4004_v5  ;;  %v5663_v33 = vcombine.high %v4004_v5, %v4004_v5  ;;  %v5525_v34 = vcombine.low %v7691_v57, %v7691_v57 }
 0x65f   : > { %v4072_v62 = vrot.slane %v7694_v18, %v8140_v4 }
 0x660   : > { %v3380_v39 = vpop.permute.xlu1 %3379  ;;  %v3921_v51 = vpop.permute.xlu0 %3920 }
 0x661   : > { %v3957_v38 = vsel %vm804_vm12, %v3955_v48, %v3921_v51  ;;  %v4200_v48 = vshrl.u32 %v7448_v58, 16  ;;  %v4976_v58 = vrot.slane %v4962_v24, %v8140_v4 }
 0x662   : > { %v3959_v43 = vsel %vm807_vm13, %v3957_v38, %v3926_v0  ;;  %4095 = vrot.lane.b32.xlu1 %v5662_v41, %s5742_s15  ;;  %4320 = vrot.lane.b32.xlu0 %v5487_v28, %s5741_s14 }
 0x663   : > { %v7688_v40 = vsel %vm810_vm14, %v3959_v43, %v3931_v16  ;;  %v4201_v51 = vpack.i.b16 %v4200_v48, %v4199_v26  ;;  %v5539_v24 = vcombine.low %v4976_v58, %v4976_v58  ;;  %v5477_v48 = vcombine.low %v4072_v62, %v4072_v62 }
 0x664   : > { %v3375_v56 = vpop.permute.xlu1 %3374  ;;  %v3600_v0 = vpop.permute.xlu0 %3599 }
 0x665   : > { %v3443_v15 = vsel %vm791_vm8, %v7303_v45, %v3375_v56  ;;  %v5670_v45 = vcombine.high %v4242_v55, %v4242_v55  ;;  %v4284_v38 = vrot.slane %v4201_v51, %v8139_v31  ;;  %v4054_v55 = vrot.slane %v4040_v42, %v8140_v4 }
 0x666   : > { %4100 = vrot.lane.b32.xlu1 %v5473_v17, %s5741_s14  ;;  %4110 = vrot.lane.b32.xlu0 %v5663_v33, %s5738_s11  ;;  %v3445_v16 = vsel %vm795_vm9, %v3443_v15, %v3380_v39  ;;  %v5671_v33 = vcombine.high %v4224_v1, %v4224_v1  ;;  %v4015_v42 = vcombine.high %v7617_v23, %v8138_v36 }
 0x667   : > { %v5480_v15 = vcombine.low %v4054_v55, %v4054_v55 }
 0x668   : > { %v3595_v41 = vpop.permute.xlu1 %3594  ;;  %v3415_v28 = vpop.permute.xlu0 %3414  ;;  %v4029_v23 = vrot.slane %v4015_v42, %v8140_v4 }
 0x669   : > { %v3663_v5 = vsel %vm791_vm8, %v7311_v46, %v3595_v41  ;;  %v4260_v46 = vcombine.high %v7641_v49, %v8138_v36  ;;  %v5700_v41 = vcombine.high %v4976_v58, %v4976_v58 }
 0x66a   : > { %4315 = vrot.lane.b32.xlu1 %v5670_v45, %s5742_s15  ;;  %4817 = vrot.lane.b32.xlu0 %v5525_v34, %s5740_s13  ;;  %v3665_v39 = vsel %vm795_vm9, %v3663_v5, %v3600_v0  ;;  %v4292_v0 = vrot.slane %v4284_v38, %v8140_v4 }
 0x66b   : > { %v4274_v45 = vrot.slane %v4260_v46, %v8140_v4 }
 0x66c   : > { %v3390_v43 = vpop.permute.xlu1 %3389  ;;  %v3635_v44 = vpop.permute.xlu0 %3634  ;;  %v5674_v1 = vcombine.high %v4292_v0, %v4292_v0 }
 0x66e   : > { %5037 = vrot.lane.b32.xlu1 %v5539_v24, %s5740_s13  ;;  %4120 = vrot.lane.b32.xlu0 %v5477_v48, %s5744_s17  ;;  %v5491_v24 = vcombine.low %v4292_v0, %v4292_v0  ;;  %v5494_v48 = vcombine.low %v4274_v45, %v4274_v45 }
 0x670   : > { %v3605_v56 = vpop.permute.xlu1 %3604  ;;  %v3385_v17 = vpop.permute.xlu0 %3384 }
 0x671   : > { %v3667_v31 = vsel %vm798_vm10, %v3665_v39, %v3605_v56  ;;  %v3447_v26 = vsel %vm798_vm10, %v3445_v16, %v3385_v17  ;;  %v4235_v16 = vcombine.high %v7634_v2, %v8138_v36 }
 0x672   : > { %4330 = vrot.lane.b32.xlu1 %v5671_v33, %s5738_s11  ;;  %4135 = vrot.lane.b32.xlu0 %v5480_v15, %s5741_s14  ;;  %v3449_v34 = vsel %vm801_vm11, %v3447_v26, %v3390_v43  ;;  %v5666_v33 = vcombine.high %v4072_v62, %v4072_v62  ;;  %v5474_v15 = vcombine.low %v4029_v23, %v4029_v23 }
 0x673   : > { %v4249_v2 = vrot.slane %v4235_v16, %v8140_v4  ;;  %v5667_v62 = vcombine.high %v4054_v55, %v4054_v55 }
 0x674   : > { %v3400_v49 = vpop.permute.xlu1 %3399  ;;  %v3610_v51 = vpop.permute.xlu0 %3609 }
 0x675   : > { %v3669_v5 = vsel %vm801_vm11, %v3667_v31, %v3610_v51  ;;  %v5488_v51 = vcombine.low %v4249_v2, %v4249_v2 }
 0x676   : > { %5047 = vrot.lane.b32.xlu1 %v5700_v41, %s5739_s12  ;;  %4350 = vrot.lane.b32.xlu0 %v5674_v1, %s5742_s15 }
 0x678   : > { %v3620_v39 = vpop.permute.xlu1 %3619  ;;  %v3410_v43 = vpop.permute.xlu0 %3409 }
 0x679   : > { %v3458_v58 = vsel %vm791_vm8, %v7325_v12, %v3410_v43  ;;  %v5675_v43 = vcombine.high %v4274_v45, %v4274_v45 }
 0x67a   : > { %4340 = vrot.lane.b32.xlu1 %v5491_v24, %s5744_s17  ;;  %4355 = vrot.lane.b32.xlu0 %v5494_v48, %s5741_s14  ;;  %v3460_v46 = vsel %vm795_vm9, %v3458_v58, %v3415_v28  ;;  %v4065_v28 = vcombine.high %v7694_v18, %v8138_v36 }
 0x67c   : > { %v3630_v56 = vpop.permute.xlu1 %3629  ;;  %v3420_v17 = vpop.permute.xlu0 %3419  ;;  %v4079_v24 = vrot.slane %v4065_v28, %v8140_v4 }
 0x67d   : > { %v3678_v0 = vsel %vm791_vm8, %v7340_v8, %v3630_v56  ;;  %v3462_v31 = vsel %vm798_vm10, %v3460_v46, %v3420_v17  ;;  %v4285_v8 = vcombine.high %v4284_v38, %v8138_v36  ;;  %v3219_v36 = vsel %vm791_vm8, %v7135_v61, %v7382_v19 }
 0x67e   : > { %4130 = vrot.lane.b32.xlu1 %v5666_v33, %s5742_s15  ;;  %4105 = vrot.lane.b32.xlu0 %v5474_v15, %s5740_s13  ;;  %v3680_v12 = vsel %vm795_vm9, %v3678_v0, %v3635_v44  ;;  %v5664_v44 = vcombine.high %v4029_v23, %v4029_v23  ;;  %v5672_v23 = vcombine.high %v4249_v2, %v4249_v2 }
 0x67f   : > { %v5481_v46 = vcombine.low %v4079_v24, %v4079_v24  ;;  %v4299_v56 = vrot.slane %v4285_v8, %v8140_v4  ;;  %v5668_v28 = vcombine.high %v4079_v24, %v4079_v24 }
 0x680   : > { %v3425_v26 = vpop.permute.xlu1 %3424  ;;  %v3645_v42 = vpop.permute.xlu0 %3644 }
 0x681   : > { %v7751_v41 = vsel %vm801_vm11, %v3462_v31, %v3425_v26  ;;  %v5495_v15 = vcombine.low %v4299_v56, %v4299_v56  ;;  %v5676_v61 = vcombine.high %v4299_v56, %v4299_v56 }
 0x682   : > { %4145 = vrot.lane.b32.xlu1 %v5667_v62, %s5738_s11  ;;  %4325 = vrot.lane.b32.xlu0 %v5488_v51, %s5740_s13 }
 0x684   : > { %v3640_v1 = vpop.permute.xlu1 %3639  ;;  %v3395_v16 = vpop.permute.xlu0 %3394 }
 0x685   : > { %v3682_v18 = vsel %vm798_vm10, %v3680_v12, %v3640_v1  ;;  %v3451_v55 = vsel %vm804_vm12, %v3449_v34, %v3395_v16  ;;  %v3221_v34 = vsel %vm795_vm9, %v3219_v36, %v7370_v20 }
 0x686   : > { %4365 = vrot.lane.b32.xlu1 %v5675_v43, %s5738_s11  ;;  %4115 = vrot.lane.b32.xlu0 %v5664_v44, %s5739_s12  ;;  %v3453_v48 = vsel %vm807_vm13, %v3451_v55, %v3400_v49  ;;  %v3684_v58 = vsel %vm801_vm11, %v3682_v18, %v3645_v42  ;;  %v3223_v49 = vsel %vm798_vm10, %v3221_v34, %v7391_v3  ;;  %s5273_s11 = sshll.u32 %s8188_s25, 1 }
 0x687   : > { %v3225_v19 = vsel %vm801_vm11, %v3223_v49, %v7408_v7  ;;  %v5692_v7 = vcombine.high %v7691_v57, %v7691_v57  ;;  %v5138_v57 = vld [vmem:[%s7970_s6] sm:$0x3]  ;;  %v3234_v43 = vsel %vm791_vm8, %v7163_v29, %v7421_v59  ;;  %s276_s14 = scalar_lea.vmem %s7971_s7, %s5273_s11 }
 0x688   : > { %v3435_v38 = vpop.permute.xlu1 %3434  ;;  %v3655_v45 = vpop.permute.xlu0 %3654  ;;  %v3227_v0 = vsel %vm804_vm12, %v3225_v19, %v7450_v47 }
 0x68a   : > { %4335 = vrot.lane.b32.xlu1 %v5672_v23, %s5739_s12  ;;  %4140 = vrot.lane.b32.xlu0 %v5481_v46, %s5740_s13 }
 0x68c   : > { %v3615_v17 = vpop.permute.xlu1 %3614  ;;  %v3405_v33 = vpop.permute.xlu0 %3404 }
 0x68d   : > { %v3671_v2 = vsel %vm804_vm12, %v3669_v5, %v3615_v17  ;;  %v3455_v4 = vsel %vm810_vm14, %v3453_v48, %v3405_v33  ;;  %v3229_v5 = vsel %vm807_vm13, %v3227_v0, %v7419_v52  ;;  %v5090_v17 = vrot.slane %v7688_v40, 5 }
 0x68e   : > { %4360 = vrot.lane.b32.xlu1 %v5495_v15, %s5740_s13  ;;  %4370 = vrot.lane.b32.xlu0 %v5676_v61, %s5739_s12  ;;  %v3673_v20 = vsel %vm807_vm13, %v3671_v2, %v3620_v39  ;;  %v5081_v3 = vrot.slane %v3455_v4, 7  ;;  %v3231_v47 = vsel %vm810_vm14, %v3229_v5, %v7465_v53  ;;  %v5089_v39 = vrot.slane %v7663_v35, 5 }
 0x68f   : > { %v5688_v53 = vcombine.high %v7606_v32, %v7606_v32 }
 0x690   : > { %v3625_v31 = vpop.permute.xlu1 %3624  ;;  %v4988_v12 = vpop.permute.xlu0 %4987  ;;  %v5108_v62 = vsel %vm2672_vm15, %v3231_v47, %v5081_v3 }
 0x691   : > { %v3675_v26 = vsel %vm810_vm14, %v3673_v20, %v3625_v31 }
 0x692   : > { %v5085_v42 = vrot.slane %v3675_v26, 6  ;;  %4150 = vrot.lane.b32.xlu1 %v5668_v28, %s5739_s12  ;;  %4827 = vrot.lane.b32.xlu0 %v5692_v7, %s5739_s12 }
 0x694   : > { %v5112_v52 = vsel %vm295_vm0, %v5108_v62, %v5085_v42  ;;  %v3650_v51 = vpop.permute.xlu1 %3649  ;;  %v4768_v8 = vpop.permute.xlu0 %4767 }
 0x695   : > { %v3686_v1 = vsel %vm804_vm12, %v3684_v58, %v3650_v51  ;;  %v7801_v16 = vsel %vm8161_vm3, %v5112_v52, %v5089_v39  ;;  %v3236_v58 = vsel %vm795_vm9, %v3234_v43, %v7397_v50 }
 0x696   : > { %4792 = vrot.lane.b32.xlu1 %v5688_v53, %s5739_s12  ;;  %5141 = vperm.xlu0 %5726, %v5138_v57   ;;  %v3688_v35 = vsel %vm807_vm13, %v3686_v1, %v3655_v45  ;;  %v3238_v36 = vsel %vm798_vm10, %v3236_v58, %v7433_v11 }
 0x697   : > { %v3240_v59 = vsel %vm801_vm11, %v3238_v36, %v7463_v6 }
 0x698   : > { %v4983_v44 = vpop.permute.xlu1 %4982  ;;  %v3430_v24 = vpop.permute.xlu0 %3429 }
 0x699   : > { %v5051_v18 = vsel %vm791_vm8, %v7428_v22, %v4983_v44  ;;  %v3466_v32 = vsel %vm804_vm12, %v7751_v41, %v3430_v24  ;;  %v3242_v41 = vsel %vm804_vm12, %v3240_v59, %v7483_v10 }
 0x69a   : > { %v3468_v55 = vsel %vm807_vm13, %v3466_v32, %v3435_v38  ;;  %v5053_v48 = vsel %vm795_vm9, %v5051_v18, %v4988_v12  ;;  %v3244_v56 = vsel %vm807_vm13, %v3242_v41, %v7481_v37 }
 0x69b   : > { %v3246_v34 = vsel %vm810_vm14, %v3244_v56, %v7492_v30 }
 0x69c   : > { %v5023_v45 = vpop.permute.xlu1 %5022  ;;  %v3440_v29 = vpop.permute.xlu0 %3439 }
 0x69d   : > { %v3470_v22 = vsel %vm810_vm14, %v3468_v55, %v3440_v29 }
 0x69e   : > { %v5082_v23 = vrot.slane %v3470_v22, 7 }
 0x6a0   : > { %v4763_v38 = vpop.permute.xlu1 %4762  ;;  %v3660_v46 = vpop.permute.xlu0 %3659  ;;  %v5110_v10 = vsel %vm2672_vm15, %v3246_v34, %v5082_v23 }
 0x6a1   : > { %v4831_v50 = vsel %vm791_vm8, %v7444_v14, %v4763_v38  ;;  %v3690_v11 = vsel %vm810_vm14, %v3688_v35, %v3660_v46 }
 0x6a2   : > { %v5086_v6 = vrot.slane %v3690_v11, 6  ;;  %v4833_v49 = vsel %vm795_vm9, %v4831_v50, %v4768_v8 }
 0x6a4   : > { %v5114_v33 = vsel %vm295_vm0, %v5110_v10, %v5086_v6  ;;  %v4993_v15 = vpop.permute.xlu1 %4992  ;;  %v4803_v61 = vpop.permute.xlu0 %4802  ;;  %vm8172_vm0 = vcmask 1043456  }
 0x6a5   : > { %v5055_v37 = vsel %vm798_vm10, %v5053_v48, %v4993_v15  ;;  %v7836_v14 = vsel %vm8162_vm4, %v5114_v33, %v5090_v17 }
 0x6a8   : > { %v4778_v19 = vpop.permute.xlu1 %4777  ;;  %v4998_v2 = vpop.permute.xlu0 %4997 }
 0x6a9   : > { %v5057_v23 = vsel %vm801_vm11, %v5055_v37, %v4998_v2 }
 0x6ac   : > { %v5008_v4 = vpop.permute.xlu1 %5007  ;;  %v4773_v30 = vpop.permute.xlu0 %4772 }
 0x6ad   : > { %v4835_v0 = vsel %vm798_vm10, %v4833_v49, %v4773_v30 }
 0x6ae   : > { %v4837_v20 = vsel %vm801_vm11, %v4835_v0, %v4778_v19  ;;  %v4611_v0 = vsel %vm791_vm8, %v7217_v27, %v7506_v13  ;;  %v8165_v13 = vld [vmem:[#allocation9_spill] sm:$0xff] }
 0x6b0   : > { %v4788_v40 = vpop.permute.xlu1 %4787  ;;  %v4091_v3 = vpop.permute.xlu0 %4090 }
 0x6b4   : > { %v4311_v31 = vpop.permute.xlu1 %4310  ;;  %v5018_v12 = vpop.permute.xlu0 %5017 }
 0x6b5   : > { %v5066_v59 = vsel %vm791_vm8, %v7477_v25, %v5018_v12 }
 0x6b6   : > { %v5068_v38 = vsel %vm795_vm9, %v5066_v59, %v5023_v45 }
 0x6b8   : > { %v4798_v28 = vpop.permute.xlu1 %4797  ;;  %v5028_v7 = vpop.permute.xlu0 %5027 }
 0x6b9   : > { %v4846_v5 = vsel %vm791_vm8, %v7504_v21, %v4798_v28  ;;  %v5070_v46 = vsel %vm798_vm10, %v5068_v38, %v5028_v7  ;;  %v8170_v38 = vld [vmem:[#allocation26_spill] sm:$0xff] }
 0x6ba   : > { %v4848_v26 = vsel %vm795_vm9, %v4846_v5, %v4803_v61 }
 0x6bc   : > { %v4808_v47 = vpop.permute.xlu1 %4807  ;;  %v5003_v42 = vpop.permute.xlu0 %5002 }
 0x6bd   : > { %v4850_v39 = vsel %vm798_vm10, %v4848_v26, %v4808_v47  ;;  %v5059_v56 = vsel %vm804_vm12, %v5057_v23, %v5003_v42  ;;  %v8164_v42 = vld [vmem:[#allocation23_spill] sm:$0xff] }
 0x6be   : > { %v5061_v49 = vsel %vm807_vm13, %v5059_v56, %v5008_v4 }
 0x6c0   : > { %v5033_v62 = vpop.permute.xlu1 %5032  ;;  %v5043_v57 = vpop.permute.xlu0 %5042 }
 0x6c1   : > { %v5072_v50 = vsel %vm801_vm11, %v5070_v46, %v5033_v62  ;;  %v8166_v62 = vld [vmem:[#allocation12_spill] sm:$0xff]  ;;  %v8171_v46 = vld [vmem:[#allocation25_spill] sm:$0xff] }
 0x6c4   : > { %v4813_v52 = vpop.permute.xlu1 %4812  ;;  %v4783_v51 = vpop.permute.xlu0 %4782 }
 0x6c5   : > { %v7845_v8 = vsel %vm801_vm11, %v4850_v39, %v4813_v52  ;;  %v4839_v53 = vsel %vm804_vm12, %v4837_v20, %v4783_v51  ;;  %v8168_v52 = vld [vmem:[#allocation10_spill] sm:$0xff] }
 0x6c6   : > { %v7849_v1 = vsel %vm807_vm13, %v4839_v53, %v4788_v40 }
 0x6c8   : > { %v7851_v35 = vpop.permute.xlu1 %4822  ;;  %v5013_v21 = vpop.permute.xlu0 %5012 }
 0x6c9   : > { %v5063_v25 = vsel %vm810_vm14, %v5061_v49, %v5013_v21 }
 0x6ca   : > { %v5147_v15 = vsel %vm2672_vm15, %v5063_v25, 0 }
 0x6cc   : > { %v4086_v43 = vpop.permute.xlu1 %4085  ;;  %v7853_v44 = vpop.permute.xlu0 %4125 }
 0x6cd   : > { %v4154_v19 = vsel %vm791_vm8, %v7544_v54, %v4086_v43  ;;  %v8163_v54 = vld [vmem:[#allocation20_spill] sm:$0xff] }
 0x6ce   : > { %v4156_v20 = vsel %vm795_vm9, %v4154_v19, %v4091_v3  ;;  %v4613_v26 = vsel %vm795_vm9, %v4611_v0, %v8163_v54  ;;  %v8176_v0 = vld [vmem:[#allocation21_spill] sm:$0xff] }
 0x6cf   : > { %v4615_v27 = vsel %vm798_vm10, %v4613_v26, %v8164_v42 }
 0x6d0   : > { %v4346_v24 = vpop.permute.xlu1 %4345  ;;  %v4306_v18 = vpop.permute.xlu0 %4305  ;;  %v4617_v3 = vsel %vm801_vm11, %v4615_v27, %v8165_v13 }
 0x6d1   : > { %v4374_v30 = vsel %vm791_vm8, %v7562_v9, %v4306_v18 }
 0x6d2   : > { %v4376_v28 = vsel %vm795_vm9, %v4374_v30, %v4311_v31  ;;  %v4619_v31 = vsel %vm804_vm12, %v4617_v3, %v8166_v62 }
 0x6d4   : > { %v4096_v32 = vpop.permute.xlu1 %4095  ;;  %v4321_v55 = vpop.permute.xlu0 %4320 }
 0x6d5   : > { %v4158_v40 = vsel %vm798_vm10, %v4156_v20, %v4096_v32 }
 0x6d8   : > { %v4101_v48 = vpop.permute.xlu1 %4100  ;;  %v4111_v58 = vpop.permute.xlu0 %4110 }
 0x6d9   : > { %v4160_v12 = vsel %vm801_vm11, %v4158_v40, %v4101_v48 }
 0x6dc   : > { %v4316_v36 = vpop.permute.xlu1 %4315  ;;  %v7855_v29 = vpop.permute.xlu0 %4817 }
 0x6dd   : > { %v4378_v47 = vsel %vm798_vm10, %v4376_v28, %v4316_v36  ;;  %v8178_v28 = vld [vmem:[#allocation19_spill] sm:$0xff] }
 0x6de   : > { %v4380_v53 = vsel %vm801_vm11, %v4378_v47, %v4321_v55 }
 0x6e0   : > { %v5038_v22 = vpop.permute.xlu1 %5037  ;;  %v4121_v41 = vpop.permute.xlu0 %4120 }
 0x6e1   : > { %v5074_v6 = vsel %vm804_vm12, %v5072_v50, %v5038_v22  ;;  %v4169_v32 = vsel %vm791_vm8, %v7638_v60, %v4121_v41  ;;  %v8169_v22 = vld [vmem:[#allocation13_spill] sm:$0xff] }
 0x6e2   : > { %v5076_v10 = vsel %vm807_vm13, %v5074_v6, %v5043_v57  ;;  %v8167_v57 = vld [vmem:[#allocation17_spill] sm:$0xff]  ;;  %v4621_v23 = vsel %vm807_vm13, %v4619_v31, %v8169_v22  ;;  %v4171_v56 = vsel %vm795_vm9, %v4169_v32, %v7853_v44  ;;  %v8173_v6 = vld [vmem:[#allocation14_spill] sm:$0xff]  ;;  %v8186_v22 = vld [vmem:[#allocation4_spill] sm:$0xff] }
 0x6e3   : > { %v4626_v51 = vsel %vm791_vm8, %v8168_v52, %v8167_v57 }
 0x6e4   : > { %v4331_v11 = vpop.permute.xlu1 %4330  ;;  %v4136_v34 = vpop.permute.xlu0 %4135  ;;  %v4628_v55 = vsel %vm795_vm9, %v4626_v51, %v8170_v38 }
 0x6e5   : > { %v4630_v49 = vsel %vm798_vm10, %v4628_v55, %v8173_v6 }
 0x6e8   : > { %v5048_v17 = vpop.permute.xlu1 %5047  ;;  %v4351_v33 = vpop.permute.xlu0 %4350 }
 0x6e9   : > { %v5078_v45 = vsel %vm810_vm14, %v5076_v10, %v5048_v17 }
 0x6ea   : > { %5542 = vmatprep.subr.msk.bf16.mxu0 %vm2672_vm15, %v5078_v45 }
 0x6eb   : > { %5164 = vmatpush1.bf16.msra.mxu0 %v5147_v15 }
 0x6ec   : > { %v4341_v61 = vpop.permute.xlu1 %4340  ;;  %v4356_v37 = vpop.permute.xlu0 %4355 }
 0x6ed   : > { %v4389_v39 = vsel %vm791_vm8, %v7654_v63, %v4341_v61  ;;  %v8174_v61 = vld [vmem:[#allocation7_spill] sm:$0xff]  ;;  %vm8175_vm8 = vcmask 1044480  }
 0x6ee   : > { %v4391_v36 = vsel %vm795_vm9, %v4389_v39, %v4346_v24  ;;  %v4632_v44 = vsel %vm801_vm11, %v4630_v49, %v8174_v61  ;;  %vm8177_vm9 = vcmask 1045504  }
 0x6ef   : > { %v4393_v25 = vsel %vm798_vm10, %v4391_v36, %v4351_v33  ;;  %v4634_v33 = vsel %vm804_vm12, %v4632_v44, %v8176_v0 }
 0x6f0   : > { %v4131_v2 = vpop.permute.xlu1 %4130  ;;  %v4106_v4 = vpop.permute.xlu0 %4105 }
 0x6f1   : > { %v4162_v9 = vsel %vm804_vm12, %v4160_v12, %v4106_v4  ;;  %v4173_v17 = vsel %vm798_vm10, %v4171_v56, %v4131_v2  ;;  %v4854_v12 = vsel %vm804_vm12, %v7845_v8, %v7855_v29  ;;  %vm8180_vm10 = vmmov %vm8172_vm0 }
 0x6f2   : > { %v4164_v43 = vsel %vm807_vm13, %v4162_v9, %v4111_v58  ;;  %v4623_v58 = vsel %vm810_vm14, %v4621_v23, %v8171_v46  ;;  %v8179_v9 = vld [vmem:[#allocation8_spill] sm:$0xff]  ;;  %v4856_v13 = vsel %vm807_vm13, %v4854_v12, %v7851_v35 }
 0x6f3   : > { %v5101_v15 = vrot.slane %v4623_v58, 2 }
 0x6f4   : > { %v4146_v7 = vpop.permute.xlu1 %4145  ;;  %v4326_v5 = vpop.permute.xlu0 %4325 }
 0x6f5   : > { %v4382_v48 = vsel %vm804_vm12, %v4380_v53, %v4326_v5 }
 0x6f6   : > { %v4384_v50 = vsel %vm807_vm13, %v4382_v48, %v4331_v11  ;;  %v4175_v11 = vsel %vm801_vm11, %v4173_v17, %v4136_v34  ;;  %v4636_v34 = vsel %vm807_vm13, %v4634_v33, %v8178_v28 }
 0x6f7   : > { %v4638_v42 = vsel %vm810_vm14, %v4636_v34, %v8179_v9 }
 0x6f8   : > { %v4366_v21 = vpop.permute.xlu1 %4365  ;;  %v4116_v18 = vpop.permute.xlu0 %4115  ;;  %v5102_v39 = vrot.slane %v4638_v42, 2 }
 0x6f9   : > { %v4166_v63 = vsel %vm810_vm14, %v4164_v43, %v4116_v18  ;;  %v5753_v43 = vmov 1966171168  }
 0x6fa   : > { %v5093_v59 = vrot.slane %v4166_v63, 4 }
 0x6fc   : > { %v5120_v60 = vsel %vm8172_vm0, %v7801_v16, %v5093_v59  ;;  %v4336_v41 = vpop.permute.xlu1 %4335  ;;  %v4141_v24 = vpop.permute.xlu0 %4140  ;;  %v4395_v16 = vsel %vm801_vm11, %v4393_v25, %v4356_v37  ;;  %vm8181_vm11 = vmmov %vm8175_vm8 }
 0x6fd   : > { %v4386_v10 = vsel %vm810_vm14, %v4384_v50, %v4336_v41  ;;  %v4177_v2 = vsel %vm804_vm12, %v4175_v11, %v4141_v24 }
 0x6fe   : > { %v5097_v45 = vrot.slane %v4386_v10, 3  ;;  %v4179_v26 = vsel %vm807_vm13, %v4177_v2, %v4146_v7 }
 0x700   : > { %v5124_v19 = vsel %vm8175_vm8, %v5120_v60, %v5097_v45  ;;  %v4361_v4 = vpop.permute.xlu1 %4360  ;;  %v4371_v30 = vpop.permute.xlu0 %4370 }
 0x701   : > { %v4397_v20 = vsel %vm804_vm12, %v4395_v16, %v4361_v4  ;;  %v5128_v40 = vsel %vm8177_vm9, %v5124_v19, %v5101_v15  ;;  %vm8182_vm12 = vmmov %vm8177_vm9 }
 0x702   : > { %v4399_v37 = vsel %vm807_vm13, %v4397_v20, %v4366_v21  ;;  %vm8183_vm13 = vcmask 1046528  }
 0x703   : > { %v4401_v5 = vsel %vm810_vm14, %v4399_v37, %v4371_v30  ;;  %vm8184_vm15 = vmmov %vm8183_vm13 }
 0x704   : > { %v4151_v54 = vpop.permute.xlu1 %4150  ;;  %v4828_v47 = vpop.permute.xlu0 %4827  ;;  %v5098_v3 = vrot.slane %v4401_v5, 3 }
 0x705   : > { %v4181_v27 = vsel %vm810_vm14, %v4179_v26, %v4151_v54  ;;  %v4858_v29 = vsel %vm810_vm14, %v4856_v13, %v4828_v47 }
 0x706   : > { %v5094_v8 = vrot.slane %v4181_v27, 4  ;;  %v5106_v57 = vrot.slane %v4858_v29, 1 }
 0x708   : > { %v5122_v62 = vsel %vm8180_vm10, %v7836_v14, %v5094_v8  ;;  %v4793_v31 = vpop.permute.xlu1 %4792  ;;  %v5137_v14 = vld [vmem:[%s7969_s5] sm:$0x1] }
 0x709   : > { %v4843_v7 = vsel %vm810_vm14, %v7849_v1, %v4793_v31  ;;  %v5126_v52 = vsel %vm8181_vm11, %v5122_v62, %v5098_v3  ;;  %v5198_v1 = vunpack.c.l.s4 %v5753_v43 }
 0x70a   : > { %v5105_v51 = vrot.slane %v4843_v7, 1  ;;  %v5130_v53 = vsel %vm8182_vm12, %v5126_v52, %v5102_v39 }
 0x70b   : > { %v5135_v35 = vsel %vm8183_vm13, %v5130_v53, %v5106_v57  ;;  %v5199_v18 = vunpack.c.0.s8 %v5198_v1 }
 0x70c   : > { %5165 = vmatprep.subr.bf16.mxu0 %v5135_v35  ;;  %v5132_v21 = vsel %vm8184_vm15, %v5128_v40, %v5105_v51 }
 0x70d   : > { %5166 = vmatpush1.bf16.msra.mxu0 %v5132_v21  ;;  %v5202_v23 = vsub.s32 %v5199_v18, %v8186_v22 }
 0x710   : > { %5543 = vmatmul.mubr.msk.bf16.vlgmr.msra.gmra.mxu0 %vm8185_vm1, %v5137_v14 }
 0x711   : > { %v5142_v48 = vpop.permute.xlu0 %5141 }
 0x7d0   : > { %v5185_v32 = vpop.f32.mrf.mxu0 }
 0x7d1   : > { %v5186_v36 = vadd.f32 %v5185_v32, %v5142_v48 }
 0x7d2   : > { %v5187_v63 = vpop.f32.mrf.mxu0 }
 0x7d3   : > { %v5188_v59 = vadd.f32 %v5187_v63, %v5142_v48 }
 0x7d4   : > { %v5189_v38 = vpop.f32.mrf.mxu0 }
 0x7d5   : > { %v5544_v55 = vpack.c.bf16 %v5188_v59, %v5186_v36 }
 0x7d6   : > { %v5190_v46 = vpop.f32.mrf.mxu0 }
 0x7d7   : > { %v5203_v58 = vrot.slane %v5544_v55, %v5202_v23 }
 0x7d9   : > { %5545 = vst.sshfl [vmem:[%s276_s14] sm:$0x5 pattern:$0x73625140] %v5203_v58 }
 0x7da PF: > { %s17_s24 = sadd.s32 1, %s5735_s24  }
 0x7db   : > { %p14_p4 = scmp.ge.s32.totalorder %s17_s24, 4  }
 0x7dd   :  { %16 = sbr.rel (!%p14_p4) target bundleno = 1 (0x1), region = 78 }

</bundles_post_ra>
